<compile_context>
chip_gen: v5e
topology: v5e:2x2
jax: 0.10.0
libtpu: 0.0.40
codegen_flags: <defaults>
</compile_context>

<pallas_src>
import numpy as np

import jax
import jax.numpy as jnp
from jax.experimental import pallas as pl
from jax.experimental.pallas import tpu as pltpu

CIN, C1, C2, C_INTER, C_AUX_INTER, NUM_CLASSES = 4, 8, 16, 8, 4, 3


# ---------------------------------------------------------------------------
# In-kernel building blocks (operate on VMEM-resident traced values)
# ---------------------------------------------------------------------------
def _affine_relu(y, scale, shift):
    return jnp.maximum(y * scale + shift, 0.0)


def _conv3x3_s2(xe, xo, wps):
    """Direct stride-2 SAME 3x3 conv from a column-phase-split, row-padded input.

    xe:  (N, hin+2, win//2,     C)  even input columns 0,2,...    (rows zero-padded)
    xo:  (N, hin+2, win//2 + 1, C)  columns -1(zero pad),1,3,...  (rows zero-padded)
    wps: (9*C + 2, Cout)            packed [im2col weight ; scale ; shift]
    returns (N * hin//2 * win//2, Cout), rows ordered (n, i, j), ReLU applied.
    """
    N, R, wo, C = xe.shape
    hout = (R - 2) // 2
    # column taps are plain contiguous slices of the phase-split input
    col_tap = {0: xo[:, :, 0:wo, :],        # input col 2j-1
               1: xe[:, :, 0:wo, :],        # input col 2j
               2: xo[:, :, 1:wo + 1, :]}    # input col 2j+1
    taps = []
    for dy in range(3):
        for dx in range(3):
            t = col_tap[dx][:, dy:dy + 2 * hout, :, :]         # (N, 2*hout, wo, C)
            # stride-2 row selection via leading-dim split (lane dim untouched)
            t = t.reshape(N, hout, 2, wo, C)[:, :, 0, :, :]    # rows 2i+dy (padded)
            taps.append(t)
    patches = jnp.concatenate(taps, axis=3).reshape(N * hout * wo, 9 * C)
    y = jnp.dot(patches, wps[0:9 * C], preferred_element_type=jnp.float32)
    return _affine_relu(y, wps[9 * C:9 * C + 1], wps[9 * C + 1:9 * C + 2])


def _conv3x3_s1(x4, wps):
    """SAME stride-1 3x3 conv on x4=(N, h, w, C) as one im2col GEMM + affine + ReLU."""
    N, h, w, C = x4.shape
    zr = jnp.zeros((N, 1, w, C), jnp.float32)
    xp = jnp.concatenate([zr, x4, zr], axis=1)                  # (N, h+2, w,   C)
    zc = jnp.zeros((N, h + 2, 1, C), jnp.float32)
    xp = jnp.concatenate([zc, xp, zc], axis=2)                  # (N, h+2, w+2, C)
    taps = [xp[:, dy:dy + h, dx:dx + w, :] for dy in range(3) for dx in range(3)]
    patches = jnp.concatenate(taps, axis=3).reshape(N * h * w, 9 * C)
    y = jnp.dot(patches, wps[0:9 * C], preferred_element_type=jnp.float32)
    return _affine_relu(y, wps[9 * C:9 * C + 1], wps[9 * C + 1:9 * C + 2])


def _head_tail(hfeat, N, h, w, C, rh, m2, bias):
    """Separable bilinear upsample fused with the head's final 1x1 conv.

    hfeat: (N*h*w, C)  post conv3x3/BN/ReLU hidden features, rows (n, i, j)
    rh:    (H, h)      bilinear row-interp matrix (align_corners=False)
    m2:    (w*C, K*W)  fused [column-interp x 1x1-conv weight] matrix
    bias:  (1, K*W)    1x1-conv bias (bilinear weights sum to 1, so it passes through)
    returns (N*H, K*W) rows (n, I), lanes (k, J)
    """
    f4 = hfeat.reshape(N, h, w, C)
    # lane-merge the column axis (j-major) -> (N, h, w*C); lane dim only grows
    f3 = jnp.concatenate([f4[:, :, j, :] for j in range(w)], axis=-1)
    # H-interp per image (N is tiny/static), then fused 1x1-conv + W-interp GEMM
    a = jnp.concatenate(
        [jnp.dot(rh, f3[n], preferred_element_type=jnp.float32) for n in range(N)],
        axis=0)                                                 # (N*H, w*C)
    return jnp.dot(a, m2, preferred_element_type=jnp.float32) + bias


def _fcn_kernel(xe_ref, xo_ref, w1_ref, w2_ref, wc_ref, wa_ref, rh_ref, m2_ref,
                out_ref):
    """Fully fused FCN forward; whole batch in one grid step (M = N*h*w)."""
    N = xe_ref.shape[0]
    h1, w1s = (xe_ref.shape[1] - 2) // 2, xe_ref.shape[2]       # = H/2, W/2
    h2, w2s = h1 // 2, w1s // 2                                 # = H/4, W/4
    rh = rh_ref[...]
    m2 = m2_ref[...]

    # ---- backbone: two direct stride-2 conv3x3 + ReLU ----------------------
    f1 = _conv3x3_s2(xe_ref[...], xo_ref[...], w1_ref[...])     # (N*h1*w1s, C1)
    aux_feat = f1.reshape(N, h1, w1s, C1)                       # 'aux' feature map

    # column-phase split + zero pads of aux_feat for the second stride-2 conv
    f1p = f1.reshape(N, h1, w2s, 2, C1)
    a_e, a_o = f1p[:, :, :, 0, :], f1p[:, :, :, 1, :]           # even / odd cols
    zrow = jnp.zeros((N, 1, w2s, C1), jnp.float32)
    a_e = jnp.concatenate([zrow, a_e, zrow], axis=1)            # (N, h1+2, w2s,   C1)
    a_o = jnp.concatenate([zrow, a_o, zrow], axis=1)
    zcol = jnp.zeros((N, h1 + 2, 1, C1), jnp.float32)
    a_o = jnp.concatenate([zcol, a_o], axis=2)                  # (N, h1+2, w2s+1, C1)

    f2 = _conv3x3_s2(a_e, a_o, w2_ref[...])                     # (N*h2*w2s, C2)
    out_feat = f2.reshape(N, h2, w2s, C2)                       # 'out' feature map

    # ---- classifier head: conv3x3->BN->ReLU->(Dropout=id)->conv1x1->up x4 --
    hc = _conv3x3_s1(out_feat, wc_ref[...])                     # (N*h2*w2s, C_INTER)
    rc = w2s * C_INTER
    out_c = _head_tail(hc, N, h2, w2s, C_INTER,
                       rh[:, 0:h2], m2[0:rc], m2[rc:rc + 1])    # (N*H, K*W)

    # ---- aux head: same structure on the stride-2 feature map, up x2 -------
    ha = _conv3x3_s1(aux_feat, wa_ref[...])                     # (N*h1*w1s, C_AUX)
    ra = w1s * C_AUX_INTER
    out_a = _head_tail(ha, N, h1, w1s, C_AUX_INTER,
                       rh[:, h2:h2 + h1],
                       m2[rc + 1:rc + 1 + ra],
                       m2[rc + 1 + ra:rc + 2 + ra])             # (N*H, K*W)

    # single merged store: rows (n, I), lanes (head, k, J)
    out_ref[...] = jnp.concatenate([out_c, out_a], axis=-1)     # (N*H, 2*K*W)


# ---------------------------------------------------------------------------
# Host-side precomputed operators / parameter packing
# ---------------------------------------------------------------------------
def _bilinear_matrix(out_size, in_size):
    """Row-interp matrix matching F.interpolate(mode='bilinear', align_corners=False)."""
    scale = in_size / out_size
    R = np.zeros((out_size, in_size), np.float32)
    for i in range(out_size):
        src = (i + 0.5) * scale - 0.5
        src = max(src, 0.0)
        i0 = min(int(np.floor(src)), in_size - 1)
        i1 = min(i0 + 1, in_size - 1)
        l1 = src - i0
        R[i, i0] += 1.0 - l1
        R[i, i1] += l1
    return R


def _bn_affine(gamma, beta, mean, var, eps=1e-5):
    s = gamma / jnp.sqrt(var + eps)
    return (s.reshape(1, -1).astype(jnp.float32),
            (beta - mean * s).reshape(1, -1).astype(jnp.float32))


def fcn_forward(x_nchw, params):
    """Returns {'out','aux'} as (N, NUM_CLASSES, H, W), like the PyTorch module."""
    N, Cin, H, W = x_nchw.shape
    K = NUM_CLASSES
    f32 = jnp.float32
    x = jnp.transpose(x_nchw, (0, 2, 3, 1)).astype(f32)          # NHWC

    # host-side layout plumbing for the first stride-2 conv: row pad + col-phase split
    xp = jnp.pad(x, ((0, 0), (1, 1), (0, 0), (0, 0)))            # rows -1..H
    x_e = xp[:, :, 0::2, :]                                      # (N, H+2, W/2,   Cin)
    x_o = jnp.pad(xp[:, :, 1::2, :],
                  ((0, 0), (0, 0), (1, 0), (0, 0)))              # (N, H+2, W/2+1, Cin)

    def pack_conv(w, scale, shift):                              # (3,3,Ci,Co) + affine
        wm = w.reshape(-1, w.shape[-1]).astype(f32)              # rows (dy*3+dx)*Ci+ci
        return jnp.concatenate([wm, scale.astype(f32), shift.astype(f32)], axis=0)

    w1_pk = pack_conv(params['b1_w'], jnp.ones((1, C1), f32), params['b1_b'].reshape(1, C1))
    w2_pk = pack_conv(params['b2_w'], jnp.ones((1, C2), f32), params['b2_b'].reshape(1, C2))
    cs, ch = _bn_affine(params['c_bn_g'], params['c_bn_b'], params['c_bn_m'], params['c_bn_v'])
    as_, ah = _bn_affine(params['a_bn_g'], params['a_bn_b'], params['a_bn_m'], params['a_bn_v'])
    wc_pk = pack_conv(params['c1_w'], cs, ch)
    wa_pk = pack_conv(params['a1_w'], as_, ah)

    # separable bilinear operators (per-axis; no O(hw*HW) kron matrices)
    rh_c, rw_c = _bilinear_matrix(H, H // 4), _bilinear_matrix(W, W // 4)
    rh_a, rw_a = _bilinear_matrix(H, H // 2), _bilinear_matrix(W, W // 2)
    rh_pk = jnp.asarray(np.concatenate([rh_c, rh_a], axis=1))    # (H, H/4 + H/2)

    def fuse_w_interp(rw, w1x1, b1x1, c):
        # M[(j*C + ci), (k*W + J)] = rw[J, j] * w1x1[ci, k];  bias row b[k*W+J] = b1x1[k]
        m = jnp.einsum('Jj,ck->jckJ', jnp.asarray(rw), w1x1.astype(f32))
        m = m.reshape(rw.shape[1] * c, K * W)
        b = jnp.repeat(b1x1.astype(f32), W).reshape(1, K * W)
        return jnp.concatenate([m, b], axis=0)

    m2_pk = jnp.concatenate(
        [fuse_w_interp(rw_c, params['c2_w'], params['c2_b'], C_INTER),
         fuse_w_interp(rw_a, params['a2_w'], params['a2_b'], C_AUX_INTER)], axis=0)

    ops = (x_e, x_o, w1_pk, w2_pk, wc_pk, wa_pk, rh_pk, m2_pk)
    in_specs = [pl.BlockSpec(o.shape, lambda i, nd=o.ndim: (0,) * nd) for o in ops]

    # TODO(synk): on v7x add a 2-wide "parallel" batch-chunk grid axis (one chunk
    # per TensorCore); single-step grid is optimal for v5e/v6e at these sizes.
    y = pl.pallas_call(
        _fcn_kernel,
        grid=(1,),
        in_specs=in_specs,
        out_specs=pl.BlockSpec((N * H, 2 * K * W), lambda i: (0, 0)),
        out_shape=jax.ShapeDtypeStruct((N * H, 2 * K * W), jnp.float32),
        compiler_params=pltpu.CompilerParams(
            dimension_semantics=("arbitrary",)),
    )(*ops)

    # wrapper-side layout plumbing only (free XLA glue)
    y = y.reshape(N, H, 2, K, W)
    y = jnp.transpose(y, (2, 0, 3, 1, 4))                        # (head, N, K, H, W)
    return {'out': y[0], 'aux': y[1]}


# ---------------------------------------------------------------------------
# Synthetic model definition (deterministic init) -- unchanged semantics
# ---------------------------------------------------------------------------
def init_params(key):
    ks = jax.random.split(key, 18)
    p = {}
    # backbone (mini-resnet stand-in): conv3x3 s2 + ReLU ; conv3x3 s2 + ReLU
    p['b1_w'] = 0.1 * jax.random.normal(ks[0], (3, 3, CIN, C1))
    p['b1_b'] = 0.1 * jax.random.normal(ks[1], (C1,))
    p['b2_w'] = 0.1 * jax.random.normal(ks[2], (3, 3, C1, C2))
    p['b2_b'] = 0.1 * jax.random.normal(ks[3], (C2,))
    # classifier FCNHead(C2 -> NUM_CLASSES)
    p['c1_w'] = 0.1 * jax.random.normal(ks[4], (3, 3, C2, C_INTER))
    p['c_bn_g'] = 1.0 + 0.1 * jax.random.normal(ks[5], (C_INTER,))
    p['c_bn_b'] = 0.1 * jax.random.normal(ks[6], (C_INTER,))
    p['c_bn_m'] = 0.1 * jax.random.normal(ks[7], (C_INTER,))
    p['c_bn_v'] = jnp.abs(jax.random.normal(ks[8], (C_INTER,))) + 0.5
    p['c2_w'] = 0.1 * jax.random.normal(ks[9], (C_INTER, NUM_CLASSES))
    p['c2_b'] = 0.1 * jax.random.normal(ks[10], (NUM_CLASSES,))
    # aux classifier FCNHead(C1 -> NUM_CLASSES)
    p['a1_w'] = 0.1 * jax.random.normal(ks[11], (3, 3, C1, C_AUX_INTER))
    p['a_bn_g'] = 1.0 + 0.1 * jax.random.normal(ks[12], (C_AUX_INTER,))
    p['a_bn_b'] = 0.1 * jax.random.normal(ks[13], (C_AUX_INTER,))
    p['a_bn_m'] = 0.1 * jax.random.normal(ks[14], (C_AUX_INTER,))
    p['a_bn_v'] = jnp.abs(jax.random.normal(ks[15], (C_AUX_INTER,))) + 0.5
    p['a2_w'] = 0.1 * jax.random.normal(ks[16], (C_AUX_INTER, NUM_CLASSES))
    p['a2_b'] = 0.1 * jax.random.normal(ks[17], (NUM_CLASSES,))
    return p


# ---------------------------------------------------------------------------
# Pure-XLA reference (no Pallas) used only to validate the fused kernel
# ---------------------------------------------------------------------------
def _ref_forward(x_nchw, params):
    eps = 1e-5
    hp = jax.lax.Precision.HIGHEST
    H, W = x_nchw.shape[-2], x_nchw.shape[-1]
    x = jnp.transpose(x_nchw, (0, 2, 3, 1)).astype(jnp.float32)   # NHWC

    def conv3x3(t, w, scale, shift):
        y = jax.lax.conv_general_dilated(
            t, w, (1, 1), "SAME",
            dimension_numbers=("NHWC", "HWIO", "NHWC"), precision=hp)
        return jnp.maximum(y * scale + shift, 0.0)

    f1 = conv3x3(x, params["b1_w"], 1.0, params["b1_b"])
    aux_feat = f1[:, ::2, ::2, :]
    f2 = conv3x3(aux_feat, params["b2_w"], 1.0, params["b2_b"])
    out_feat = f2[:, ::2, ::2, :]

    def head(t, w1, g, b, m, v, w2, b2):
        s = g / jnp.sqrt(v + eps)
        h = conv3x3(t, w1, s, b - m * s)
        return jnp.einsum("nhwc,ck->nhwk", h, w2, precision=hp) + b2

    def upsample(t):   # (N, h, w, K) -> (N, K, H, W)
        rh = jnp.asarray(_bilinear_matrix(H, t.shape[1]))
        rw = jnp.asarray(_bilinear_matrix(W, t.shape[2]))
        return jnp.einsum("Hh,nhwk,Ww->nkHW", rh, t, rw, precision=hp)

    out = upsample(head(out_feat, params["c1_w"], params["c_bn_g"], params["c_bn_b"],
                        params["c_bn_m"], params["c_bn_v"], params["c2_w"], params["c2_b"]))
    aux = upsample(head(aux_feat, params["a1_w"], params["a_bn_g"], params["a_bn_b"],
                        params["a_bn_m"], params["a_bn_v"], params["a2_w"], params["a2_b"]))
    return {"out": out, "aux": aux}


if __name__ == "__main__":
    key = jax.random.PRNGKey(0)
    k_x, k_p = jax.random.split(key)
    x = jax.random.normal(k_x, (2, CIN, 16, 16), jnp.float32)   # NCHW, like PyTorch
    params = init_params(k_p)

    fwd = jax.jit(fcn_forward)
    result = fwd(x, params)
    out = jax.block_until_ready(result['out'])
    aux = jax.block_until_ready(result['aux'])

    assert out.shape == (2, NUM_CLASSES, 16, 16), out.shape
    assert aux.shape == (2, NUM_CLASSES, 16, 16), aux.shape

    ref = _ref_forward(x, params)
    np.testing.assert_allclose(np.asarray(out), np.asarray(ref['out']), rtol=1e-3, atol=2e-3)
    np.testing.assert_allclose(np.asarray(aux), np.asarray(ref['aux']), rtol=1e-3, atol=2e-3)
    print("KERNEL_OK")
</pallas_src>

<mosaic_0001>
module attributes {stable_mosaic.version = 11 : i64} {
  func.func @_fcn_kernel(%arg0: i32, %arg1: memref<2x18x8x4xf32, #tpu.memory_space<vmem>>, %arg2: memref<2x18x9x4xf32, #tpu.memory_space<vmem>>, %arg3: memref<38x8xf32, #tpu.memory_space<vmem>>, %arg4: memref<74x16xf32, #tpu.memory_space<vmem>>, %arg5: memref<146x8xf32, #tpu.memory_space<vmem>>, %arg6: memref<74x4xf32, #tpu.memory_space<vmem>>, %arg7: memref<16x12xf32, #tpu.memory_space<vmem>>, %arg8: memref<66x48xf32, #tpu.memory_space<vmem>>, %arg9: memref<32x96xf32, #tpu.memory_space<vmem>>) attributes {dimension_semantics = [#tpu.dimension_semantics<arbitrary>], iteration_bounds = array<i64: 1>, scalar_prefetch = 0 : i64, scratch_operands = 0 : i64, tpu.core_type = #tpu.core_type<tc>, window_params = [{pipeline_mode = #tpu.pipeline_mode<synchronous>, transform_indices = @transform_0, window_bounds = array<i64: 2, 18, 8, 4>}, {pipeline_mode = #tpu.pipeline_mode<synchronous>, transform_indices = @transform_1, window_bounds = array<i64: 2, 18, 9, 4>}, {pipeline_mode = #tpu.pipeline_mode<synchronous>, transform_indices = @transform_2, window_bounds = array<i64: 38, 8>}, {pipeline_mode = #tpu.pipeline_mode<synchronous>, transform_indices = @transform_3, window_bounds = array<i64: 74, 16>}, {pipeline_mode = #tpu.pipeline_mode<synchronous>, transform_indices = @transform_4, window_bounds = array<i64: 146, 8>}, {pipeline_mode = #tpu.pipeline_mode<synchronous>, transform_indices = @transform_5, window_bounds = array<i64: 74, 4>}, {pipeline_mode = #tpu.pipeline_mode<synchronous>, transform_indices = @transform_6, window_bounds = array<i64: 16, 12>}, {pipeline_mode = #tpu.pipeline_mode<synchronous>, transform_indices = @transform_7, window_bounds = array<i64: 66, 48>}, {pipeline_mode = #tpu.pipeline_mode<synchronous>, transform_indices = @transform_8, window_bounds = array<i64: 32, 96>}]} {
    %c0 = arith.constant 0 : index
    %c0_0 = arith.constant 0 : index
    %0 = vector.load %arg7[%c0, %c0_0] : memref<16x12xf32, #tpu.memory_space<vmem>>, vector<16x12xf32>
    %c0_1 = arith.constant 0 : index
    %c0_2 = arith.constant 0 : index
    %1 = vector.load %arg8[%c0_1, %c0_2] : memref<66x48xf32, #tpu.memory_space<vmem>>, vector<66x48xf32>
    %c0_3 = arith.constant 0 : index
    %c0_4 = arith.constant 0 : index
    %c0_5 = arith.constant 0 : index
    %c0_6 = arith.constant 0 : index
    %2 = vector.load %arg1[%c0_3, %c0_4, %c0_5, %c0_6] : memref<2x18x8x4xf32, #tpu.memory_space<vmem>>, vector<2x18x8x4xf32>
    %c0_7 = arith.constant 0 : index
    %c0_8 = arith.constant 0 : index
    %c0_9 = arith.constant 0 : index
    %c0_10 = arith.constant 0 : index
    %3 = vector.load %arg2[%c0_7, %c0_8, %c0_9, %c0_10] : memref<2x18x9x4xf32, #tpu.memory_space<vmem>>, vector<2x18x9x4xf32>
    %c0_11 = arith.constant 0 : index
    %c0_12 = arith.constant 0 : index
    %4 = vector.load %arg3[%c0_11, %c0_12] : memref<38x8xf32, #tpu.memory_space<vmem>>, vector<38x8xf32>
    %5 = vector.extract_strided_slice %3 {offsets = [0, 0, 0, 0], sizes = [2, 18, 8, 4], strides = [1, 1, 1, 1]} : vector<2x18x9x4xf32> to vector<2x18x8x4xf32>
    %6 = vector.extract_strided_slice %3 {offsets = [0, 0, 1, 0], sizes = [2, 18, 8, 4], strides = [1, 1, 1, 1]} : vector<2x18x9x4xf32> to vector<2x18x8x4xf32>
    %7 = vector.extract_strided_slice %5 {offsets = [0, 0, 0, 0], sizes = [2, 16, 8, 4], strides = [1, 1, 1, 1]} : vector<2x18x8x4xf32> to vector<2x16x8x4xf32>
    %8 = vector.shape_cast %7 : vector<2x16x8x4xf32> to vector<2x8x2x8x4xf32>
    %9 = vector.extract_strided_slice %8 {offsets = [0, 0, 0, 0, 0], sizes = [2, 8, 1, 8, 4], strides = [1, 1, 1, 1, 1]} : vector<2x8x2x8x4xf32> to vector<2x8x1x8x4xf32>
    %10 = vector.shape_cast %9 : vector<2x8x1x8x4xf32> to vector<2x8x8x4xf32>
    %11 = vector.extract_strided_slice %2 {offsets = [0, 0, 0, 0], sizes = [2, 16, 8, 4], strides = [1, 1, 1, 1]} : vector<2x18x8x4xf32> to vector<2x16x8x4xf32>
    %12 = vector.shape_cast %11 : vector<2x16x8x4xf32> to vector<2x8x2x8x4xf32>
    %13 = vector.extract_strided_slice %12 {offsets = [0, 0, 0, 0, 0], sizes = [2, 8, 1, 8, 4], strides = [1, 1, 1, 1, 1]} : vector<2x8x2x8x4xf32> to vector<2x8x1x8x4xf32>
    %14 = vector.shape_cast %13 : vector<2x8x1x8x4xf32> to vector<2x8x8x4xf32>
    %15 = vector.extract_strided_slice %6 {offsets = [0, 0, 0, 0], sizes = [2, 16, 8, 4], strides = [1, 1, 1, 1]} : vector<2x18x8x4xf32> to vector<2x16x8x4xf32>
    %16 = vector.shape_cast %15 : vector<2x16x8x4xf32> to vector<2x8x2x8x4xf32>
    %17 = vector.extract_strided_slice %16 {offsets = [0, 0, 0, 0, 0], sizes = [2, 8, 1, 8, 4], strides = [1, 1, 1, 1, 1]} : vector<2x8x2x8x4xf32> to vector<2x8x1x8x4xf32>
    %18 = vector.shape_cast %17 : vector<2x8x1x8x4xf32> to vector<2x8x8x4xf32>
    %19 = vector.extract_strided_slice %5 {offsets = [0, 1, 0, 0], sizes = [2, 16, 8, 4], strides = [1, 1, 1, 1]} : vector<2x18x8x4xf32> to vector<2x16x8x4xf32>
    %20 = vector.shape_cast %19 : vector<2x16x8x4xf32> to vector<2x8x2x8x4xf32>
    %21 = vector.extract_strided_slice %20 {offsets = [0, 0, 0, 0, 0], sizes = [2, 8, 1, 8, 4], strides = [1, 1, 1, 1, 1]} : vector<2x8x2x8x4xf32> to vector<2x8x1x8x4xf32>
    %22 = vector.shape_cast %21 : vector<2x8x1x8x4xf32> to vector<2x8x8x4xf32>
    %23 = vector.extract_strided_slice %2 {offsets = [0, 1, 0, 0], sizes = [2, 16, 8, 4], strides = [1, 1, 1, 1]} : vector<2x18x8x4xf32> to vector<2x16x8x4xf32>
    %24 = vector.shape_cast %23 : vector<2x16x8x4xf32> to vector<2x8x2x8x4xf32>
    %25 = vector.extract_strided_slice %24 {offsets = [0, 0, 0, 0, 0], sizes = [2, 8, 1, 8, 4], strides = [1, 1, 1, 1, 1]} : vector<2x8x2x8x4xf32> to vector<2x8x1x8x4xf32>
    %26 = vector.shape_cast %25 : vector<2x8x1x8x4xf32> to vector<2x8x8x4xf32>
    %27 = vector.extract_strided_slice %6 {offsets = [0, 1, 0, 0], sizes = [2, 16, 8, 4], strides = [1, 1, 1, 1]} : vector<2x18x8x4xf32> to vector<2x16x8x4xf32>
    %28 = vector.shape_cast %27 : vector<2x16x8x4xf32> to vector<2x8x2x8x4xf32>
    %29 = vector.extract_strided_slice %28 {offsets = [0, 0, 0, 0, 0], sizes = [2, 8, 1, 8, 4], strides = [1, 1, 1, 1, 1]} : vector<2x8x2x8x4xf32> to vector<2x8x1x8x4xf32>
    %30 = vector.shape_cast %29 : vector<2x8x1x8x4xf32> to vector<2x8x8x4xf32>
    %31 = vector.extract_strided_slice %5 {offsets = [0, 2, 0, 0], sizes = [2, 16, 8, 4], strides = [1, 1, 1, 1]} : vector<2x18x8x4xf32> to vector<2x16x8x4xf32>
    %32 = vector.shape_cast %31 : vector<2x16x8x4xf32> to vector<2x8x2x8x4xf32>
    %33 = vector.extract_strided_slice %32 {offsets = [0, 0, 0, 0, 0], sizes = [2, 8, 1, 8, 4], strides = [1, 1, 1, 1, 1]} : vector<2x8x2x8x4xf32> to vector<2x8x1x8x4xf32>
    %34 = vector.shape_cast %33 : vector<2x8x1x8x4xf32> to vector<2x8x8x4xf32>
    %35 = vector.extract_strided_slice %2 {offsets = [0, 2, 0, 0], sizes = [2, 16, 8, 4], strides = [1, 1, 1, 1]} : vector<2x18x8x4xf32> to vector<2x16x8x4xf32>
    %36 = vector.shape_cast %35 : vector<2x16x8x4xf32> to vector<2x8x2x8x4xf32>
    %37 = vector.extract_strided_slice %36 {offsets = [0, 0, 0, 0, 0], sizes = [2, 8, 1, 8, 4], strides = [1, 1, 1, 1, 1]} : vector<2x8x2x8x4xf32> to vector<2x8x1x8x4xf32>
    %38 = vector.shape_cast %37 : vector<2x8x1x8x4xf32> to vector<2x8x8x4xf32>
    %39 = vector.extract_strided_slice %6 {offsets = [0, 2, 0, 0], sizes = [2, 16, 8, 4], strides = [1, 1, 1, 1]} : vector<2x18x8x4xf32> to vector<2x16x8x4xf32>
    %40 = vector.shape_cast %39 : vector<2x16x8x4xf32> to vector<2x8x2x8x4xf32>
    %41 = vector.extract_strided_slice %40 {offsets = [0, 0, 0, 0, 0], sizes = [2, 8, 1, 8, 4], strides = [1, 1, 1, 1, 1]} : vector<2x8x2x8x4xf32> to vector<2x8x1x8x4xf32>
    %42 = vector.shape_cast %41 : vector<2x8x1x8x4xf32> to vector<2x8x8x4xf32>
    %43 = tpu.concatenate %10, %14, %18, %22, %26, %30, %34, %38, %42 in 3 : vector<2x8x8x4xf32>, vector<2x8x8x4xf32>, vector<2x8x8x4xf32>, vector<2x8x8x4xf32>, vector<2x8x8x4xf32>, vector<2x8x8x4xf32>, vector<2x8x8x4xf32>, vector<2x8x8x4xf32>, vector<2x8x8x4xf32> -> vector<2x8x8x36xf32>
    %44 = vector.shape_cast %43 : vector<2x8x8x36xf32> to vector<128x36xf32>
    %45 = vector.extract_strided_slice %4 {offsets = [0, 0], sizes = [36, 8], strides = [1, 1]} : vector<38x8xf32> to vector<36x8xf32>
    %cst = arith.constant dense<0.000000e+00> : vector<128x8xf32>
    %46 = tpu.matmul %44, %45, %cst {dimension_numbers = #tpu.dot_dimension_numbers<[1], [0], [0], [1], [0, 0, 1, 1], [], []>} : vector<128x36xf32>, vector<36x8xf32>, vector<128x8xf32> -> vector<128x8xf32>
    %47 = vector.extract_strided_slice %4 {offsets = [36, 0], sizes = [1, 8], strides = [1, 1]} : vector<38x8xf32> to vector<1x8xf32>
    %48 = vector.extract_strided_slice %4 {offsets = [37, 0], sizes = [1, 8], strides = [1, 1]} : vector<38x8xf32> to vector<1x8xf32>
    %49 = vector.broadcast %47 : vector<1x8xf32> to vector<128x8xf32>
    %50 = arith.mulf %46, %49 : vector<128x8xf32>
    %51 = vector.broadcast %48 : vector<1x8xf32> to vector<128x8xf32>
    %52 = arith.addf %50, %51 : vector<128x8xf32>
    %cst_13 = arith.constant 0.000000e+00 : f32
    %53 = vector.broadcast %cst_13 : f32 to vector<128x8xf32>
    %54 = arith.maximumf %52, %53 : vector<128x8xf32>
    %55 = vector.shape_cast %54 : vector<128x8xf32> to vector<2x8x8x8xf32>
    %56 = vector.shape_cast %54 : vector<128x8xf32> to vector<2x8x4x2x8xf32>
    %57 = vector.extract_strided_slice %56 {offsets = [0, 0, 0, 0, 0], sizes = [2, 8, 4, 1, 8], strides = [1, 1, 1, 1, 1]} : vector<2x8x4x2x8xf32> to vector<2x8x4x1x8xf32>
    %58 = vector.shape_cast %57 : vector<2x8x4x1x8xf32> to vector<2x8x4x8xf32>
    %59 = vector.extract_strided_slice %56 {offsets = [0, 0, 0, 1, 0], sizes = [2, 8, 4, 1, 8], strides = [1, 1, 1, 1, 1]} : vector<2x8x4x2x8xf32> to vector<2x8x4x1x8xf32>
    %60 = vector.shape_cast %59 : vector<2x8x4x1x8xf32> to vector<2x8x4x8xf32>
    %cst_14 = arith.constant 0.000000e+00 : f32
    %61 = vector.broadcast %cst_14 : f32 to vector<2x1x4x8xf32>
    %62 = tpu.concatenate %61, %58, %61 in 1 : vector<2x1x4x8xf32>, vector<2x8x4x8xf32>, vector<2x1x4x8xf32> -> vector<2x10x4x8xf32>
    %63 = tpu.concatenate %61, %60, %61 in 1 : vector<2x1x4x8xf32>, vector<2x8x4x8xf32>, vector<2x1x4x8xf32> -> vector<2x10x4x8xf32>
    %cst_15 = arith.constant 0.000000e+00 : f32
    %64 = vector.broadcast %cst_15 : f32 to vector<2x10x1x8xf32>
    %65 = tpu.concatenate %64, %63 in 2 : vector<2x10x1x8xf32>, vector<2x10x4x8xf32> -> vector<2x10x5x8xf32>
    %c0_16 = arith.constant 0 : index
    %c0_17 = arith.constant 0 : index
    %66 = vector.load %arg4[%c0_16, %c0_17] : memref<74x16xf32, #tpu.memory_space<vmem>>, vector<74x16xf32>
    %67 = vector.extract_strided_slice %65 {offsets = [0, 0, 0, 0], sizes = [2, 10, 4, 8], strides = [1, 1, 1, 1]} : vector<2x10x5x8xf32> to vector<2x10x4x8xf32>
    %68 = vector.extract_strided_slice %65 {offsets = [0, 0, 1, 0], sizes = [2, 10, 4, 8], strides = [1, 1, 1, 1]} : vector<2x10x5x8xf32> to vector<2x10x4x8xf32>
    %69 = vector.extract_strided_slice %67 {offsets = [0, 0, 0, 0], sizes = [2, 8, 4, 8], strides = [1, 1, 1, 1]} : vector<2x10x4x8xf32> to vector<2x8x4x8xf32>
    %70 = vector.shape_cast %69 : vector<2x8x4x8xf32> to vector<2x4x2x4x8xf32>
    %71 = vector.extract_strided_slice %70 {offsets = [0, 0, 0, 0, 0], sizes = [2, 4, 1, 4, 8], strides = [1, 1, 1, 1, 1]} : vector<2x4x2x4x8xf32> to vector<2x4x1x4x8xf32>
    %72 = vector.shape_cast %71 : vector<2x4x1x4x8xf32> to vector<2x4x4x8xf32>
    %73 = vector.extract_strided_slice %62 {offsets = [0, 0, 0, 0], sizes = [2, 8, 4, 8], strides = [1, 1, 1, 1]} : vector<2x10x4x8xf32> to vector<2x8x4x8xf32>
    %74 = vector.shape_cast %73 : vector<2x8x4x8xf32> to vector<2x4x2x4x8xf32>
    %75 = vector.extract_strided_slice %74 {offsets = [0, 0, 0, 0, 0], sizes = [2, 4, 1, 4, 8], strides = [1, 1, 1, 1, 1]} : vector<2x4x2x4x8xf32> to vector<2x4x1x4x8xf32>
    %76 = vector.shape_cast %75 : vector<2x4x1x4x8xf32> to vector<2x4x4x8xf32>
    %77 = vector.extract_strided_slice %68 {offsets = [0, 0, 0, 0], sizes = [2, 8, 4, 8], strides = [1, 1, 1, 1]} : vector<2x10x4x8xf32> to vector<2x8x4x8xf32>
    %78 = vector.shape_cast %77 : vector<2x8x4x8xf32> to vector<2x4x2x4x8xf32>
    %79 = vector.extract_strided_slice %78 {offsets = [0, 0, 0, 0, 0], sizes = [2, 4, 1, 4, 8], strides = [1, 1, 1, 1, 1]} : vector<2x4x2x4x8xf32> to vector<2x4x1x4x8xf32>
    %80 = vector.shape_cast %79 : vector<2x4x1x4x8xf32> to vector<2x4x4x8xf32>
    %81 = vector.extract_strided_slice %67 {offsets = [0, 1, 0, 0], sizes = [2, 8, 4, 8], strides = [1, 1, 1, 1]} : vector<2x10x4x8xf32> to vector<2x8x4x8xf32>
    %82 = vector.shape_cast %81 : vector<2x8x4x8xf32> to vector<2x4x2x4x8xf32>
    %83 = vector.extract_strided_slice %82 {offsets = [0, 0, 0, 0, 0], sizes = [2, 4, 1, 4, 8], strides = [1, 1, 1, 1, 1]} : vector<2x4x2x4x8xf32> to vector<2x4x1x4x8xf32>
    %84 = vector.shape_cast %83 : vector<2x4x1x4x8xf32> to vector<2x4x4x8xf32>
    %85 = vector.extract_strided_slice %62 {offsets = [0, 1, 0, 0], sizes = [2, 8, 4, 8], strides = [1, 1, 1, 1]} : vector<2x10x4x8xf32> to vector<2x8x4x8xf32>
    %86 = vector.shape_cast %85 : vector<2x8x4x8xf32> to vector<2x4x2x4x8xf32>
    %87 = vector.extract_strided_slice %86 {offsets = [0, 0, 0, 0, 0], sizes = [2, 4, 1, 4, 8], strides = [1, 1, 1, 1, 1]} : vector<2x4x2x4x8xf32> to vector<2x4x1x4x8xf32>
    %88 = vector.shape_cast %87 : vector<2x4x1x4x8xf32> to vector<2x4x4x8xf32>
    %89 = vector.extract_strided_slice %68 {offsets = [0, 1, 0, 0], sizes = [2, 8, 4, 8], strides = [1, 1, 1, 1]} : vector<2x10x4x8xf32> to vector<2x8x4x8xf32>
    %90 = vector.shape_cast %89 : vector<2x8x4x8xf32> to vector<2x4x2x4x8xf32>
    %91 = vector.extract_strided_slice %90 {offsets = [0, 0, 0, 0, 0], sizes = [2, 4, 1, 4, 8], strides = [1, 1, 1, 1, 1]} : vector<2x4x2x4x8xf32> to vector<2x4x1x4x8xf32>
    %92 = vector.shape_cast %91 : vector<2x4x1x4x8xf32> to vector<2x4x4x8xf32>
    %93 = vector.extract_strided_slice %67 {offsets = [0, 2, 0, 0], sizes = [2, 8, 4, 8], strides = [1, 1, 1, 1]} : vector<2x10x4x8xf32> to vector<2x8x4x8xf32>
    %94 = vector.shape_cast %93 : vector<2x8x4x8xf32> to vector<2x4x2x4x8xf32>
    %95 = vector.extract_strided_slice %94 {offsets = [0, 0, 0, 0, 0], sizes = [2, 4, 1, 4, 8], strides = [1, 1, 1, 1, 1]} : vector<2x4x2x4x8xf32> to vector<2x4x1x4x8xf32>
    %96 = vector.shape_cast %95 : vector<2x4x1x4x8xf32> to vector<2x4x4x8xf32>
    %97 = vector.extract_strided_slice %62 {offsets = [0, 2, 0, 0], sizes = [2, 8, 4, 8], strides = [1, 1, 1, 1]} : vector<2x10x4x8xf32> to vector<2x8x4x8xf32>
    %98 = vector.shape_cast %97 : vector<2x8x4x8xf32> to vector<2x4x2x4x8xf32>
    %99 = vector.extract_strided_slice %98 {offsets = [0, 0, 0, 0, 0], sizes = [2, 4, 1, 4, 8], strides = [1, 1, 1, 1, 1]} : vector<2x4x2x4x8xf32> to vector<2x4x1x4x8xf32>
    %100 = vector.shape_cast %99 : vector<2x4x1x4x8xf32> to vector<2x4x4x8xf32>
    %101 = vector.extract_strided_slice %68 {offsets = [0, 2, 0, 0], sizes = [2, 8, 4, 8], strides = [1, 1, 1, 1]} : vector<2x10x4x8xf32> to vector<2x8x4x8xf32>
    %102 = vector.shape_cast %101 : vector<2x8x4x8xf32> to vector<2x4x2x4x8xf32>
    %103 = vector.extract_strided_slice %102 {offsets = [0, 0, 0, 0, 0], sizes = [2, 4, 1, 4, 8], strides = [1, 1, 1, 1, 1]} : vector<2x4x2x4x8xf32> to vector<2x4x1x4x8xf32>
    %104 = vector.shape_cast %103 : vector<2x4x1x4x8xf32> to vector<2x4x4x8xf32>
    %105 = tpu.concatenate %72, %76, %80, %84, %88, %92, %96, %100, %104 in 3 : vector<2x4x4x8xf32>, vector<2x4x4x8xf32>, vector<2x4x4x8xf32>, vector<2x4x4x8xf32>, vector<2x4x4x8xf32>, vector<2x4x4x8xf32>, vector<2x4x4x8xf32>, vector<2x4x4x8xf32>, vector<2x4x4x8xf32> -> vector<2x4x4x72xf32>
    %106 = vector.shape_cast %105 : vector<2x4x4x72xf32> to vector<32x72xf32>
    %107 = vector.extract_strided_slice %66 {offsets = [0, 0], sizes = [72, 16], strides = [1, 1]} : vector<74x16xf32> to vector<72x16xf32>
    %cst_18 = arith.constant dense<0.000000e+00> : vector<32x16xf32>
    %108 = tpu.matmul %106, %107, %cst_18 {dimension_numbers = #tpu.dot_dimension_numbers<[1], [0], [0], [1], [0, 0, 1, 1], [], []>} : vector<32x72xf32>, vector<72x16xf32>, vector<32x16xf32> -> vector<32x16xf32>
    %109 = vector.extract_strided_slice %66 {offsets = [72, 0], sizes = [1, 16], strides = [1, 1]} : vector<74x16xf32> to vector<1x16xf32>
    %110 = vector.extract_strided_slice %66 {offsets = [73, 0], sizes = [1, 16], strides = [1, 1]} : vector<74x16xf32> to vector<1x16xf32>
    %111 = vector.broadcast %109 : vector<1x16xf32> to vector<32x16xf32>
    %112 = arith.mulf %108, %111 : vector<32x16xf32>
    %113 = vector.broadcast %110 : vector<1x16xf32> to vector<32x16xf32>
    %114 = arith.addf %112, %113 : vector<32x16xf32>
    %cst_19 = arith.constant 0.000000e+00 : f32
    %115 = vector.broadcast %cst_19 : f32 to vector<32x16xf32>
    %116 = arith.maximumf %114, %115 : vector<32x16xf32>
    %117 = vector.shape_cast %116 : vector<32x16xf32> to vector<2x4x4x16xf32>
    %c0_20 = arith.constant 0 : index
    %c0_21 = arith.constant 0 : index
    %118 = vector.load %arg5[%c0_20, %c0_21] : memref<146x8xf32, #tpu.memory_space<vmem>>, vector<146x8xf32>
    %cst_22 = arith.constant 0.000000e+00 : f32
    %119 = vector.broadcast %cst_22 : f32 to vector<2x1x4x16xf32>
    %120 = tpu.concatenate %119, %117, %119 in 1 : vector<2x1x4x16xf32>, vector<2x4x4x16xf32>, vector<2x1x4x16xf32> -> vector<2x6x4x16xf32>
    %cst_23 = arith.constant 0.000000e+00 : f32
    %121 = vector.broadcast %cst_23 : f32 to vector<2x6x1x16xf32>
    %122 = tpu.concatenate %121, %120, %121 in 2 : vector<2x6x1x16xf32>, vector<2x6x4x16xf32>, vector<2x6x1x16xf32> -> vector<2x6x6x16xf32>
    %123 = vector.extract_strided_slice %122 {offsets = [0, 0, 0, 0], sizes = [2, 4, 4, 16], strides = [1, 1, 1, 1]} : vector<2x6x6x16xf32> to vector<2x4x4x16xf32>
    %124 = vector.extract_strided_slice %122 {offsets = [0, 0, 1, 0], sizes = [2, 4, 4, 16], strides = [1, 1, 1, 1]} : vector<2x6x6x16xf32> to vector<2x4x4x16xf32>
    %125 = vector.extract_strided_slice %122 {offsets = [0, 0, 2, 0], sizes = [2, 4, 4, 16], strides = [1, 1, 1, 1]} : vector<2x6x6x16xf32> to vector<2x4x4x16xf32>
    %126 = vector.extract_strided_slice %122 {offsets = [0, 1, 0, 0], sizes = [2, 4, 4, 16], strides = [1, 1, 1, 1]} : vector<2x6x6x16xf32> to vector<2x4x4x16xf32>
    %127 = vector.extract_strided_slice %122 {offsets = [0, 1, 1, 0], sizes = [2, 4, 4, 16], strides = [1, 1, 1, 1]} : vector<2x6x6x16xf32> to vector<2x4x4x16xf32>
    %128 = vector.extract_strided_slice %122 {offsets = [0, 1, 2, 0], sizes = [2, 4, 4, 16], strides = [1, 1, 1, 1]} : vector<2x6x6x16xf32> to vector<2x4x4x16xf32>
    %129 = vector.extract_strided_slice %122 {offsets = [0, 2, 0, 0], sizes = [2, 4, 4, 16], strides = [1, 1, 1, 1]} : vector<2x6x6x16xf32> to vector<2x4x4x16xf32>
    %130 = vector.extract_strided_slice %122 {offsets = [0, 2, 1, 0], sizes = [2, 4, 4, 16], strides = [1, 1, 1, 1]} : vector<2x6x6x16xf32> to vector<2x4x4x16xf32>
    %131 = vector.extract_strided_slice %122 {offsets = [0, 2, 2, 0], sizes = [2, 4, 4, 16], strides = [1, 1, 1, 1]} : vector<2x6x6x16xf32> to vector<2x4x4x16xf32>
    %132 = tpu.concatenate %123, %124, %125, %126, %127, %128, %129, %130, %131 in 3 : vector<2x4x4x16xf32>, vector<2x4x4x16xf32>, vector<2x4x4x16xf32>, vector<2x4x4x16xf32>, vector<2x4x4x16xf32>, vector<2x4x4x16xf32>, vector<2x4x4x16xf32>, vector<2x4x4x16xf32>, vector<2x4x4x16xf32> -> vector<2x4x4x144xf32>
    %133 = vector.shape_cast %132 : vector<2x4x4x144xf32> to vector<32x144xf32>
    %134 = vector.extract_strided_slice %118 {offsets = [0, 0], sizes = [144, 8], strides = [1, 1]} : vector<146x8xf32> to vector<144x8xf32>
    %cst_24 = arith.constant dense<0.000000e+00> : vector<32x8xf32>
    %135 = tpu.matmul %133, %134, %cst_24 {dimension_numbers = #tpu.dot_dimension_numbers<[1], [0], [0], [1], [0, 0, 1, 1], [], []>} : vector<32x144xf32>, vector<144x8xf32>, vector<32x8xf32> -> vector<32x8xf32>
    %136 = vector.extract_strided_slice %118 {offsets = [144, 0], sizes = [1, 8], strides = [1, 1]} : vector<146x8xf32> to vector<1x8xf32>
    %137 = vector.extract_strided_slice %118 {offsets = [145, 0], sizes = [1, 8], strides = [1, 1]} : vector<146x8xf32> to vector<1x8xf32>
    %138 = vector.broadcast %136 : vector<1x8xf32> to vector<32x8xf32>
    %139 = arith.mulf %135, %138 : vector<32x8xf32>
    %140 = vector.broadcast %137 : vector<1x8xf32> to vector<32x8xf32>
    %141 = arith.addf %139, %140 : vector<32x8xf32>
    %cst_25 = arith.constant 0.000000e+00 : f32
    %142 = vector.broadcast %cst_25 : f32 to vector<32x8xf32>
    %143 = arith.maximumf %141, %142 : vector<32x8xf32>
    %144 = vector.extract_strided_slice %0 {offsets = [0, 0], sizes = [16, 4], strides = [1, 1]} : vector<16x12xf32> to vector<16x4xf32>
    %145 = vector.extract_strided_slice %1 {offsets = [0, 0], sizes = [32, 48], strides = [1, 1]} : vector<66x48xf32> to vector<32x48xf32>
    %146 = vector.extract_strided_slice %1 {offsets = [32, 0], sizes = [1, 48], strides = [1, 1]} : vector<66x48xf32> to vector<1x48xf32>
    %147 = vector.shape_cast %143 : vector<32x8xf32> to vector<2x4x4x8xf32>
    %148 = vector.extract_strided_slice %147 {offsets = [0, 0, 0, 0], sizes = [2, 4, 1, 8], strides = [1, 1, 1, 1]} : vector<2x4x4x8xf32> to vector<2x4x1x8xf32>
    %149 = vector.shape_cast %148 : vector<2x4x1x8xf32> to vector<2x4x8xf32>
    %150 = vector.extract_strided_slice %147 {offsets = [0, 0, 1, 0], sizes = [2, 4, 1, 8], strides = [1, 1, 1, 1]} : vector<2x4x4x8xf32> to vector<2x4x1x8xf32>
    %151 = vector.shape_cast %150 : vector<2x4x1x8xf32> to vector<2x4x8xf32>
    %152 = vector.extract_strided_slice %147 {offsets = [0, 0, 2, 0], sizes = [2, 4, 1, 8], strides = [1, 1, 1, 1]} : vector<2x4x4x8xf32> to vector<2x4x1x8xf32>
    %153 = vector.shape_cast %152 : vector<2x4x1x8xf32> to vector<2x4x8xf32>
    %154 = vector.extract_strided_slice %147 {offsets = [0, 0, 3, 0], sizes = [2, 4, 1, 8], strides = [1, 1, 1, 1]} : vector<2x4x4x8xf32> to vector<2x4x1x8xf32>
    %155 = vector.shape_cast %154 : vector<2x4x1x8xf32> to vector<2x4x8xf32>
    %156 = tpu.concatenate %149, %151, %153, %155 in 2 : vector<2x4x8xf32>, vector<2x4x8xf32>, vector<2x4x8xf32>, vector<2x4x8xf32> -> vector<2x4x32xf32>
    %157 = vector.extract_strided_slice %156 {offsets = [0, 0, 0], sizes = [1, 4, 32], strides = [1, 1, 1]} : vector<2x4x32xf32> to vector<1x4x32xf32>
    %158 = vector.shape_cast %157 : vector<1x4x32xf32> to vector<4x32xf32>
    %cst_26 = arith.constant dense<0.000000e+00> : vector<16x32xf32>
    %159 = tpu.matmul %144, %158, %cst_26 {dimension_numbers = #tpu.dot_dimension_numbers<[1], [0], [0], [1], [0, 0, 1, 1], [], []>} : vector<16x4xf32>, vector<4x32xf32>, vector<16x32xf32> -> vector<16x32xf32>
    %160 = vector.extract_strided_slice %156 {offsets = [1, 0, 0], sizes = [1, 4, 32], strides = [1, 1, 1]} : vector<2x4x32xf32> to vector<1x4x32xf32>
    %161 = vector.shape_cast %160 : vector<1x4x32xf32> to vector<4x32xf32>
    %cst_27 = arith.constant dense<0.000000e+00> : vector<16x32xf32>
    %162 = tpu.matmul %144, %161, %cst_27 {dimension_numbers = #tpu.dot_dimension_numbers<[1], [0], [0], [1], [0, 0, 1, 1], [], []>} : vector<16x4xf32>, vector<4x32xf32>, vector<16x32xf32> -> vector<16x32xf32>
    %163 = tpu.concatenate %159, %162 in 0 : vector<16x32xf32>, vector<16x32xf32> -> vector<32x32xf32>
    %cst_28 = arith.constant dense<0.000000e+00> : vector<32x48xf32>
    %164 = tpu.matmul %163, %145, %cst_28 {dimension_numbers = #tpu.dot_dimension_numbers<[1], [0], [0], [1], [0, 0, 1, 1], [], []>} : vector<32x32xf32>, vector<32x48xf32>, vector<32x48xf32> -> vector<32x48xf32>
    %165 = vector.broadcast %146 : vector<1x48xf32> to vector<32x48xf32>
    %166 = arith.addf %164, %165 : vector<32x48xf32>
    %c0_29 = arith.constant 0 : index
    %c0_30 = arith.constant 0 : index
    %167 = vector.load %arg6[%c0_29, %c0_30] : memref<74x4xf32, #tpu.memory_space<vmem>>, vector<74x4xf32>
    %cst_31 = arith.constant 0.000000e+00 : f32
    %168 = vector.broadcast %cst_31 : f32 to vector<2x1x8x8xf32>
    %169 = tpu.concatenate %168, %55, %168 in 1 : vector<2x1x8x8xf32>, vector<2x8x8x8xf32>, vector<2x1x8x8xf32> -> vector<2x10x8x8xf32>
    %cst_32 = arith.constant 0.000000e+00 : f32
    %170 = vector.broadcast %cst_32 : f32 to vector<2x10x1x8xf32>
    %171 = tpu.concatenate %170, %169, %170 in 2 : vector<2x10x1x8xf32>, vector<2x10x8x8xf32>, vector<2x10x1x8xf32> -> vector<2x10x10x8xf32>
    %172 = vector.extract_strided_slice %171 {offsets = [0, 0, 0, 0], sizes = [2, 8, 8, 8], strides = [1, 1, 1, 1]} : vector<2x10x10x8xf32> to vector<2x8x8x8xf32>
    %173 = vector.extract_strided_slice %171 {offsets = [0, 0, 1, 0], sizes = [2, 8, 8, 8], strides = [1, 1, 1, 1]} : vector<2x10x10x8xf32> to vector<2x8x8x8xf32>
    %174 = vector.extract_strided_slice %171 {offsets = [0, 0, 2, 0], sizes = [2, 8, 8, 8], strides = [1, 1, 1, 1]} : vector<2x10x10x8xf32> to vector<2x8x8x8xf32>
    %175 = vector.extract_strided_slice %171 {offsets = [0, 1, 0, 0], sizes = [2, 8, 8, 8], strides = [1, 1, 1, 1]} : vector<2x10x10x8xf32> to vector<2x8x8x8xf32>
    %176 = vector.extract_strided_slice %171 {offsets = [0, 1, 1, 0], sizes = [2, 8, 8, 8], strides = [1, 1, 1, 1]} : vector<2x10x10x8xf32> to vector<2x8x8x8xf32>
    %177 = vector.extract_strided_slice %171 {offsets = [0, 1, 2, 0], sizes = [2, 8, 8, 8], strides = [1, 1, 1, 1]} : vector<2x10x10x8xf32> to vector<2x8x8x8xf32>
    %178 = vector.extract_strided_slice %171 {offsets = [0, 2, 0, 0], sizes = [2, 8, 8, 8], strides = [1, 1, 1, 1]} : vector<2x10x10x8xf32> to vector<2x8x8x8xf32>
    %179 = vector.extract_strided_slice %171 {offsets = [0, 2, 1, 0], sizes = [2, 8, 8, 8], strides = [1, 1, 1, 1]} : vector<2x10x10x8xf32> to vector<2x8x8x8xf32>
    %180 = vector.extract_strided_slice %171 {offsets = [0, 2, 2, 0], sizes = [2, 8, 8, 8], strides = [1, 1, 1, 1]} : vector<2x10x10x8xf32> to vector<2x8x8x8xf32>
    %181 = tpu.concatenate %172, %173, %174, %175, %176, %177, %178, %179, %180 in 3 : vector<2x8x8x8xf32>, vector<2x8x8x8xf32>, vector<2x8x8x8xf32>, vector<2x8x8x8xf32>, vector<2x8x8x8xf32>, vector<2x8x8x8xf32>, vector<2x8x8x8xf32>, vector<2x8x8x8xf32>, vector<2x8x8x8xf32> -> vector<2x8x8x72xf32>
    %182 = vector.shape_cast %181 : vector<2x8x8x72xf32> to vector<128x72xf32>
    %183 = vector.extract_strided_slice %167 {offsets = [0, 0], sizes = [72, 4], strides = [1, 1]} : vector<74x4xf32> to vector<72x4xf32>
    %cst_33 = arith.constant dense<0.000000e+00> : vector<128x4xf32>
    %184 = tpu.matmul %182, %183, %cst_33 {dimension_numbers = #tpu.dot_dimension_numbers<[1], [0], [0], [1], [0, 0, 1, 1], [], []>} : vector<128x72xf32>, vector<72x4xf32>, vector<128x4xf32> -> vector<128x4xf32>
    %185 = vector.extract_strided_slice %167 {offsets = [72, 0], sizes = [1, 4], strides = [1, 1]} : vector<74x4xf32> to vector<1x4xf32>
    %186 = vector.extract_strided_slice %167 {offsets = [73, 0], sizes = [1, 4], strides = [1, 1]} : vector<74x4xf32> to vector<1x4xf32>
    %187 = vector.broadcast %185 : vector<1x4xf32> to vector<128x4xf32>
    %188 = arith.mulf %184, %187 : vector<128x4xf32>
    %189 = vector.broadcast %186 : vector<1x4xf32> to vector<128x4xf32>
    %190 = arith.addf %188, %189 : vector<128x4xf32>
    %cst_34 = arith.constant 0.000000e+00 : f32
    %191 = vector.broadcast %cst_34 : f32 to vector<128x4xf32>
    %192 = arith.maximumf %190, %191 : vector<128x4xf32>
    %193 = vector.extract_strided_slice %0 {offsets = [0, 4], sizes = [16, 8], strides = [1, 1]} : vector<16x12xf32> to vector<16x8xf32>
    %194 = vector.extract_strided_slice %1 {offsets = [33, 0], sizes = [32, 48], strides = [1, 1]} : vector<66x48xf32> to vector<32x48xf32>
    %195 = vector.extract_strided_slice %1 {offsets = [65, 0], sizes = [1, 48], strides = [1, 1]} : vector<66x48xf32> to vector<1x48xf32>
    %196 = vector.shape_cast %192 : vector<128x4xf32> to vector<2x8x8x4xf32>
    %197 = vector.extract_strided_slice %196 {offsets = [0, 0, 0, 0], sizes = [2, 8, 1, 4], strides = [1, 1, 1, 1]} : vector<2x8x8x4xf32> to vector<2x8x1x4xf32>
    %198 = vector.shape_cast %197 : vector<2x8x1x4xf32> to vector<2x8x4xf32>
    %199 = vector.extract_strided_slice %196 {offsets = [0, 0, 1, 0], sizes = [2, 8, 1, 4], strides = [1, 1, 1, 1]} : vector<2x8x8x4xf32> to vector<2x8x1x4xf32>
    %200 = vector.shape_cast %199 : vector<2x8x1x4xf32> to vector<2x8x4xf32>
    %201 = vector.extract_strided_slice %196 {offsets = [0, 0, 2, 0], sizes = [2, 8, 1, 4], strides = [1, 1, 1, 1]} : vector<2x8x8x4xf32> to vector<2x8x1x4xf32>
    %202 = vector.shape_cast %201 : vector<2x8x1x4xf32> to vector<2x8x4xf32>
    %203 = vector.extract_strided_slice %196 {offsets = [0, 0, 3, 0], sizes = [2, 8, 1, 4], strides = [1, 1, 1, 1]} : vector<2x8x8x4xf32> to vector<2x8x1x4xf32>
    %204 = vector.shape_cast %203 : vector<2x8x1x4xf32> to vector<2x8x4xf32>
    %205 = vector.extract_strided_slice %196 {offsets = [0, 0, 4, 0], sizes = [2, 8, 1, 4], strides = [1, 1, 1, 1]} : vector<2x8x8x4xf32> to vector<2x8x1x4xf32>
    %206 = vector.shape_cast %205 : vector<2x8x1x4xf32> to vector<2x8x4xf32>
    %207 = vector.extract_strided_slice %196 {offsets = [0, 0, 5, 0], sizes = [2, 8, 1, 4], strides = [1, 1, 1, 1]} : vector<2x8x8x4xf32> to vector<2x8x1x4xf32>
    %208 = vector.shape_cast %207 : vector<2x8x1x4xf32> to vector<2x8x4xf32>
    %209 = vector.extract_strided_slice %196 {offsets = [0, 0, 6, 0], sizes = [2, 8, 1, 4], strides = [1, 1, 1, 1]} : vector<2x8x8x4xf32> to vector<2x8x1x4xf32>
    %210 = vector.shape_cast %209 : vector<2x8x1x4xf32> to vector<2x8x4xf32>
    %211 = vector.extract_strided_slice %196 {offsets = [0, 0, 7, 0], sizes = [2, 8, 1, 4], strides = [1, 1, 1, 1]} : vector<2x8x8x4xf32> to vector<2x8x1x4xf32>
    %212 = vector.shape_cast %211 : vector<2x8x1x4xf32> to vector<2x8x4xf32>
    %213 = tpu.concatenate %198, %200, %202, %204, %206, %208, %210, %212 in 2 : vector<2x8x4xf32>, vector<2x8x4xf32>, vector<2x8x4xf32>, vector<2x8x4xf32>, vector<2x8x4xf32>, vector<2x8x4xf32>, vector<2x8x4xf32>, vector<2x8x4xf32> -> vector<2x8x32xf32>
    %214 = vector.extract_strided_slice %213 {offsets = [0, 0, 0], sizes = [1, 8, 32], strides = [1, 1, 1]} : vector<2x8x32xf32> to vector<1x8x32xf32>
    %215 = vector.shape_cast %214 : vector<1x8x32xf32> to vector<8x32xf32>
    %cst_35 = arith.constant dense<0.000000e+00> : vector<16x32xf32>
    %216 = tpu.matmul %193, %215, %cst_35 {dimension_numbers = #tpu.dot_dimension_numbers<[1], [0], [0], [1], [0, 0, 1, 1], [], []>} : vector<16x8xf32>, vector<8x32xf32>, vector<16x32xf32> -> vector<16x32xf32>
    %217 = vector.extract_strided_slice %213 {offsets = [1, 0, 0], sizes = [1, 8, 32], strides = [1, 1, 1]} : vector<2x8x32xf32> to vector<1x8x32xf32>
    %218 = vector.shape_cast %217 : vector<1x8x32xf32> to vector<8x32xf32>
    %cst_36 = arith.constant dense<0.000000e+00> : vector<16x32xf32>
    %219 = tpu.matmul %193, %218, %cst_36 {dimension_numbers = #tpu.dot_dimension_numbers<[1], [0], [0], [1], [0, 0, 1, 1], [], []>} : vector<16x8xf32>, vector<8x32xf32>, vector<16x32xf32> -> vector<16x32xf32>
    %220 = tpu.concatenate %216, %219 in 0 : vector<16x32xf32>, vector<16x32xf32> -> vector<32x32xf32>
    %cst_37 = arith.constant dense<0.000000e+00> : vector<32x48xf32>
    %221 = tpu.matmul %220, %194, %cst_37 {dimension_numbers = #tpu.dot_dimension_numbers<[1], [0], [0], [1], [0, 0, 1, 1], [], []>} : vector<32x32xf32>, vector<32x48xf32>, vector<32x48xf32> -> vector<32x48xf32>
    %222 = vector.broadcast %195 : vector<1x48xf32> to vector<32x48xf32>
    %223 = arith.addf %221, %222 : vector<32x48xf32>
    %224 = tpu.concatenate %166, %223 in 1 : vector<32x48xf32>, vector<32x48xf32> -> vector<32x96xf32>
    %c0_38 = arith.constant 0 : index
    %c0_39 = arith.constant 0 : index
    %225 = vector.load %arg9[%c0_38, %c0_39] : memref<32x96xf32, #tpu.memory_space<vmem>>, vector<32x96xf32>
    tpu.vector_store %arg9[%c0_38, %c0_39], %224 {strides = array<i32>} : memref<32x96xf32, #tpu.memory_space<vmem>>, vector<32x96xf32>,
    return
  }
  func.func @transform_0(%arg0: i32) -> (i32, i32, i32, i32) {
    %c0_i32 = arith.constant 0 : i32
    %c0_i32_0 = arith.constant 0 : i32
    %c0_i32_1 = arith.constant 0 : i32
    %c0_i32_2 = arith.constant 0 : i32
    %c0_i32_3 = arith.constant 0 : i32
    return %c0_i32, %c0_i32_0, %c0_i32_1, %c0_i32_2 : i32, i32, i32, i32
  }
  func.func @transform_1(%arg0: i32) -> (i32, i32, i32, i32) {
    %c0_i32 = arith.constant 0 : i32
    %c0_i32_0 = arith.constant 0 : i32
    %c0_i32_1 = arith.constant 0 : i32
    %c0_i32_2 = arith.constant 0 : i32
    %c0_i32_3 = arith.constant 0 : i32
    return %c0_i32, %c0_i32_0, %c0_i32_1, %c0_i32_2 : i32, i32, i32, i32
  }
  func.func @transform_2(%arg0: i32) -> (i32, i32) {
    %c0_i32 = arith.constant 0 : i32
    %c0_i32_0 = arith.constant 0 : i32
    %c0_i32_1 = arith.constant 0 : i32
    return %c0_i32, %c0_i32_0 : i32, i32
  }
  func.func @transform_3(%arg0: i32) -> (i32, i32) {
    %c0_i32 = arith.constant 0 : i32
    %c0_i32_0 = arith.constant 0 : i32
    %c0_i32_1 = arith.constant 0 : i32
    return %c0_i32, %c0_i32_0 : i32, i32
  }
  func.func @transform_4(%arg0: i32) -> (i32, i32) {
    %c0_i32 = arith.constant 0 : i32
    %c0_i32_0 = arith.constant 0 : i32
    %c0_i32_1 = arith.constant 0 : i32
    return %c0_i32, %c0_i32_0 : i32, i32
  }
  func.func @transform_5(%arg0: i32) -> (i32, i32) {
    %c0_i32 = arith.constant 0 : i32
    %c0_i32_0 = arith.constant 0 : i32
    %c0_i32_1 = arith.constant 0 : i32
    return %c0_i32, %c0_i32_0 : i32, i32
  }
  func.func @transform_6(%arg0: i32) -> (i32, i32) {
    %c0_i32 = arith.constant 0 : i32
    %c0_i32_0 = arith.constant 0 : i32
    %c0_i32_1 = arith.constant 0 : i32
    return %c0_i32, %c0_i32_0 : i32, i32
  }
  func.func @transform_7(%arg0: i32) -> (i32, i32) {
    %c0_i32 = arith.constant 0 : i32
    %c0_i32_0 = arith.constant 0 : i32
    %c0_i32_1 = arith.constant 0 : i32
    return %c0_i32, %c0_i32_0 : i32, i32
  }
  func.func @transform_8(%arg0: i32) -> (i32, i32) {
    %c0_i32 = arith.constant 0 : i32
    %c0_i32_0 = arith.constant 0 : i32
    %c0_i32_1 = arith.constant 0 : i32
    return %c0_i32, %c0_i32_0 : i32, i32
  }
}

</mosaic_0001>

<bundles_post_ra>
// kernel: fcn_forward.1
= control target key start
LH: loop header
LB: loop body
LE: loop exit
PB: predicated region body
PF: predicated region fallthrough
CT: control target
= control target key end

     0   :  { %vm243_vm0 = vcmask 1046528   ;;  %s3795_s11 = smov 12   ;;  %s3796_s12 = smov 4   ;;  %vm921_vm1 = vcmask 1043456   ;;  %vm6636_vm2 = vcmask 31744   ;;  %vm753_vm3 = vcmask 64512   ;;  %s6624_s1 = inlined_call_operand.vmem [shape: f32[2,18,9,4], index: 1, kind: input, shape index: {}]   ;;  %s6625_s0 = inlined_call_operand.vmem [shape: f32[2,18,8,4], index: 0, kind: input, shape index: {}]   ;;  %s6626_s2 = inlined_call_operand.vmem [shape: f32[38,8], index: 2, kind: input, shape index: {}]   ;;  %s6627_s3 = inlined_call_operand.vmem [shape: f32[74,16], index: 3, kind: input, shape index: {}]   ;;  %s6628_s4 = inlined_call_operand.vmem [shape: f32[146,8], index: 4, kind: input, shape index: {}]   ;;  %s6629_s5 = inlined_call_operand.vmem [shape: f32[74,4], index: 5, kind: input, shape index: {}]   ;;  %s6630_s6 = inlined_call_operand.vmem [shape: f32[16,12], index: 6, kind: input, shape index: {}]   ;;  %s6631_s7 = inlined_call_operand.vmem [shape: f32[66,48], index: 7, kind: input, shape index: {}]   ;;  %s6632_s8 = inlined_call_operand.vmem [shape: f32[32,96], index: 8, kind: output, shape index: {}]  }
   0x1   :  { %v76_v0 = vld [vmem:[%s6624_s1 + $0x10] sm:$0xff]  ;;  %v40_v1 = vld [vmem:[%s6625_s0] sm:$0xff]  ;;  %v77_v2 = vld [vmem:[%s6624_s1 + $0x18] sm:$0x1]  ;;  %s3797_s17 = smov 20   ;;  %s3798_s22 = smov 16  }
   0x2   :  { %356 = vrot.lane.b32.xlu1 %v76_v0, %s3795_s11  ;;  %v484_v3 = vrot.slane %v76_v0, 1  ;;  %163 = vrot.lane.b32.xlu0 %v40_v1, %s3796_s12  ;;  %v485_v4 = vrot.slane %v77_v2, 1  ;;  %v3871_v5 = vld [vmem:[%s6624_s1] sm:$0xff]  ;;  %v75_v6 = vld [vmem:[%s6624_s1 + $0x8] sm:$0x1]  ;;  %s3799_s23 = smov 8  }
   0x3   :  { %v244_v7 = vrot.slane %v3871_v5, 1  ;;  %v245_v9 = vrot.slane %v75_v6, 1  ;;  %v41_v10 = vld [vmem:[%s6625_s0 + $0x8] sm:$0xff]  ;;  %v3891_v13 = vld [vmem:[%s6624_s1 + $0x20] sm:$0xff]  ;;  %s3800_s26 = smov 24   ;;  %v42_v17 = vld [vmem:[%s6625_s0 + $0x10] sm:$0xff] }
   0x4   :  { %v486_v8 = vsel %vm243_vm0, %v484_v3, %v485_v4  ;;  %v79_v12 = vld [vmem:[%s6624_s1 + $0x28] sm:$0x1]  ;;  %v247_v14 = vrot.slane %v3891_v13, 1  ;;  %s3801_s29 = smov 32   ;;  %s3802_s30 = smov 28   ;;  %v80_v18 = vld [vmem:[%s6624_s1 + $0x30] sm:$0xff] }
   0x5   :  { %532 = vrot.lane.b32.xlu2 %v486_v8, %s3797_s17  ;;  %v246_v11 = vsel %vm243_vm0, %v244_v7, %v245_v9  ;;  %v248_v15 = vrot.slane %v79_v12, 1  ;;  %v81_v19 = vld [vmem:[%s6624_s1 + $0x38] sm:$0x1]  ;;  %v487_v21 = vrot.slane %v80_v18, 1  ;;  %v3918_v23 = vld [vmem:[%s6624_s1 + $0x40] sm:$0xff]  ;;  %v84_v30 = vld [vmem:[%s6624_s1 + $0x50] sm:$0xff] }
   0x6   :  { %v43_v20 = vld [vmem:[%s6625_s0 + $0x18] sm:$0xff]  ;;  %v488_v22 = vrot.slane %v81_v19, 1  ;;  %v83_v25 = vld [vmem:[%s6624_s1 + $0x48] sm:$0x1]  ;;  %v44_v26 = vld [vmem:[%s6625_s0 + $0x20] sm:$0xff]  ;;  %v250_v27 = vrot.slane %v3918_v23, 1 }
   0x7   :  { %v249_v16 = vsel %vm243_vm0, %v247_v14, %v248_v15  ;;  %v251_v28 = vrot.slane %v83_v25, 1  ;;  %v85_v31 = vld [vmem:[%s6624_s1 + $0x58] sm:$0x1]  ;;  %v490_v32 = vrot.slane %v84_v30, 1  ;;  %v45_v34 = vld [vmem:[%s6625_s0 + $0x28] sm:$0xff]  ;;  %v3951_v36 = vld [vmem:[%s6624_s1 + $0x60] sm:$0xff] }
   0x8   :  { %v489_v24 = vsel %vm243_vm0, %v487_v21, %v488_v22  ;;  %v491_v33 = vrot.slane %v85_v31, 1  ;;  %v87_v37 = vld [vmem:[%s6624_s1 + $0x68] sm:$0x1]  ;;  %v253_v38 = vrot.slane %v3951_v36, 1  ;;  %v46_v40 = vld [vmem:[%s6625_s0 + $0x30] sm:$0xff]  ;;  %v47_v47 = vld [vmem:[%s6625_s0 + $0x38] sm:$0xff] }
   0x9   :  { %v252_v29 = vsel %vm243_vm0, %v250_v27, %v251_v28  ;;  %v254_v39 = vrot.slane %v87_v37, 1  ;;  %v89_v42 = vld [vmem:[%s6624_s1 + $0x78] sm:$0x1]  ;;  %v88_v43 = vld [vmem:[%s6624_s1 + $0x70] sm:$0xff]  ;;  %v91_v48 = vld [vmem:[%s6624_s1 + $0x88] sm:$0x1] }
   0xa   :  { %420 = vrot.lane.b32.xlu1 %v41_v10, %s3798_s22  ;;  %292 = vrot.lane.b32.xlu0 %v246_v11, %s3799_s23  ;;  %v492_v35 = vsel %vm243_vm0, %v490_v32, %v491_v33  ;;  %v493_v44 = vrot.slane %v88_v43, 1  ;;  %v494_v45 = vrot.slane %v89_v42, 1  ;;  %v3987_v49 = vld [vmem:[%s6624_s1 + $0x80] sm:$0xff]  ;;  %v257_v51 = vrot.slane %v91_v48, 1  ;;  %v92_v54 = vld [vmem:[%s6624_s1 + $0x90] sm:$0xff]  ;;  %s3805_s15 = smov 48  }
   0xb   :  { %v255_v41 = vsel %vm243_vm0, %v253_v38, %v254_v39  ;;  %v256_v50 = vrot.slane %v3987_v49, 1  ;;  %v48_v53 = vld [vmem:[%s6625_s0 + $0x40] sm:$0xff]  ;;  %v93_v55 = vld [vmem:[%s6624_s1 + $0x98] sm:$0x1]  ;;  %v49_v56 = vld [vmem:[%s6625_s0 + $0x48] sm:$0xff]  ;;  %v496_v57 = vrot.slane %v92_v54, 1 }
   0xc   :  { %v495_v46 = vsel %vm243_vm0, %v493_v44, %v494_v45  ;;  %v497_v58 = vrot.slane %v93_v55, 1  ;;  %v4014_v59 = vld [vmem:[%s6626_s2 + $0x20] sm:$0x3f]  ;;  %v145_v63 = vld [vmem:[%s6626_s2 + $0x18] sm:$0xff]  ;;  %v95_v0 = vld [vmem:[%s6624_s1 + $0xa8] sm:$0x1] }
   0xd   :  { %582 = vrot.lane.b32.xlu2 %v3891_v13, %s3800_s26  ;;  %v258_v52 = vsel %vm243_vm0, %v256_v50, %v257_v51  ;;  %3692 = vmatpush.msk.msra.mxu0 %vm921_vm1, %v4014_v59  ;;  %v4021_v61 = vld [vmem:[%s6624_s1 + $0xa0] sm:$0xff]  ;;  %v144_v1 = vld [vmem:[%s6626_s2 + $0x10] sm:$0xff]  ;;  %v143_v3 = vld [vmem:[%s6626_s2 + $0x8] sm:$0xff]  ;;  %v260_v6 = vrot.slane %v95_v0, 1  ;;  %vm6635_vm4 = vcmask 97280   ;;  %vm787_vm5 = vcmask 130048  }
   0xe   :  { %v498_v62 = vsel %vm243_vm0, %v496_v57, %v497_v58  ;;  %v50_v2 = vld [vmem:[%s6625_s0 + $0x50] sm:$0xff]  ;;  %v259_v4 = vrot.slane %v4021_v61, 1  ;;  %v142_v7 = vld [vmem:[%s6626_s2] sm:$0xff]  ;;  %v97_v11 = vld [vmem:[%s6624_s1 + $0xb8] sm:$0x1]  ;;  %vm6634_vm6 = vcmask 162816  }
   0xf   :  { %937 = vmatpush.msra.mxu0 %v145_v63  ;;  %v96_v10 = vld [vmem:[%s6624_s1 + $0xb0] sm:$0xff]  ;;  %v500_v14 = vrot.slane %v97_v11, 1  ;;  %v99_v19 = vld [vmem:[%s6624_s1 + $0xc8] sm:$0x1]  ;;  %vm821_vm7 = vcmask 195584   ;;  %vm6633_vm8 = vcmask 228352  }
  0x10   :  { %v261_v9 = vsel %vm243_vm0, %v259_v4, %v260_v6  ;;  %v499_v12 = vrot.slane %v96_v10, 1  ;;  %vm6642_vm9 = vcmask 261120   ;;  %vm872_vm10 = vcmask 293888   ;;  %v103_v48 = vld [vmem:[%s6624_s1 + $0xe8] sm:$0x1]  ;;  %v4112_v50 = vld [vmem:[%s6624_s1 + $0xe0] sm:$0xff] }
  0x11   :  { %938 = vmatpush.msra.mxu0 %v144_v1  ;;  %v265_v51 = vrot.slane %v4112_v50, 1  ;;  %v105_v4 = vld [vmem:[%s6624_s1 + $0xf8] sm:$0x1]  ;;  %vm1168_vm11 = vcmask 1041409   ;;  %vm1170_vm12 = vcmask 1042434   ;;  %vm1172_vm13 = vcmask 1043459  }
  0x12   :  { %688 = vrot.lane.b32.xlu1 %v249_v16, %s3801_s29  ;;  %632 = vrot.lane.b32.xlu0 %v42_v17, %s3802_s30  ;;  %vm1366_vm14 = vcmask 1040384   ;;  %s3806_s16 = smov 56   ;;  %s3807_s2 = smov 64   ;;  %vm6639_vm15 = vcmask 326656  }
  0x13   :  { %939 = vmatpush.msra.mxu0 %v143_v3  ;;  %v104_v3 = vld [vmem:[%s6624_s1 + $0xf0] sm:$0xff]  ;;  %s3808_s25 = smov 112   ;;  %s3809_s27 = smov 96  }
  0x15   :  { %165 = vrot.lane.b32.xlu2 %v42_v17, %s3796_s12  ;;  %940 = vmatpush.msra.mxu0 %v142_v7  ;;  %v501_v17 = vsel %vm243_vm0, %v499_v12, %v500_v14  ;;  %v55_v7 = vld [vmem:[%s6625_s0 + $0x78] sm:$0xff] }
  0x1a   :  { %358 = vrot.lane.b32.xlu1 %v80_v18, %s3795_s11  ;;  %294 = vrot.lane.b32.xlu0 %v249_v16, %s3799_s23  ;;  %v51_v16 = vld [vmem:[%s6625_s0 + $0x58] sm:$0xff]  ;;  %v4066_v18 = vld [vmem:[%s6624_s1 + $0xc0] sm:$0xff] }
  0x1b   :  { %v262_v22 = vrot.slane %v4066_v18, 1 }
  0x1d   :  { %422 = vrot.lane.b32.xlu2 %v43_v20, %s3798_s22 }
  0x22   :  { %584 = vrot.lane.b32.xlu1 %v3918_v23, %s3800_s26  ;;  %534 = vrot.lane.b32.xlu0 %v489_v24, %s3797_s17  ;;  %v263_v24 = vrot.slane %v99_v19, 1  ;;  %v107_v19 = vld [vmem:[%s6624_s1 + $0x108] sm:$0x1] }
  0x24   :  { %v264_v27 = vsel %vm243_vm0, %v262_v22, %v263_v24  ;;  %v683_v24 = vrot.slane %v107_v19, 1  ;;  %v60_v19 = vld [vmem:[%s6625_s0 + $0xa8] sm:$0xff] }
  0x25   :  { %634 = vrot.lane.b32.xlu2 %v44_v26, %s3802_s30 }
  0x2a   :  { %167 = vrot.lane.b32.xlu1 %v44_v26, %s3796_s12  ;;  %690 = vrot.lane.b32.xlu0 %v252_v29, %s3801_s29  ;;  %v52_v26 = vld [vmem:[%s6625_s0 + $0x60] sm:$0xff] }
  0x2d   :  { %296 = vrot.lane.b32.xlu2 %v252_v29, %s3799_s23 }
  0x32   :  { %424 = vrot.lane.b32.xlu1 %v45_v34, %s3798_s22  ;;  %360 = vrot.lane.b32.xlu0 %v84_v30, %s3795_s11 }
  0x35   :  { %536 = vrot.lane.b32.xlu2 %v492_v35, %s3797_s17  ;;  %v101_v35 = vld [vmem:[%s6624_s1 + $0xd8] sm:$0x1] }
  0x36   :  { %v503_v39 = vrot.slane %v101_v35, 1 }
  0x3a   :  { %636 = vrot.lane.b32.xlu1 %v46_v40, %s3802_s30  ;;  %586 = vrot.lane.b32.xlu0 %v3951_v36, %s3800_s26 }
  0x3d   :  { %692 = vrot.lane.b32.xlu2 %v255_v41, %s3801_s29 }
  0x42   :  { %298 = vrot.lane.b32.xlu1 %v255_v41, %s3799_s23  ;;  %169 = vrot.lane.b32.xlu0 %v46_v40, %s3796_s12 }
  0x45   :  { %362 = vrot.lane.b32.xlu2 %v88_v43, %s3795_s11 }
  0x4a   :  { %538 = vrot.lane.b32.xlu1 %v495_v46, %s3797_s17  ;;  %426 = vrot.lane.b32.xlu0 %v47_v47, %s3798_s22  ;;  %v53_v47 = vld [vmem:[%s6625_s0 + $0x68] sm:$0xff] }
  0x4d   :  { %588 = vrot.lane.b32.xlu2 %v3987_v49, %s3800_s26 }
  0x52   :  { %694 = vrot.lane.b32.xlu1 %v258_v52, %s3801_s29  ;;  %638 = vrot.lane.b32.xlu0 %v48_v53, %s3802_s30 }
  0x55   :  { %171 = vrot.lane.b32.xlu2 %v48_v53, %s3796_s12 }
  0x5a   :  { %364 = vrot.lane.b32.xlu1 %v92_v54, %s3795_s11  ;;  %300 = vrot.lane.b32.xlu0 %v258_v52, %s3799_s23  ;;  %v266_v52 = vrot.slane %v103_v48, 1  ;;  %v58_v48 = vld [vmem:[%s6625_s0 + $0x98] sm:$0xff] }
  0x5c   :  { %v267_v58 = vsel %vm243_vm0, %v265_v51, %v266_v52  ;;  %v4201_v52 = vld [vmem:[%s6624_s1 + $0x140] sm:$0xff] }
  0x5d   :  { %428 = vrot.lane.b32.xlu2 %v49_v56, %s3798_s22 }
  0x5f   :  { %v533_v60 = vpop.permute.xlu2 %532 }
  0x62   :  { %590 = vrot.lane.b32.xlu1 %v4021_v61, %s3800_s26  ;;  %540 = vrot.lane.b32.xlu0 %v498_v62, %s3797_s17 }
  0x65   :  { %640 = vrot.lane.b32.xlu2 %v50_v2, %s3802_s30 }
  0x67   :  { %v583_v8 = vpop.permute.xlu2 %582 }
  0x6a   :  { %173 = vrot.lane.b32.xlu1 %v50_v2, %s3796_s12  ;;  %696 = vrot.lane.b32.xlu0 %v261_v9, %s3801_s29 }
  0x6d   :  { %302 = vrot.lane.b32.xlu2 %v261_v9, %s3799_s23  ;;  %v506_v9 = vrot.slane %v105_v4, 1  ;;  %v115_v4 = vld [vmem:[%s6624_s1 + $0x158] sm:$0x1] }
  0x6f   :  { %v166_v15 = vpop.permute.xlu2 %165 }
  0x70   :  { %v738_v53 = vsel %vm6636_vm2, %v3891_v13, %v166_v15 }
  0x72   :  { %430 = vrot.lane.b32.xlu1 %v51_v16, %s3798_s22  ;;  %366 = vrot.lane.b32.xlu0 %v96_v10, %s3795_s11  ;;  %v106_v16 = vld [vmem:[%s6624_s1 + $0x100] sm:$0xff] }
  0x73   :  { %v682_v22 = vrot.slane %v106_v16, 1 }
  0x74   :  { %v357_v20 = vpop.permute.xlu1 %356  ;;  %v164_v21 = vpop.permute.xlu0 %163 }
  0x75   :  { %542 = vrot.lane.b32.xlu2 %v501_v17, %s3797_s17  ;;  %v737_v28 = vsel %vm6636_vm2, %v3871_v5, %v164_v21  ;;  %v100_v5 = vld [vmem:[%s6624_s1 + $0xd0] sm:$0xff]  ;;  %v56_v21 = vld [vmem:[%s6625_s0 + $0x80] sm:$0xff] }
  0x76   :  { %v502_v38 = vrot.slane %v100_v5, 1 }
  0x77   :  { %v423_v25 = vpop.permute.xlu2 %422 }
  0x78   :  { %v504_v46 = vsel %vm243_vm0, %v502_v38, %v503_v39  ;;  %v111_v38 = vld [vmem:[%s6624_s1 + $0x138] sm:$0x1] }
  0x7a   :  { %642 = vrot.lane.b32.xlu1 %v52_v26, %s3802_s30  ;;  %592 = vrot.lane.b32.xlu0 %v4066_v18, %s3800_s26 }
  0x7c   :  { %v421_v29 = vpop.permute.xlu1 %420  ;;  %v293_v30 = vpop.permute.xlu0 %292 }
  0x7d   :  { %v754_v31 = vsel %vm753_vm3, %v737_v28, %v293_v30  ;;  %698 = vrot.lane.b32.xlu2 %v264_v27, %s3801_s29 }
  0x7e   :  { %v771_v32 = vsel %vm6635_vm4, %v754_v31, %v357_v20 }
  0x7f   :  { %v788_v33 = vsel %vm787_vm5, %v771_v32, %v421_v29  ;;  %v635_v34 = vpop.permute.xlu2 %634 }
  0x80   :  { %v805_v37 = vsel %vm6634_vm6, %v788_v33, %v533_v60  ;;  %v54_v60 = vld [vmem:[%s6625_s0 + $0x70] sm:$0xff] }
  0x81   :  { %v822_v41 = vsel %vm821_vm7, %v805_v37, %v583_v8  ;;  %v505_v8 = vrot.slane %v104_v3, 1  ;;  %v57_v33 = vld [vmem:[%s6625_s0 + $0x90] sm:$0xff] }
  0x82   :  { %304 = vrot.lane.b32.xlu1 %v264_v27, %s3799_s23  ;;  %175 = vrot.lane.b32.xlu0 %v52_v26, %s3796_s12  ;;  %v109_v26 = vld [vmem:[%s6624_s1 + $0x128] sm:$0x1] }
  0x83   :  { %v507_v17 = vsel %vm243_vm0, %v505_v8, %v506_v9  ;;  %v269_v31 = vrot.slane %v109_v26, 1  ;;  %v512_v9 = vrot.slane %v115_v4, 1 }
  0x84   :  { %v689_v40 = vpop.permute.xlu1 %688  ;;  %v633_v42 = vpop.permute.xlu0 %632 }
  0x85   :  { %v839_v43 = vsel %vm6633_vm8, %v822_v41, %v633_v42  ;;  %368 = vrot.lane.b32.xlu2 %v100_v5, %s3795_s11  ;;  %v110_v5 = vld [vmem:[%s6624_s1 + $0x130] sm:$0xff] }
  0x86   :  { %v856_v44 = vsel %vm6642_vm9, %v839_v43, %v689_v40 }
  0x87   :  { %v297_v45 = vpop.permute.xlu2 %296  ;;  %3693 = vmatmul.msk.f32.vlgmr.msra.gmra.mxu0 %vm872_vm10, %v856_v44  ;;  %v508_v44 = vrot.slane %v110_v5, 1 }
  0x8a   :  { %544 = vrot.lane.b32.xlu1 %v504_v46, %s3797_s17  ;;  %432 = vrot.lane.b32.xlu0 %v53_v47, %s3798_s22 }
  0x8c   :  { %v359_v54 = vpop.permute.xlu1 %358  ;;  %v295_v55 = vpop.permute.xlu0 %294 }
  0x8d   :  { %594 = vrot.lane.b32.xlu2 %v4112_v50, %s3800_s26  ;;  %v755_v56 = vsel %vm753_vm3, %v738_v53, %v295_v55  ;;  %v113_v53 = vld [vmem:[%s6624_s1 + $0x148] sm:$0x1] }
  0x8e   :  { %v772_v62 = vsel %vm6635_vm4, %v755_v56, %v359_v54  ;;  %v271_v56 = vrot.slane %v4201_v52, 1 }
  0x8f   :  { %v537_v57 = vpop.permute.xlu2 %536  ;;  %v789_v0 = vsel %vm787_vm5, %v772_v62, %v423_v25  ;;  %v4163_v25 = vld [vmem:[%s6624_s1 + $0x120] sm:$0xff] }
  0x90   :  { %v268_v30 = vrot.slane %v4163_v25, 1  ;;  %v59_v62 = vld [vmem:[%s6625_s0 + $0xa0] sm:$0xff] }
  0x92   :  { %700 = vrot.lane.b32.xlu1 %v267_v58, %s3801_s29  ;;  %644 = vrot.lane.b32.xlu0 %v54_v60, %s3802_s30  ;;  %v270_v37 = vsel %vm243_vm0, %v268_v30, %v269_v31  ;;  %v61_v31 = vld [vmem:[%s6625_s0 + $0xb0] sm:$0xff] }
  0x94   :  { %v585_v13 = vpop.permute.xlu1 %584  ;;  %v535_v63 = vpop.permute.xlu0 %534 }
  0x95   :  { %177 = vrot.lane.b32.xlu2 %v54_v60, %s3796_s12  ;;  %v806_v1 = vsel %vm6634_vm6, %v789_v0, %v535_v63 }
  0x96   :  { %v823_v6 = vsel %vm821_vm7, %v806_v1, %v585_v13 }
  0x97   :  { %v693_v2 = vpop.permute.xlu2 %692  ;;  %v840_v12 = vsel %vm6633_vm8, %v823_v6, %v635_v34  ;;  %v684_v34 = vsel %vm243_vm0, %v682_v22, %v683_v24 }
  0x9a   :  { %370 = vrot.lane.b32.xlu1 %v104_v3, %s3795_s11  ;;  %306 = vrot.lane.b32.xlu0 %v267_v58, %s3799_s23 }
  0x9c   :  { %v168_v10 = vpop.permute.xlu1 %167  ;;  %v691_v11 = vpop.permute.xlu0 %690 }
  0x9d   :  { %434 = vrot.lane.b32.xlu2 %v55_v7, %s3798_s22  ;;  %v857_v14 = vsel %vm6642_vm9, %v840_v12, %v691_v11  ;;  %v739_v20 = vsel %vm6636_vm2, %v3918_v23, %v168_v10  ;;  %v114_v7 = vld [vmem:[%s6624_s1 + $0x150] sm:$0xff] }
  0x9e   :  { %3694 = vmatmul.msk.f32.gmra.mxu0 %vm872_vm10, %v857_v14  ;;  %v756_v28 = vsel %vm753_vm3, %v739_v20, %v297_v45  ;;  %v509_v45 = vrot.slane %v111_v38, 1  ;;  %v511_v8 = vrot.slane %v114_v7, 1  ;;  %v117_v20 = vld [vmem:[%s6624_s1 + $0x168] sm:$0x1]  ;;  %v119_v38 = vld [vmem:[%s6624_s1 + $0x178] sm:$0x1] }
  0x9f   :  { %v363_v15 = vpop.permute.xlu2 %362  ;;  %v275_v24 = vrot.slane %v117_v20, 1 }
  0xa0   :  { %v510_v51 = vsel %vm243_vm0, %v508_v44, %v509_v45 }
  0xa2   :  { %596 = vrot.lane.b32.xlu1 %v106_v16, %s3800_s26  ;;  %546 = vrot.lane.b32.xlu0 %v507_v17, %s3797_s17  ;;  %v513_v17 = vsel %vm243_vm0, %v511_v8, %v512_v9 }
  0xa4   :  { %v425_v23 = vpop.permute.xlu1 %424  ;;  %v361_v27 = vpop.permute.xlu0 %360 }
  0xa5   :  { %646 = vrot.lane.b32.xlu2 %v56_v21, %s3802_s30  ;;  %v773_v29 = vsel %vm6635_vm4, %v756_v28, %v361_v27  ;;  %v4247_v21 = vld [vmem:[%s6624_s1 + $0x160] sm:$0xff] }
  0xa6   :  { %v790_v35 = vsel %vm787_vm5, %v773_v29, %v425_v23  ;;  %v274_v22 = vrot.slane %v4247_v21, 1 }
  0xa7   :  { %v589_v32 = vpop.permute.xlu2 %588  ;;  %v807_v40 = vsel %vm6634_vm6, %v790_v35, %v537_v57  ;;  %v272_v57 = vrot.slane %v113_v53, 1  ;;  %v121_v53 = vld [vmem:[%s6624_s1 + $0x188] sm:$0x1] }
  0xa8   :  { %v276_v30 = vsel %vm243_vm0, %v274_v22, %v275_v24 }
  0xa9   :  { %v273_v63 = vsel %vm243_vm0, %v271_v56, %v272_v57  ;;  %v278_v57 = vrot.slane %v121_v53, 1 }
  0xaa   :  { %179 = vrot.lane.b32.xlu1 %v57_v33, %s3796_s12  ;;  %702 = vrot.lane.b32.xlu0 %v684_v34, %s3801_s29 }
  0xac   :  { %v637_v39 = vpop.permute.xlu1 %636  ;;  %v587_v41 = vpop.permute.xlu0 %586 }
  0xad   :  { %v824_v42 = vsel %vm821_vm7, %v807_v40, %v587_v41  ;;  %308 = vrot.lane.b32.xlu2 %v270_v37, %s3799_s23  ;;  %v62_v40 = vld [vmem:[%s6625_s0 + $0xb8] sm:$0xff] }
  0xae   :  { %v841_v43 = vsel %vm6633_vm8, %v824_v42, %v637_v39  ;;  %v515_v42 = vrot.slane %v119_v38, 1 }
  0xaf   :  { %v172_v46 = vpop.permute.xlu2 %171  ;;  %v858_v47 = vsel %vm6642_vm9, %v841_v43, %v693_v2 }
  0xb0   :  { %3695 = vmatmul.msk.f32.gmra.mxu0 %vm872_vm10, %v858_v47  ;;  %v741_v26 = vsel %vm6636_vm2, %v3987_v49, %v172_v46 }
  0xb2   :  { %436 = vrot.lane.b32.xlu1 %v58_v48, %s3798_s22  ;;  %372 = vrot.lane.b32.xlu0 %v110_v5, %s3795_s11  ;;  %v118_v5 = vld [vmem:[%s6624_s1 + $0x170] sm:$0xff]  ;;  %v4284_v48 = vld [vmem:[%s6624_s1 + $0x180] sm:$0xff] }
  0xb3   :  { %v514_v41 = vrot.slane %v118_v5, 1  ;;  %v277_v56 = vrot.slane %v4284_v48, 1 }
  0xb4   :  { %v299_v54 = vpop.permute.xlu1 %298  ;;  %v170_v55 = vpop.permute.xlu0 %169 }
  0xb5   :  { %548 = vrot.lane.b32.xlu2 %v510_v51, %s3797_s17  ;;  %v740_v58 = vsel %vm6636_vm2, %v3951_v36, %v170_v55  ;;  %v516_v51 = vsel %vm243_vm0, %v514_v41, %v515_v42  ;;  %v63_v55 = vld [vmem:[%s6625_s0 + $0xc0] sm:$0xff] }
  0xb6   :  { %v757_v13 = vsel %vm753_vm3, %v740_v58, %v299_v54 }
  0xb7   :  { %v429_v60 = vpop.permute.xlu2 %428  ;;  %v774_v2 = vsel %vm6635_vm4, %v757_v13, %v363_v15 }
  0xba   :  { %648 = vrot.lane.b32.xlu1 %v59_v62, %s3802_s30  ;;  %598 = vrot.lane.b32.xlu0 %v4201_v52, %s3800_s26 }
  0xbc   :  { %v539_v0 = vpop.permute.xlu1 %538  ;;  %v427_v1 = vpop.permute.xlu0 %426 }
  0xbd   :  { %704 = vrot.lane.b32.xlu2 %v273_v63, %s3801_s29  ;;  %v791_v36 = vsel %vm787_vm5, %v774_v2, %v427_v1  ;;  %v122_v1 = vld [vmem:[%s6624_s1 + $0x190] sm:$0xff]  ;;  %v123_v2 = vld [vmem:[%s6624_s1 + $0x198] sm:$0x1] }
  0xbe   :  { %v808_v6 = vsel %vm6634_vm6, %v791_v36, %v539_v0  ;;  %v517_v8 = vrot.slane %v122_v1, 1  ;;  %v518_v9 = vrot.slane %v123_v2, 1  ;;  %v131_v2 = vld [vmem:[%s6624_s1 + $0x1d8] sm:$0x1] }
  0xbf   :  { %v641_v3 = vpop.permute.xlu2 %640  ;;  %v825_v11 = vsel %vm821_vm7, %v808_v6, %v589_v32 }
  0xc2   :  { %310 = vrot.lane.b32.xlu1 %v273_v63, %s3799_s23  ;;  %181 = vrot.lane.b32.xlu0 %v59_v62, %s3796_s12  ;;  %v279_v63 = vsel %vm243_vm0, %v277_v56, %v278_v57 }
  0xc4   :  { %v695_v10 = vpop.permute.xlu1 %694  ;;  %v639_v12 = vpop.permute.xlu0 %638 }
  0xc5   :  { %v842_v14 = vsel %vm6633_vm8, %v825_v11, %v639_v12  ;;  %374 = vrot.lane.b32.xlu2 %v114_v7, %s3795_s11  ;;  %v64_v12 = vld [vmem:[%s6625_s0 + $0xc8] sm:$0xff] }
  0xc6   :  { %v859_v15 = vsel %vm6642_vm9, %v842_v14, %v695_v10  ;;  %v519_v14 = vsel %vm243_vm0, %v517_v8, %v518_v9 }
  0xc7   :  { %v303_v16 = vpop.permute.xlu2 %302  ;;  %3696 = vmatmul.msk.f32.gmra.mxu0 %vm872_vm10, %v859_v15  ;;  %v4327_v15 = vld [vmem:[%s6624_s1 + $0x1a0] sm:$0xff] }
  0xc8   :  { %v280_v20 = vrot.slane %v4327_v15, 1 }
  0xca   :  { %550 = vrot.lane.b32.xlu1 %v513_v17, %s3797_s17  ;;  %438 = vrot.lane.b32.xlu0 %v60_v19, %s3798_s22 }
  0xcc   :  { %v365_v23 = vpop.permute.xlu1 %364  ;;  %v301_v27 = vpop.permute.xlu0 %300 }
  0xcd   :  { %600 = vrot.lane.b32.xlu2 %v4247_v21, %s3800_s26  ;;  %v758_v28 = vsel %vm753_vm3, %v741_v26, %v301_v27  ;;  %v65_v26 = vld [vmem:[%s6625_s0 + $0xd0] sm:$0xff] }
  0xce   :  { %v775_v32 = vsel %vm6635_vm4, %v758_v28, %v365_v23 }
  0xcf   :  { %v543_v29 = vpop.permute.xlu2 %542  ;;  %v792_v34 = vsel %vm787_vm5, %v775_v32, %v429_v60 }
  0xd2   :  { %706 = vrot.lane.b32.xlu1 %v276_v30, %s3801_s29  ;;  %650 = vrot.lane.b32.xlu0 %v61_v31, %s3802_s30 }
  0xd4   :  { %v591_v49 = vpop.permute.xlu1 %590  ;;  %v541_v33 = vpop.permute.xlu0 %540 }
  0xd5   :  { %183 = vrot.lane.b32.xlu2 %v61_v31, %s3796_s12  ;;  %v809_v35 = vsel %vm6634_vm6, %v792_v34, %v541_v33  ;;  %v126_v34 = vld [vmem:[%s6624_s1 + $0x1b0] sm:$0xff] }
  0xd6   :  { %v826_v39 = vsel %vm821_vm7, %v809_v35, %v591_v49  ;;  %v520_v35 = vrot.slane %v126_v34, 1 }
  0xd7   :  { %v699_v37 = vpop.permute.xlu2 %698  ;;  %v843_v45 = vsel %vm6633_vm8, %v826_v39, %v641_v3 }
  0xda   :  { %376 = vrot.lane.b32.xlu1 %v118_v5, %s3795_s11  ;;  %312 = vrot.lane.b32.xlu0 %v276_v30, %s3799_s23 }
  0xdc   :  { %v174_v43 = vpop.permute.xlu1 %173  ;;  %v697_v44 = vpop.permute.xlu0 %696 }
  0xdd   :  { %440 = vrot.lane.b32.xlu2 %v62_v40, %s3798_s22  ;;  %v860_v46 = vsel %vm6642_vm9, %v843_v45, %v697_v44  ;;  %v742_v54 = vsel %vm6636_vm2, %v4021_v61, %v174_v43  ;;  %v66_v44 = vld [vmem:[%s6625_s0 + $0xd8] sm:$0xff]  ;;  %v129_v45 = vld [vmem:[%s6624_s1 + $0x1c8] sm:$0x1] }
  0xde   :  { %3697 = vmatmul.msk.f32.gmra.mxu0 %vm872_vm10, %v860_v46  ;;  %v759_v62 = vsel %vm753_vm3, %v742_v54, %v303_v16  ;;  %v125_v16 = vld [vmem:[%s6624_s1 + $0x1a8] sm:$0x1]  ;;  %v4373_v46 = vld [vmem:[%s6624_s1 + $0x1c0] sm:$0xff] }
  0xdf   :  { %v369_v47 = vpop.permute.xlu2 %368  ;;  %v281_v22 = vrot.slane %v125_v16, 1  ;;  %v133_v16 = vld [vmem:[%s6624_s1 + $0x1e8] sm:$0x1] }
  0xe1   :  { %v282_v27 = vsel %vm243_vm0, %v280_v20, %v281_v22  ;;  %v287_v22 = vrot.slane %v133_v16, 1 }
  0xe2   :  { %602 = vrot.lane.b32.xlu1 %v4284_v48, %s3800_s26  ;;  %552 = vrot.lane.b32.xlu0 %v516_v51, %s3797_s17  ;;  %v284_v51 = vrot.slane %v129_v45, 1 }
  0xe4   :  { %v431_v58 = vpop.permute.xlu1 %430  ;;  %v367_v60 = vpop.permute.xlu0 %366 }
  0xe5   :  { %652 = vrot.lane.b32.xlu2 %v63_v55, %s3802_s30  ;;  %v776_v61 = vsel %vm6635_vm4, %v759_v62, %v367_v60 }
  0xe6   :  { %v793_v0 = vsel %vm787_vm5, %v776_v61, %v431_v58  ;;  %v67_v58 = vld [vmem:[%s6625_s0 + $0xe0] sm:$0xff] }
  0xe7   :  { %v595_v13 = vpop.permute.xlu2 %594  ;;  %v810_v3 = vsel %vm6634_vm6, %v793_v0, %v543_v29 }
  0xea   :  { %185 = vrot.lane.b32.xlu1 %v63_v55, %s3796_s12  ;;  %708 = vrot.lane.b32.xlu0 %v279_v63, %s3801_s29 }
  0xec   :  { %v643_v36 = vpop.permute.xlu1 %642  ;;  %v593_v4 = vpop.permute.xlu0 %592 }
  0xed   :  { %v827_v6 = vsel %vm821_vm7, %v810_v3, %v593_v4  ;;  %314 = vrot.lane.b32.xlu2 %v279_v63, %s3799_s23  ;;  %v68_v3 = vld [vmem:[%s6625_s0 + $0xe8] sm:$0xff] }
  0xee   :  { %v844_v7 = vsel %vm6633_vm8, %v827_v6, %v643_v36  ;;  %v524_v6 = vrot.slane %v131_v2, 1 }
  0xef   :  { %v178_v10 = vpop.permute.xlu2 %177  ;;  %v861_v11 = vsel %vm6642_vm9, %v844_v7, %v699_v37 }
  0xf0   :  { %3698 = vmatmul.msk.f32.gmra.mxu0 %vm872_vm10, %v861_v11  ;;  %v744_v54 = vsel %vm6636_vm2, %v4112_v50, %v178_v10 }
  0xf2   :  { %442 = vrot.lane.b32.xlu1 %v64_v12, %s3798_s22  ;;  %378 = vrot.lane.b32.xlu0 %v122_v1, %s3795_s11  ;;  %v130_v1 = vld [vmem:[%s6624_s1 + $0x1d0] sm:$0xff]  ;;  %v4412_v12 = vld [vmem:[%s6624_s1 + $0x1e0] sm:$0xff] }
  0xf3   :  { %v523_v4 = vrot.slane %v130_v1, 1  ;;  %v286_v20 = vrot.slane %v4412_v12, 1 }
  0xf4   :  { %v305_v17 = vpop.permute.xlu1 %304  ;;  %v176_v19 = vpop.permute.xlu0 %175 }
  0xf5   :  { %554 = vrot.lane.b32.xlu2 %v519_v14, %s3797_s17  ;;  %v743_v23 = vsel %vm6636_vm2, %v4066_v18, %v176_v19  ;;  %v127_v18 = vld [vmem:[%s6624_s1 + $0x1b8] sm:$0x1]  ;;  %v525_v14 = vsel %vm243_vm0, %v523_v4, %v524_v6 }
  0xf6   :  { %v760_v28 = vsel %vm753_vm3, %v743_v23, %v305_v17  ;;  %v521_v37 = vrot.slane %v127_v18, 1  ;;  %v69_v17 = vld [vmem:[%s6625_s0 + $0xf0] sm:$0xff]  ;;  %v139_v4 = vld [vmem:[%s6624_s1 + $0x218] sm:$0x1] }
  0xf7   :  { %v435_v24 = vpop.permute.xlu2 %434  ;;  %v777_v31 = vsel %vm6635_vm4, %v760_v28, %v369_v47  ;;  %v283_v47 = vrot.slane %v4373_v46, 1 }
  0xf8   :  { %v522_v43 = vsel %vm243_vm0, %v520_v35, %v521_v37 }
  0xf9   :  { %v285_v57 = vsel %vm243_vm0, %v283_v47, %v284_v51  ;;  %v4465_v47 = vperm.slane %v4014_v59, 4 }
  0xfa   :  { %654 = vrot.lane.b32.xlu1 %v65_v26, %s3802_s30  ;;  %604 = vrot.lane.b32.xlu0 %v4327_v15, %s3800_s26 }
  0xfc   :  { %v545_v29 = vpop.permute.xlu1 %544  ;;  %v433_v30 = vpop.permute.xlu0 %432 }
  0xfd   :  { %710 = vrot.lane.b32.xlu2 %v282_v27, %s3801_s29  ;;  %v794_v32 = vsel %vm787_vm5, %v777_v31, %v433_v30  ;;  %v135_v31 = vld [vmem:[%s6624_s1 + $0x1f8] sm:$0x1] }
  0xfe   :  { %v811_v33 = vsel %vm6634_vm6, %v794_v32, %v545_v29  ;;  %v288_v29 = vsel %vm243_vm0, %v286_v20, %v287_v22  ;;  %v527_v37 = vrot.slane %v135_v31, 1 }
  0xff   :  { %v647_v49 = vpop.permute.xlu2 %646  ;;  %v828_v38 = vsel %vm821_vm7, %v811_v33, %v595_v13 }
 0x102   :  { %316 = vrot.lane.b32.xlu1 %v282_v27, %s3799_s23  ;;  %187 = vrot.lane.b32.xlu0 %v65_v26, %s3796_s12 }
 0x104   :  { %v701_v5 = vpop.permute.xlu1 %700  ;;  %v645_v39 = vpop.permute.xlu0 %644 }
 0x105   :  { %380 = vrot.lane.b32.xlu2 %v126_v34, %s3795_s11  ;;  %v845_v40 = vsel %vm6633_vm8, %v828_v38, %v645_v39  ;;  %v942_v32 = vpop.f32.mrf.mxu0  ;;  %v70_v39 = vld [vmem:[%s6625_s0 + $0xf8] sm:$0xff] }
 0x106   :  { %v862_v42 = vsel %vm6642_vm9, %v845_v40, %v701_v5 }
 0x107   :  { %v309_v41 = vpop.permute.xlu2 %308  ;;  %3699 = vmatmul.msk.f32.gmra.mxu0 %vm872_vm10, %v862_v42  ;;  %v4459_v42 = vld [vmem:[%s6624_s1 + $0x200] sm:$0xff] }
 0x10a   :  { %556 = vrot.lane.b32.xlu1 %v522_v43, %s3797_s17  ;;  %444 = vrot.lane.b32.xlu0 %v66_v44, %s3798_s22  ;;  %v137_v43 = vld [vmem:[%s6624_s1 + $0x208] sm:$0x1] }
 0x10c   :  { %v371_v53 = vpop.permute.xlu1 %370  ;;  %v307_v55 = vpop.permute.xlu0 %306 }
 0x10d   :  { %606 = vrot.lane.b32.xlu2 %v4373_v46, %s3800_s26  ;;  %v761_v60 = vsel %vm753_vm3, %v744_v54, %v307_v55  ;;  %v290_v54 = vrot.slane %v137_v43, 1 }
 0x10e   :  { %v778_v62 = vsel %vm6635_vm4, %v761_v60, %v371_v53  ;;  %v289_v53 = vrot.slane %v4459_v42, 1  ;;  %v4478_v60 = vperm.slane %v4014_v59, 5 }
 0x10f   :  { %v549_v56 = vpop.permute.xlu2 %548  ;;  %v795_v13 = vsel %vm787_vm5, %v778_v62, %v435_v24 }
 0x110   :  { %v291_v62 = vsel %vm243_vm0, %v289_v53, %v290_v54 }
 0x112   :  { %712 = vrot.lane.b32.xlu1 %v285_v57, %s3801_s29  ;;  %656 = vrot.lane.b32.xlu0 %v67_v58, %s3802_s30 }
 0x114   :  { %v597_v50 = vpop.permute.xlu1 %596  ;;  %v547_v61 = vpop.permute.xlu0 %546 }
 0x115   :  { %189 = vrot.lane.b32.xlu2 %v67_v58, %s3796_s12  ;;  %v812_v63 = vsel %vm6634_vm6, %v795_v13, %v547_v61 }
 0x116   :  { %v829_v36 = vsel %vm821_vm7, %v812_v63, %v597_v50 }
 0x117   :  { %v705_v0 = vpop.permute.xlu2 %704  ;;  %v846_v9 = vsel %vm6633_vm8, %v829_v36, %v647_v49 }
 0x11a   :  { %382 = vrot.lane.b32.xlu1 %v130_v1, %s3795_s11  ;;  %318 = vrot.lane.b32.xlu0 %v285_v57, %s3799_s23  ;;  %v71_v57 = vld [vmem:[%s6625_s0 + $0x100] sm:$0xff] }
 0x11b   :  { %v945_v44 = vpop.f32.mrf.mxu0 }
 0x11c   :  { %v180_v7 = vpop.permute.xlu1 %179  ;;  %v703_v8 = vpop.permute.xlu0 %702  ;;  %v992_v55 = vmul.f32 %v4465_v47, %v945_v44 }
 0x11d   :  { %446 = vrot.lane.b32.xlu2 %v68_v3, %s3798_s22  ;;  %v863_v10 = vsel %vm6642_vm9, %v846_v9, %v703_v8  ;;  %v745_v19 = vsel %vm6636_vm2, %v4163_v25, %v180_v7  ;;  %v134_v25 = vld [vmem:[%s6624_s1 + $0x1f0] sm:$0xff] }
 0x11e   :  { %3700 = vmatmul.msk.f32.gmra.mxu0 %vm872_vm10, %v863_v10  ;;  %v762_v23 = vsel %vm753_vm3, %v745_v19, %v309_v41  ;;  %v526_v35 = vrot.slane %v134_v25, 1  ;;  %v1009_v50 = vadd.f32 %v4478_v60, %v992_v55  ;;  %v138_v8 = vld [vmem:[%s6624_s1 + $0x210] sm:$0xff]  ;;  %v530_v10 = vrot.slane %v139_v4, 1 }
 0x11f   :  { %v4407_v11 = vpop.permute.xlu2 %374  ;;  %v529_v9 = vrot.slane %v138_v8, 1 }
 0x120   :  { %v528_v41 = vsel %vm243_vm0, %v526_v35, %v527_v37  ;;  %v4490_v1 = vmax.f32 %v1009_v50, 0.0 }
 0x122   :  { %608 = vrot.lane.b32.xlu1 %v4412_v12, %s3800_s26  ;;  %558 = vrot.lane.b32.xlu0 %v525_v14, %s3797_s17  ;;  %v1223_v31 = vperm.slane %v4490_v1, 1  ;;  %v1061_v35 = vrot.slane %v4490_v1, 6 }
 0x124   :  { %v437_v24 = vpop.permute.xlu1 %436  ;;  %v373_v26 = vpop.permute.xlu0 %372 }
 0x125   :  { %658 = vrot.lane.b32.xlu2 %v69_v17, %s3802_s30  ;;  %v779_v27 = vsel %vm6635_vm4, %v762_v23, %v373_v26 }
 0x126   :  { %v796_v30 = vsel %vm787_vm5, %v779_v27, %v437_v24  ;;  %v1060_v24 = vrot.slane %v4490_v1, 4  ;;  %v531_v27 = vsel %vm243_vm0, %v529_v9, %v530_v10 }
 0x127   :  { %v4430_v28 = vpop.permute.xlu2 %600  ;;  %v813_v18 = vsel %vm6634_vm6, %v796_v30, %v549_v56 }
 0x12a   :  { %191 = vrot.lane.b32.xlu1 %v69_v17, %s3796_s12  ;;  %714 = vrot.lane.b32.xlu0 %v288_v29, %s3801_s29 }
 0x12c   :  { %v649_v49 = vpop.permute.xlu1 %648  ;;  %v599_v33 = vpop.permute.xlu0 %598 }
 0x12d   :  { %320 = vrot.lane.b32.xlu2 %v288_v29, %s3799_s23  ;;  %v830_v34 = vsel %vm821_vm7, %v813_v18, %v599_v33  ;;  %v948_v63 = vpop.f32.mrf.mxu0  ;;  %v72_v29 = vld [vmem:[%s6625_s0 + $0x108] sm:$0xff] }
 0x12e   :  { %v847_v38 = vsel %vm6633_vm8, %v830_v34, %v649_v49  ;;  %v993_v3 = vmul.f32 %v4465_v47, %v948_v63  ;;  %v1225_v49 = vperm.slane %v1060_v24, 1 }
 0x12f   :  { %v4445_v5 = vpop.permute.xlu2 %183  ;;  %v864_v40 = vsel %vm6642_vm9, %v847_v38, %v705_v0 }
 0x130   :  { %3701 = vmatmul.msk.f32.gmra.mxu0 %vm872_vm10, %v864_v40  ;;  %v1010_v14 = vadd.f32 %v4478_v60, %v993_v3  ;;  %v747_v40 = vsel %vm6636_vm2, %v4247_v21, %v4445_v5  ;;  %v73_v21 = vld [vmem:[%s6625_s0 + $0x110] sm:$0xff]  ;;  %v3803_v5 = vmov 0.0   ;;  %s3804_s0 = smov 40  }
 0x132   :  { %448 = vrot.lane.b32.xlu1 %v70_v39, %s3798_s22  ;;  %384 = vrot.lane.b32.xlu0 %v134_v25, %s3795_s11  ;;  %v4522_v30 = vmax.f32 %v1010_v14, 0.0  ;;  %v141_v25 = vld [vmem:[%s6624_s1 + $0x228] sm:$0x1] }
 0x133   :  { %v686_v34 = vrot.slane %v141_v25, 1  ;;  %v1111_v25 = vperm.slane %v1061_v35, 0 }
 0x134   :  { %v311_v45 = vpop.permute.xlu1 %310  ;;  %v182_v51 = vpop.permute.xlu0 %181  ;;  %v1062_v39 = vrot.slane %v4522_v30, 2 }
 0x135   :  { %560 = vrot.lane.b32.xlu2 %v528_v41, %s3797_s17  ;;  %v746_v58 = vsel %vm6636_vm2, %v4201_v52, %v182_v51  ;;  %v991_v52 = vmul.f32 %v4465_v47, %v942_v32  ;;  %v140_v32 = vld [vmem:[%s6624_s1 + $0x220] sm:$0xff] }
 0x136   :  { %v763_v61 = vsel %vm753_vm3, %v746_v58, %v311_v45  ;;  %v685_v33 = vrot.slane %v140_v32, 1  ;;  %v1226_v58 = vperm.slane %v1061_v35, 1  ;;  %v1228_v63 = vperm.slane %v1062_v39, 1 }
 0x137   :  { %v4470_v56 = vpop.permute.xlu2 %440  ;;  %v780_v59 = vsel %vm6635_vm4, %v763_v61, %v4407_v11  ;;  %v1008_v6 = vadd.f32 %v4478_v60, %v991_v52  ;;  %v1059_v11 = vrot.slane %v4490_v1, 2 }
 0x138   :  { %v687_v55 = vsel %vm243_vm0, %v685_v33, %v686_v34 }
 0x139   :  { %v4511_v20 = vmax.f32 %v1008_v6, 0.0  ;;  %v1109_v44 = vperm.slane %v1059_v11, 0  ;;  %v1227_v6 = vperm.slane %v4522_v30, 1 }
 0x13a   :  { %660 = vrot.lane.b32.xlu1 %v71_v57, %s3802_s30  ;;  %610 = vrot.lane.b32.xlu0 %v4459_v42, %s3800_s26 }
 0x13b   :  { %v1056_v18 = vrot.slane %v4511_v20, 2  ;;  %v1057_v51 = vrot.slane %v4511_v20, 4 }
 0x13c   :  { %v551_v13 = vpop.permute.xlu1 %550  ;;  %v439_v0 = vpop.permute.xlu0 %438 }
 0x13d   :  { %716 = vrot.lane.b32.xlu2 %v291_v62, %s3801_s29  ;;  %v797_v2 = vsel %vm787_vm5, %v780_v59, %v439_v0  ;;  %v1220_v53 = vperm.slane %v1056_v18, 1  ;;  %v1108_v0 = vperm.slane %v4490_v1, 0  ;;  %v1058_v59 = vrot.slane %v4511_v20, 6 }
 0x13e   :  { %v814_v7 = vsel %vm6634_vm6, %v797_v2, %v551_v13  ;;  %v1219_v13 = vperm.slane %v4511_v20, 1  ;;  %v1110_v2 = vperm.slane %v1060_v24, 0  ;;  %v1221_v3 = vperm.slane %v1057_v51, 1 }
 0x13f   :  { %v4493_v36 = vpop.permute.xlu2 %652  ;;  %v831_v17 = vsel %vm821_vm7, %v814_v7, %v4430_v28  ;;  %v1224_v28 = vperm.slane %v1059_v11, 1  ;;  %v1174_v9 = vsel %vm1168_vm11, %v1109_v44, %v1108_v0  ;;  %v1222_v34 = vperm.slane %v1058_v59, 1 }
 0x140   :  { %v1283_v4 = vsel %vm1168_vm11, %v1220_v53, %v1219_v13 }
 0x141   :  { %v1286_v37 = vsel %vm1168_vm11, %v1224_v28, %v1223_v31  ;;  %v1284_v31 = vsel %vm1170_vm12, %v1221_v3, %v1283_v4  ;;  %v1112_v3 = vperm.slane %v4522_v30, 0  ;;  %v1107_v4 = vperm.slane %v1058_v59, 0 }
 0x142   :  { %322 = vrot.lane.b32.xlu1 %v291_v62, %s3799_s23  ;;  %193 = vrot.lane.b32.xlu0 %v71_v57, %s3796_s12  ;;  %v1287_v45 = vsel %vm1170_vm12, %v1225_v49, %v1286_v37  ;;  %v4552_v57 = vrot.slane %v3803_v5, 7  ;;  %v1063_v62 = vrot.slane %v4522_v30, 4  ;;  %v1285_v35 = vsel %vm1172_vm13, %v1222_v34, %v1284_v31 }
 0x143   :  { %v1288_v52 = vsel %vm1172_vm13, %v1226_v58, %v1287_v45  ;;  %v1104_v45 = vperm.slane %v4511_v20, 0 }
 0x144   :  { %v707_v16 = vpop.permute.xlu1 %706  ;;  %v651_v19 = vpop.permute.xlu0 %650  ;;  %v1229_v10 = vperm.slane %v1063_v62, 1 }
 0x145   :  { %386 = vrot.lane.b32.xlu2 %v138_v8, %s3795_s11  ;;  %v848_v22 = vsel %vm6633_vm8, %v831_v17, %v651_v19  ;;  %v951_v41 = vpop.f32.mrf.mxu0  ;;  %v4570_v8 = vsel %vm1366_vm14, 0.0, %v4552_v57  ;;  %v1064_v17 = vrot.slane %v4522_v30, 6  ;;  %v1289_v19 = vsel %vm1168_vm11, %v1228_v63, %v1227_v6 }
 0x146   :  { %v865_v23 = vsel %vm6642_vm9, %v848_v22, %v707_v16  ;;  %v994_v50 = vmul.f32 %v4465_v47, %v951_v41  ;;  %v1334_v16 = vrot.slane %v1288_v52, 7  ;;  %v1105_v41 = vperm.slane %v1056_v18, 0 }
 0x147   :  { %v4515_v26 = vpop.permute.xlu2 %314  ;;  %3702 = vmatmul.msk.f32.gmra.mxu0 %vm872_vm10, %v865_v23  ;;  %v1422_v23 = vrot.slane %v4570_v8, 1  ;;  %v1113_v63 = vperm.slane %v1062_v39, 0  ;;  %v1114_v6 = vperm.slane %v1063_v62, 0 }
 0x148   :  { %v1011_v11 = vadd.f32 %v4478_v60, %v994_v50  ;;  %v4591_v33 = vsel %vm1366_vm14, 0.0, %v1334_v16  ;;  %v1106_v50 = vperm.slane %v1057_v51, 0 }
 0x14a   :  { %562 = vrot.lane.b32.xlu1 %v531_v27, %s3797_s17  ;;  %450 = vrot.lane.b32.xlu0 %v72_v29, %s3798_s22  ;;  %v1175_v27 = vsel %vm1170_vm12, %v1110_v2, %v1174_v9  ;;  %v4588_v49 = vmax.f32 %v1011_v11, 0.0  ;;  %v1177_v9 = vsel %vm1168_vm11, %v1113_v63, %v1112_v3 }
 0x14b   :  { %v4596_v37 = vsel %vm1172_vm13, %v1111_v25, %v1175_v27 }
 0x14c   :  { %v377_v38 = vpop.permute.xlu1 %376  ;;  %v313_v43 = vpop.permute.xlu0 %312  ;;  %v1065_v53 = vrot.slane %v4588_v49, 2  ;;  %v1066_v0 = vrot.slane %v4588_v49, 4  ;;  %v1231_v39 = vperm.slane %v4588_v49, 1  ;;  %v1067_v16 = vrot.slane %v4588_v49, 6 }
 0x14d   :  { %612 = vrot.lane.b32.xlu2 %v140_v32, %s3800_s26  ;;  %v764_v61 = vsel %vm753_vm3, %v747_v40, %v313_v43  ;;  %v1290_v32 = vsel %vm1170_vm12, %v1229_v10, %v1289_v19  ;;  %v1423_v43 = vrot.slane %v4591_v33, 1 }
 0x14e   :  { %v781_v7 = vsel %vm6635_vm4, %v764_v61, %v377_v38  ;;  %v1169_v61 = vsel %vm1168_vm11, %v1105_v41, %v1104_v45  ;;  %v1232_v52 = vperm.slane %v1065_v53, 1  ;;  %v1233_v10 = vperm.slane %v1066_v0, 1 }
 0x14f   :  { %v4546_v54 = vpop.permute.xlu2 %554  ;;  %v798_v24 = vsel %vm787_vm5, %v781_v7, %v4470_v56  ;;  %v1230_v56 = vperm.slane %v1064_v17, 1  ;;  %v1171_v51 = vsel %vm1170_vm12, %v1106_v50, %v1169_v61  ;;  %v1234_v34 = vperm.slane %v1067_v16, 1 }
 0x150   :  { %v1292_v19 = vsel %vm1168_vm11, %v1232_v52, %v1231_v39 }
 0x151   :  { %v1291_v40 = vsel %vm1172_vm13, %v1230_v56, %v1290_v32  ;;  %v1293_v25 = vsel %vm1170_vm12, %v1233_v10, %v1292_v19 }
 0x152   :  { %718 = vrot.lane.b32.xlu1 %v687_v55, %s3801_s29  ;;  %662 = vrot.lane.b32.xlu0 %v73_v21, %s3802_s30  ;;  %v1335_v58 = vrot.slane %v1291_v40, 7 }
 0x154   :  { %v603_v14 = vpop.permute.xlu1 %602  ;;  %v553_v22 = vpop.permute.xlu0 %552 }
 0x155   :  { %1394 = vrot.lane.b32.xlu2 %v3803_v5, %s3799_s23  ;;  %v815_v29 = vsel %vm6634_vm6, %v798_v24, %v553_v22  ;;  %v1333_v5 = vrot.slane %v1285_v35, 7  ;;  %v1178_v24 = vsel %vm1170_vm12, %v1114_v6, %v1177_v9 }
 0x156   :  { %v832_v38 = vsel %vm821_vm7, %v815_v29, %v603_v14  ;;  %v1173_v14 = vsel %vm1172_vm13, %v1107_v4, %v1171_v51  ;;  %v1115_v29 = vperm.slane %v1064_v17, 0 }
 0x157   :  { %v4584_v28 = vpop.permute.xlu2 %710  ;;  %v849_v21 = vsel %vm6633_vm8, %v832_v38, %v4493_v36  ;;  %v1368_v2 = vsel %vm1366_vm14, 0.0, %v1333_v5  ;;  %v1370_v36 = vsel %vm1366_vm14, 0.0, %v1335_v58 }
 0x158   :  { %v1506_v32 = vrot.slane %v1368_v2, 1  ;;  %v1179_v56 = vsel %vm1172_vm13, %v1115_v29, %v1178_v24  ;;  %v1507_v35 = vrot.slane %v1370_v36, 1 }
 0x15a   :  { %1429 = vrot.lane.b32.xlu1 %v1422_v23, %s3798_s22  ;;  %1396 = vrot.lane.b32.xlu0 %v4596_v37, %s3799_s23 }
 0x15b   :  { %v954_v22 = vpop.f32.mrf.mxu0 }
 0x15c   :  { %v186_v44 = vpop.permute.xlu1 %185  ;;  %v709_v55 = vpop.permute.xlu0 %708  ;;  %v995_v31 = vmul.f32 %v4465_v47, %v954_v22 }
 0x15d   :  { %1431 = vrot.lane.b32.xlu2 %v1423_v43, %s3798_s22  ;;  %v866_v18 = vsel %vm6642_vm9, %v849_v21, %v709_v55  ;;  %v748_v7 = vsel %vm6636_vm2, %v4284_v48, %v186_v44 }
 0x15e   :  { %3703 = vmatmul.msk.f32.gmra.mxu0 %vm872_vm10, %v866_v18  ;;  %v765_v62 = vsel %vm753_vm3, %v748_v7, %v4515_v26  ;;  %v1294_v26 = vsel %vm1172_vm13, %v1234_v34, %v1293_v25  ;;  %v1012_v17 = vadd.f32 %v4478_v60, %v995_v31  ;;  %v1117_v18 = vperm.slane %v1065_v53, 0 }
 0x15f   :  { %v4619_v13 = vpop.permute.xlu2 %380  ;;  %v1336_v55 = vrot.slane %v1294_v26, 7  ;;  %v1118_v53 = vperm.slane %v1066_v0, 0  ;;  %v1119_v7 = vperm.slane %v1067_v16, 0 }
 0x160   :  { %v4664_v61 = vmax.f32 %v1012_v17, 0.0 }
 0x161   :  { %v4671_v52 = vsel %vm1366_vm14, 0.0, %v1336_v55 }
 0x162   :  { %1458 = vrot.lane.b32.xlu0 %v1368_v2, %s3800_s26  ;;  %1460 = vrot.lane.b32.xlu1 %v1370_v36, %s3800_s26  ;;  %v1116_v2 = vperm.slane %v4588_v49, 0  ;;  %v1068_v6 = vrot.slane %v4664_v61, 2  ;;  %v1069_v10 = vrot.slane %v4664_v61, 4  ;;  %v1424_v29 = vrot.slane %v4671_v52, 1 }
 0x164   :  { %v443_v11 = vpop.permute.xlu1 %442  ;;  %v379_v59 = vpop.permute.xlu0 %378  ;;  %v1180_v51 = vsel %vm1168_vm11, %v1117_v18, %v1116_v2  ;;  %v1236_v24 = vperm.slane %v1068_v6, 1 }
 0x165   :  { %1482 = vrot.lane.b32.xlu2 %v1173_v14, %s3801_s29  ;;  %v782_v48 = vsel %vm6635_vm4, %v765_v62, %v379_v59  ;;  %v1181_v9 = vsel %vm1170_vm12, %v1118_v53, %v1180_v51 }
 0x166   :  { %v799_v38 = vsel %vm787_vm5, %v782_v48, %v443_v11 }
 0x167   :  { %v4644_v27 = vpop.permute.xlu2 %606  ;;  %v816_v41 = vsel %vm6634_vm6, %v799_v38, %v4546_v54 }
 0x16a   :  { %1514 = vrot.lane.b32.xlu1 %v1506_v32, %s3804_s0  ;;  %1484 = vrot.lane.b32.xlu0 %v1179_v56, %s3801_s29  ;;  %v1237_v56 = vperm.slane %v1069_v10, 1 }
 0x16c   :  { %v655_v40 = vpop.permute.xlu1 %654  ;;  %v605_v44 = vpop.permute.xlu0 %604 }
 0x16d   :  { %1516 = vrot.lane.b32.xlu2 %v1507_v35, %s3804_s0  ;;  %v957_v45 = vpop.f32.mrf.mxu0  ;;  %v833_v21 = vsel %vm821_vm7, %v816_v41, %v605_v44  ;;  %v1070_v35 = vrot.slane %v4664_v61, 6 }
 0x16e   :  { %v996_v5 = vmul.f32 %v4465_v47, %v957_v45  ;;  %v850_v50 = vsel %vm6633_vm8, %v833_v21, %v655_v40 }
 0x16f   :  { %v4661_v58 = vpop.permute.xlu2 %189  ;;  %v867_v54 = vsel %vm6642_vm9, %v850_v50, %v4584_v28  ;;  %v1238_v50 = vperm.slane %v1070_v35, 1 }
 0x170   :  { %v1013_v63 = vadd.f32 %v4478_v60, %v996_v5  ;;  %3704 = vmatmul.msk.f32.gmra.mxu0 %vm872_vm10, %v867_v54 }
 0x172   :  { %v4674_v36 = vmax.f32 %v1013_v63, 0.0  ;;  %1540 = vrot.lane.b32.xlu0 %v4591_v33, %s3805_s15  ;;  %1542 = vrot.lane.b32.xlu1 %v4671_v52, %s3805_s15 }
 0x174   :  { %v317_v28 = vpop.permute.xlu1 %316  ;;  %v1071_v3 = vrot.slane %v4674_v36, 2  ;;  %v1072_v4 = vrot.slane %v4674_v36, 4  ;;  %v188_v39 = vpop.permute.xlu0 %187  ;;  %v1239_v22 = vperm.slane %v4674_v36, 1  ;;  %v1073_v62 = vrot.slane %v4674_v36, 6 }
 0x175   :  { %1564 = vrot.lane.b32.xlu2 %v4596_v37, %s3806_s16  ;;  %v749_v59 = vsel %vm6636_vm2, %v4327_v15, %v188_v39  ;;  %v1182_v37 = vsel %vm1172_vm13, %v1119_v7, %v1181_v9  ;;  %v1124_v16 = vperm.slane %v4674_v36, 0  ;;  %v1235_v15 = vperm.slane %v4664_v61, 1 }
 0x176   :  { %v1125_v11 = vperm.slane %v1071_v3, 0  ;;  %v1240_v14 = vperm.slane %v1071_v3, 1  ;;  %v1241_v19 = vperm.slane %v1072_v4, 1  ;;  %v1126_v25 = vperm.slane %v1072_v4, 0 }
 0x177   :  { %v4688_v0 = vpop.permute.xlu2 %446  ;;  %v766_v31 = vsel %vm753_vm3, %v749_v59, %v317_v28  ;;  %v1242_v26 = vperm.slane %v1073_v62, 1  ;;  %v1127_v21 = vperm.slane %v1073_v62, 0  ;;  %v1120_v59 = vperm.slane %v4664_v61, 0 }
 0x178   :  { %v1298_v48 = vsel %vm1168_vm11, %v1240_v14, %v1239_v22  ;;  %v1186_v32 = vsel %vm1168_vm11, %v1125_v11, %v1124_v16  ;;  %v783_v40 = vsel %vm6635_vm4, %v766_v31, %v4619_v13  ;;  %v1121_v14 = vperm.slane %v1068_v6, 0 }
 0x179   :  { %v1299_v34 = vsel %vm1170_vm12, %v1241_v19, %v1298_v48  ;;  %v1187_v41 = vsel %vm1170_vm12, %v1126_v25, %v1186_v32  ;;  %v750_v25 = vsel %vm6636_vm2, %v4373_v46, %v4661_v58 }
 0x17a   :  { %1590 = vrot.lane.b32.xlu1 %v1423_v43, %s3807_s2  ;;  %1566 = vrot.lane.b32.xlu0 %v1182_v37, %s3806_s16  ;;  %v1295_v43 = vsel %vm1168_vm11, %v1236_v24, %v1235_v15  ;;  %v1300_v44 = vsel %vm1172_vm13, %v1242_v26, %v1299_v34  ;;  %v4718_v18 = vsel %vm1172_vm13, %v1127_v21, %v1187_v41  ;;  %v1122_v24 = vperm.slane %v1069_v10, 0 }
 0x17b   :  { %v1296_v5 = vsel %vm1170_vm12, %v1237_v56, %v1295_v43  ;;  %v1338_v63 = vrot.slane %v1300_v44, 7  ;;  %v1183_v6 = vsel %vm1168_vm11, %v1121_v14, %v1120_v59 }
 0x17c   :  { %v557_v38 = vpop.permute.xlu1 %556  ;;  %v445_v17 = vpop.permute.xlu0 %444  ;;  %v1297_v13 = vsel %vm1172_vm13, %v1238_v50, %v1296_v5  ;;  %v1184_v31 = vsel %vm1170_vm12, %v1122_v24, %v1183_v6 }
 0x17d   :  { %1592 = vrot.lane.b32.xlu2 %v1424_v29, %s3807_s2  ;;  %v800_v45 = vsel %vm787_vm5, %v783_v40, %v445_v17  ;;  %v4729_v3 = vsel %vm1366_vm14, 0.0, %v1338_v63  ;;  %v1337_v4 = vrot.slane %v1297_v13, 7 }
 0x17e   :  { %v817_v54 = vsel %vm6634_vm6, %v800_v45, %v557_v38  ;;  %v1123_v38 = vperm.slane %v1070_v35, 0 }
 0x17f   :  { %v4714_v55 = vpop.permute.xlu2 %658  ;;  %v834_v51 = vsel %vm821_vm7, %v817_v54, %v4644_v27  ;;  %v1425_v27 = vrot.slane %v4729_v3, 1  ;;  %v1372_v22 = vsel %vm1366_vm14, 0.0, %v1337_v4 }
 0x180   :  { %v1185_v46 = vsel %vm1172_vm13, %v1123_v38, %v1184_v31 }
 0x182   :  { %1398 = vrot.lane.b32.xlu0 %v1182_v37, %s3799_s23  ;;  %1400 = vrot.lane.b32.xlu1 %v4718_v18, %s3799_s23 }
 0x184   :  { %v713_v2 = vpop.permute.xlu1 %712  ;;  %v960_v53 = vpop.f32.mrf.mxu0 }
 0x185   :  { %v657_v28 = vpop.permute.xlu0 %656  ;;  %1433 = vrot.lane.b32.xlu2 %v1424_v29, %s3798_s22  ;;  %v997_v39 = vmul.f32 %v4465_v47, %v960_v53 }
 0x186   :  { %v851_v7 = vsel %vm6633_vm8, %v834_v51, %v657_v28 }
 0x187   :  { %v4733_v9 = vpop.permute.xlu2 %320  ;;  %v868_v11 = vsel %vm6642_vm9, %v851_v7, %v713_v2  ;;  %v1014_v19 = vadd.f32 %v4478_v60, %v997_v39 }
 0x188   :  { %3705 = vmatmul.msk.f32.gmra.mxu0 %vm872_vm10, %v868_v11 }
 0x189   :  { %v4741_v62 = vmax.f32 %v1014_v19, 0.0  ;;  %v1508_v19 = vrot.slane %v1372_v22, 1 }
 0x18a   :  { %1435 = vrot.lane.b32.xlu0 %v1425_v27, %s3798_s22  ;;  %1462 = vrot.lane.b32.xlu1 %v1372_v22, %s3800_s26 }
 0x18b   :  { %v1074_v16 = vrot.slane %v4741_v62, 2  ;;  %v1075_v48 = vrot.slane %v4741_v62, 4  ;;  %v1076_v29 = vrot.slane %v4741_v62, 6  ;;  %v1128_v32 = vperm.slane %v4741_v62, 0 }
 0x18c   :  { %v383_v37 = vpop.permute.xlu1 %382  ;;  %v1243_v26 = vperm.slane %v4741_v62, 1 }
 0x18d   :  { %v319_v15 = vpop.permute.xlu0 %318  ;;  %v1129_v34 = vperm.slane %v1074_v16, 0  ;;  %v1130_v10 = vperm.slane %v1075_v48, 0  ;;  %v1244_v43 = vperm.slane %v1074_v16, 1  ;;  %v1245_v17 = vperm.slane %v1075_v48, 1 }
 0x18e   :  { %v767_v40 = vsel %vm753_vm3, %v750_v25, %v319_v15  ;;  %v1131_v41 = vperm.slane %v1076_v29, 0  ;;  %v1246_v45 = vperm.slane %v1076_v29, 1 }
 0x18f   :  { %v4756_v56 = vpop.permute.xlu2 %560  ;;  %v1189_v44 = vsel %vm1168_vm11, %v1129_v34, %v1128_v32  ;;  %v1301_v21 = vsel %vm1168_vm11, %v1244_v43, %v1243_v26  ;;  %v784_v50 = vsel %vm6635_vm4, %v767_v40, %v383_v37 }
 0x190   :  { %v1190_v58 = vsel %vm1170_vm12, %v1130_v10, %v1189_v44  ;;  %v1302_v5 = vsel %vm1170_vm12, %v1245_v17, %v1301_v21  ;;  %v801_v53 = vsel %vm787_vm5, %v784_v50, %v4688_v0 }
 0x191   :  { %v1191_v35 = vsel %vm1172_vm13, %v1131_v41, %v1190_v58  ;;  %v1303_v63 = vsel %vm1172_vm13, %v1246_v45, %v1302_v5 }
 0x192   :  { %1486 = vrot.lane.b32.xlu0 %v1185_v46, %s3801_s29  ;;  %1488 = vrot.lane.b32.xlu1 %v1191_v35, %s3801_s29  ;;  %v1339_v13 = vrot.slane %v1303_v63, 7 }
 0x194   :  { %v609_v54 = vpop.permute.xlu1 %608  ;;  %v1374_v51 = vsel %vm1366_vm14, 0.0, %v1339_v13 }
 0x195   :  { %v559_v2 = vpop.permute.xlu0 %558  ;;  %1464 = vrot.lane.b32.xlu2 %v1374_v51, %s3800_s26  ;;  %v1509_v4 = vrot.slane %v1374_v51, 1 }
 0x196   :  { %v818_v28 = vsel %vm6634_vm6, %v801_v53, %v559_v2 }
 0x197   :  { %v717_v39 = vpop.permute.xlu2 %716  ;;  %v835_v7 = vsel %vm821_vm7, %v818_v28, %v609_v54 }
 0x198   :  { %v852_v24 = vsel %vm6633_vm8, %v835_v7, %v4714_v55 }
 0x19a   :  { %1520 = vrot.lane.b32.xlu0 %v1509_v4, %s3804_s0  ;;  %1544 = vrot.lane.b32.xlu1 %v4729_v3, %s3805_s15 }
 0x19b   :  { %v963_v11 = vpop.f32.mrf.mxu0 }
 0x19c   :  { %v192_v14 = vpop.permute.xlu1 %191  ;;  %v998_v0 = vmul.f32 %v4465_v47, %v963_v11 }
 0x19d   :  { %v715_v59 = vpop.permute.xlu0 %714  ;;  %1518 = vrot.lane.b32.xlu2 %v1508_v19, %s3804_s0  ;;  %v751_v22 = vsel %vm6636_vm2, %v4412_v12, %v192_v14 }
 0x19e   :  { %v869_v6 = vsel %vm6642_vm9, %v852_v24, %v715_v59  ;;  %v1015_v37 = vadd.f32 %v4478_v60, %v998_v0 }
 0x19f   :  { %3706 = vmatmul.msk.f32.gmra.mxu0 %vm872_vm10, %v869_v6  ;;  %v387_v48 = vpop.permute.xlu2 %386 }
 0x1a0   :  { %v4786_v16 = vmax.f32 %v1015_v37, 0.0 }
 0x1a2   :  { %1568 = vrot.lane.b32.xlu0 %v4718_v18, %s3806_s16  ;;  %v1077_v29 = vrot.slane %v4786_v16, 2  ;;  %v1078_v55 = vrot.slane %v4786_v16, 4  ;;  %v1079_v25 = vrot.slane %v4786_v16, 6  ;;  %v1132_v31 = vperm.slane %v4786_v16, 0 }
 0x1a3   :  { %v1247_v38 = vperm.slane %v4786_v16, 1  ;;  %v768_v18 = vsel %vm753_vm3, %v751_v22, %v4733_v9 }
 0x1a4   :  { %v449_v15 = vpop.permute.xlu1 %448  ;;  %v1133_v34 = vperm.slane %v1077_v29, 0  ;;  %v1134_v10 = vperm.slane %v1078_v55, 0  ;;  %v1248_v26 = vperm.slane %v1077_v29, 1  ;;  %v1135_v12 = vperm.slane %v1079_v25, 0 }
 0x1a5   :  { %v385_v32 = vpop.permute.xlu0 %384  ;;  %v1249_v43 = vperm.slane %v1078_v55, 1  ;;  %v1250_v41 = vperm.slane %v1079_v25, 1 }
 0x1a6   :  { %v785_v17 = vsel %vm6635_vm4, %v768_v18, %v385_v32  ;;  %v1192_v40 = vsel %vm1168_vm11, %v1133_v34, %v1132_v31  ;;  %v1304_v44 = vsel %vm1168_vm11, %v1248_v26, %v1247_v38 }
 0x1a7   :  { %v1193_v46 = vsel %vm1170_vm12, %v1134_v10, %v1192_v40  ;;  %v1305_v58 = vsel %vm1170_vm12, %v1249_v43, %v1304_v44  ;;  %v802_v35 = vsel %vm787_vm5, %v785_v17, %v449_v15  ;;  %v613_v63 = vpop.permute.xlu2 %612 }
 0x1a8   :  { %v1194_v45 = vsel %vm1172_vm13, %v1135_v12, %v1193_v46  ;;  %v1306_v21 = vsel %vm1172_vm13, %v1250_v41, %v1305_v58  ;;  %v819_v13 = vsel %vm6634_vm6, %v802_v35, %v4756_v56  ;;  %v1392_v46 = vld [vmem:[%s6627_s3 + $0x40] sm:$0xff]  ;;  %v1391_v58 = vld [vmem:[%s6627_s3 + $0x38] sm:$0xff] }
 0x1a9   :  { %1570 = vrot.lane.b32.xlu1 %v1194_v45, %s3806_s16  ;;  %v1340_v9 = vrot.slane %v1306_v21, 7  ;;  %1723 = vmatpush.msra.mxu1 %v1392_v46 }
 0x1ab   :  { %v1375_v50 = vsel %vm1366_vm14, 0.0, %v1340_v9  ;;  %1724 = vmatpush.msra.mxu1 %v1391_v58  ;;  %v1390_v9 = vld [vmem:[%s6627_s3 + $0x30] sm:$0xff] }
 0x1ac   :  { %v661_v5 = vpop.permute.xlu1 %660  ;;  %1546 = vrot.lane.b32.xlu2 %v1375_v50, %s3805_s15  ;;  %v1588_v54 = vrot.slane %v1375_v50, 1 }
 0x1ad   :  { %v611_v2 = vpop.permute.xlu0 %610  ;;  %v966_v51 = vpop.f32.mrf.mxu0  ;;  %1725 = vmatpush.msra.mxu1 %v1390_v9 }
 0x1ae   :  { %v836_v53 = vsel %vm821_vm7, %v819_v13, %v611_v2  ;;  %v999_v28 = vmul.f32 %v4465_v47, %v966_v51  ;;  %1596 = vrot.lane.b32.xlu0 %v1588_v54, %s3807_s2 }
 0x1af   :  { %v853_v4 = vsel %vm6633_vm8, %v836_v53, %v661_v5  ;;  %v4827_v6 = vpop.permute.xlu2 %1394  ;;  %v1389_v5 = vld [vmem:[%s6627_s3 + $0x28] sm:$0xff] }
 0x1b0   :  { %v870_v7 = vsel %vm6642_vm9, %v853_v4, %v717_v39  ;;  %v1016_v11 = vadd.f32 %v4478_v60, %v999_v28  ;;  %1726 = vmatpush.msra.mxu1 %v1389_v5  ;;  %v1614_v5 = vsel %vm753_vm3, %v4570_v8, %v4827_v6 }
 0x1b1   :  { %3707 = vmatmul.msk.f32.gmra.mxu0 %vm872_vm10, %v870_v7 }
 0x1b2   :  { %v4819_v14 = vmax.f32 %v1016_v11, 0.0 }
 0x1b4   :  { %v323_v19 = vpop.permute.xlu1 %322  ;;  %1594 = vrot.lane.b32.xlu2 %v1425_v27, %s3807_s2  ;;  %v1080_v0 = vrot.slane %v4819_v14, 2  ;;  %v1081_v59 = vrot.slane %v4819_v14, 4  ;;  %v1082_v24 = vrot.slane %v4819_v14, 6  ;;  %v1251_v39 = vperm.slane %v4819_v14, 1 }
 0x1b5   :  { %v194_v56 = vpop.permute.xlu0 %193 }
 0x1b6   :  { %v1252_v37 = vperm.slane %v1080_v0, 1  ;;  %v1253_v22 = vperm.slane %v1081_v59, 1  ;;  %v752_v27 = vsel %vm6636_vm2, %v4459_v42, %v194_v56  ;;  %v1254_v29 = vperm.slane %v1082_v24, 1 }
 0x1b7   :  { %v769_v15 = vsel %vm753_vm3, %v752_v27, %v323_v19  ;;  %v4849_v18 = vpop.permute.xlu2 %1431  ;;  %vm1810_vm2 = vcmask 1044480  }
 0x1b8   :  { %v1307_v55 = vsel %vm1168_vm11, %v1252_v37, %v1251_v39  ;;  %v786_v38 = vsel %vm6635_vm4, %v769_v15, %v387_v48  ;;  %vm6637_vm4 = vcmask 588800  }
 0x1b9   :  { %v1308_v25 = vsel %vm1170_vm12, %v1253_v22, %v1307_v55 }
 0x1ba   :  { %v1309_v31 = vsel %vm1172_vm13, %v1254_v29, %v1308_v25  ;;  %v1388_v29 = vld [vmem:[%s6627_s3 + $0x20] sm:$0xff] }
 0x1bb   :  { %v1341_v34 = vrot.slane %v1309_v31, 7  ;;  %1727 = vmatpush.msra.mxu1 %v1388_v29  ;;  %v1387_v31 = vld [vmem:[%s6627_s3 + $0x18] sm:$0xff] }
 0x1bc   :  { %v563_v32 = vpop.permute.xlu1 %562 }
 0x1bd   :  { %v451_v10 = vpop.permute.xlu0 %450  ;;  %v4844_v26 = vsel %vm1366_vm14, 0.0, %v1341_v34  ;;  %1728 = vmatpush.msra.mxu1 %v1387_v31 }
 0x1be   :  { %v803_v42 = vsel %vm787_vm5, %v786_v38, %v451_v10  ;;  %1466 = vrot.lane.b32.xlu0 %v4844_v26, %s3800_s26 }
 0x1bf   :  { %v820_v12 = vsel %vm6634_vm6, %v803_v42, %v563_v32  ;;  %v4872_v50 = vpop.permute.xlu2 %1482  ;;  %v1386_v32 = vld [vmem:[%s6627_s3 + $0x10] sm:$0xff]  ;;  %vm1671_vm6 = vcmask 523264  }
 0x1c0   :  { %v837_v40 = vsel %vm821_vm7, %v820_v12, %v613_v63  ;;  %v1385_v12 = vld [vmem:[%s6627_s3 + $0x8] sm:$0xff]  ;;  %1729 = vmatpush.msra.mxu1 %v1386_v32 }
 0x1c2   :  { %1730 = vmatpush.msra.mxu1 %v1385_v12 }
 0x1c4   :  { %v719_v43 = vpop.permute.xlu1 %718  ;;  %v969_v17 = vpop.f32.mrf.mxu0 }
 0x1c5   :  { %v663_v41 = vpop.permute.xlu0 %662  ;;  %v1000_v44 = vmul.f32 %v4465_v47, %v969_v17  ;;  %v1137_v17 = vperm.slane %v1080_v0, 0 }
 0x1c6   :  { %v854_v48 = vsel %vm6633_vm8, %v837_v40, %v663_v41  ;;  %v1384_v41 = vld [vmem:[%s6627_s3] sm:$0xff]  ;;  %vm6638_vm8 = vcmask 457728  }
 0x1c7   :  { %v871_v45 = vsel %vm6642_vm9, %v854_v48, %v719_v43  ;;  %v1017_v21 = vadd.f32 %v4478_v60, %v1000_v44  ;;  %v1517_v38 = vpop.permute.xlu2 %1516  ;;  %v1136_v44 = vperm.slane %v4819_v14, 0  ;;  %v1138_v48 = vperm.slane %v1081_v59, 0  ;;  %1731 = vmatpush.msra.mxu1 %v1384_v41 }
 0x1c8   :  { %3708 = vmatmul.msk.f32.gmra.mxu0 %vm872_vm10, %v871_v45  ;;  %vm1653_vm10 = vcmask 392192  }
 0x1c9   :  { %v4864_v35 = vmax.f32 %v1017_v21, 0.0  ;;  %v1195_v46 = vsel %vm1168_vm11, %v1137_v17, %v1136_v44 }
 0x1ca   :  { %v1196_v9 = vsel %vm1170_vm12, %v1138_v48, %v1195_v46 }
 0x1cb   :  { %v1083_v54 = vrot.slane %v4864_v35, 2  ;;  %v1084_v13 = vrot.slane %v4864_v35, 4  ;;  %v1085_v2 = vrot.slane %v4864_v35, 6  ;;  %v1140_v51 = vperm.slane %v4864_v35, 0 }
 0x1cc   :  { %v1430_v63 = vpop.permute.xlu1 %1429  ;;  %v1255_v19 = vperm.slane %v4864_v35, 1 }
 0x1cd   :  { %v1397_v53 = vpop.permute.xlu0 %1396  ;;  %v1141_v28 = vperm.slane %v1083_v54, 0  ;;  %v1142_v4 = vperm.slane %v1084_v13, 0  ;;  %v1256_v7 = vperm.slane %v1083_v54, 1  ;;  %v1257_v11 = vperm.slane %v1084_v13, 1 }
 0x1ce   :  { %v1143_v56 = vperm.slane %v1085_v2, 0  ;;  %v1258_v22 = vperm.slane %v1085_v2, 1  ;;  %v1139_v54 = vperm.slane %v1082_v24, 0 }
 0x1cf   :  { %v1198_v39 = vsel %vm1168_vm11, %v1141_v28, %v1140_v51  ;;  %v1310_v27 = vsel %vm1168_vm11, %v1256_v7, %v1255_v19  ;;  %v1565_v13 = vpop.permute.xlu2 %1564  ;;  %v4927_v51 = vsel %vm787_vm5, %v1614_v5, %v1430_v63 }
 0x1d0   :  { %v1199_v37 = vsel %vm1170_vm12, %v1142_v4, %v1198_v39  ;;  %v1311_v25 = vsel %vm1170_vm12, %v1257_v11, %v1310_v27  ;;  %v1197_v2 = vsel %vm1172_vm13, %v1139_v54, %v1196_v9  ;;  %v1615_v4 = vsel %vm753_vm3, %v4591_v33, %v1397_v53 }
 0x1d1   :  { %v4886_v55 = vsel %vm1172_vm13, %v1143_v56, %v1199_v37  ;;  %v1312_v15 = vsel %vm1172_vm13, %v1258_v22, %v1311_v25  ;;  %v1622_v33 = vsel %vm787_vm5, %v1615_v4, %v4849_v18 }
 0x1d2   :  { %1402 = vrot.lane.b32.xlu1 %v4886_v55, %s3799_s23  ;;  %v1342_v10 = vrot.slane %v1312_v15, 7 }
 0x1d4   :  { %v1461_v34 = vpop.permute.xlu1 %1460  ;;  %v4902_v43 = vsel %vm1366_vm14, 0.0, %v1342_v10 }
 0x1d5   :  { %v1459_v42 = vpop.permute.xlu0 %1458  ;;  %v1426_v40 = vrot.slane %v4902_v43, 1  ;;  %v1629_v29 = vsel %vm821_vm7, %v1622_v33, %v1461_v34 }
 0x1d6   :  { %v1628_v11 = vsel %vm821_vm7, %v4927_v51, %v1459_v42 }
 0x1d7   :  { %1437 = vrot.lane.b32.xlu2 %v1426_v40, %s3798_s22  ;;  %v1636_v25 = vsel %vm6642_vm9, %v1628_v11, %v4872_v50  ;;  %v1593_v18 = vpop.permute.xlu2 %1592 }
 0x1db   :  { %v972_v0 = vpop.f32.mrf.mxu0 }
 0x1dc   :  { %v1515_v58 = vpop.permute.xlu1 %1514  ;;  %v1001_v45 = vmul.f32 %v4465_v47, %v972_v0 }
 0x1dd   :  { %v1485_v21 = vpop.permute.xlu0 %1484  ;;  %v1645_v32 = vsel %vm6639_vm15, %v1636_v25, %v1515_v58 }
 0x1de   :  { %v1018_v59 = vadd.f32 %v4478_v60, %v1001_v45  ;;  %v1637_v17 = vsel %vm6642_vm9, %v1629_v29, %v1485_v21 }
 0x1df   :  { %1490 = vrot.lane.b32.xlu2 %v1197_v2, %s3801_s29  ;;  %v1646_v46 = vsel %vm6639_vm15, %v1637_v17, %v1517_v38 }
 0x1e0   :  { %v4929_v28 = vmax.f32 %v1018_v59, 0.0 }
 0x1e2   :  { %v1086_v6 = vrot.slane %v4929_v28, 2  ;;  %v1087_v7 = vrot.slane %v4929_v28, 4  ;;  %v1088_v24 = vrot.slane %v4929_v28, 6  ;;  %v1144_v56 = vperm.slane %v4929_v28, 0 }
 0x1e3   :  { %v1259_v53 = vperm.slane %v4929_v28, 1 }
 0x1e4   :  { %v1543_v63 = vpop.permute.xlu1 %1542  ;;  %v1145_v39 = vperm.slane %v1086_v6, 0  ;;  %v1146_v37 = vperm.slane %v1087_v7, 0  ;;  %v1260_v22 = vperm.slane %v1086_v6, 1  ;;  %v1261_v27 = vperm.slane %v1087_v7, 1  ;;  %v1434_v6 = vpop.permute.xlu2 %1433 }
 0x1e5   :  { %v1541_v19 = vpop.permute.xlu0 %1540  ;;  %v1147_v15 = vperm.slane %v1088_v24, 0  ;;  %v1262_v42 = vperm.slane %v1088_v24, 1  ;;  %v1655_v45 = vsel %vm1653_vm10, %v1646_v46, %v1543_v63  ;;  %v1510_v24 = vrot.slane %v4844_v26, 1 }
 0x1e6   :  { %v1201_v31 = vsel %vm1168_vm11, %v1145_v39, %v1144_v56  ;;  %v1313_v12 = vsel %vm1168_vm11, %v1260_v22, %v1259_v53  ;;  %v1654_v41 = vsel %vm1653_vm10, %v1645_v32, %v1541_v19 }
 0x1e7   :  { %v1202_v10 = vsel %vm1170_vm12, %v1146_v37, %v1201_v31  ;;  %v1314_v44 = vsel %vm1170_vm12, %v1261_v27, %v1313_v12  ;;  %v1663_v58 = vsel %vm6638_vm8, %v1654_v41, %v1565_v13 }
 0x1e8   :  { %v1203_v34 = vsel %vm1172_vm13, %v1147_v15, %v1202_v10  ;;  %v1315_v50 = vsel %vm1172_vm13, %v1262_v42, %v1314_v44 }
 0x1e9   :  { %1492 = vrot.lane.b32.xlu0 %v1203_v34, %s3801_s29  ;;  %v1343_v48 = vrot.slane %v1315_v50, 7 }
 0x1eb   :  { %v1378_v9 = vsel %vm1366_vm14, 0.0, %v1343_v48 }
 0x1ec   :  { %v1591_v0 = vpop.permute.xlu1 %1590  ;;  %1468 = vrot.lane.b32.xlu1 %v1378_v9, %s3800_s26  ;;  %v1511_v54 = vrot.slane %v1378_v9, 1 }
 0x1ed   :  { %v1672_v21 = vsel %vm1671_vm6, %v1663_v58, %v1591_v0  ;;  %v1567_v5 = vpop.permute.xlu0 %1566  ;;  %v975_v2 = vpop.f32.mrf.mxu0 }
 0x1ee   :  { %1688 = vst [vmem:[#allocation1] ss:$2 sm:$0xff] %v1672_v21  ;;  %v1664_v59 = vsel %vm6638_vm8, %v1655_v45, %v1567_v5  ;;  %v1002_v38 = vmul.f32 %v4465_v47, %v975_v2  ;;  %1524 = vrot.lane.b32.xlu2 %v1511_v54, %s3804_s0 }
 0x1ef   :  { %v1673_v4 = vsel %vm1671_vm6, %v1664_v59, %v1593_v18  ;;  %v1465_v42 = vpop.permute.xlu2 %1464 }
 0x1f0   :  { %1690 = vst [vmem:[#allocation1 + $0x1] ss:$2 sm:$0xff] %v1673_v4  ;;  %v1019_v13 = vadd.f32 %v4478_v60, %v1002_v38 }
 0x1f1   :  { %1548 = vrot.lane.b32.xlu0 %v4902_v43, %s3805_s15 }
 0x1f2   :  { %v4969_v7 = vmax.f32 %v1019_v13, 0.0 }
 0x1f4   :  { %v1401_v11 = vpop.permute.xlu1 %1400  ;;  %v1089_v19 = vrot.slane %v4969_v7, 2  ;;  %v1090_v56 = vrot.slane %v4969_v7, 4  ;;  %v1091_v39 = vrot.slane %v4969_v7, 6  ;;  %1522 = vrot.lane.b32.xlu1 %v1510_v24, %s3804_s0  ;;  %v1148_v33 = vperm.slane %v4969_v7, 0 }
 0x1f5   :  { %v1399_v63 = vpop.permute.xlu0 %1398  ;;  %v1263_v26 = vperm.slane %v4969_v7, 1 }
 0x1f6   :  { %v1149_v53 = vperm.slane %v1089_v19, 0  ;;  %v1150_v22 = vperm.slane %v1090_v56, 0  ;;  %1572 = vrot.lane.b32.xlu2 %v4886_v55, %s3806_s16  ;;  %v1264_v27 = vperm.slane %v1089_v19, 1  ;;  %v1265_v29 = vperm.slane %v1090_v56, 1 }
 0x1f7   :  { %v1703_v37 = vld.sshfl [vmem:[#allocation1] sm:$0xff pattern:$0x75316420]  ;;  %v1151_v25 = vperm.slane %v1091_v39, 0  ;;  %v1266_v32 = vperm.slane %v1091_v39, 1  ;;  %v1519_v48 = vpop.permute.xlu2 %1518  ;;  %v1616_v45 = vsel %vm753_vm3, %v4671_v52, %v1399_v63  ;;  %v1617_v52 = vsel %vm753_vm3, %v4729_v3, %v1401_v11 }
 0x1f8   :  { %3709 = vmatmul.msk.f32.vlgmr.msra.gmra.mxu1 %vm6637_vm4, %v1703_v37  ;;  %v1204_v15 = vsel %vm1168_vm11, %v1149_v53, %v1148_v33  ;;  %v1316_v10 = vsel %vm1168_vm11, %v1264_v27, %v1263_v26  ;;  %v1623_v54 = vsel %vm787_vm5, %v1616_v45, %v1434_v6 }
 0x1f9   :  { %v1205_v31 = vsel %vm1170_vm12, %v1150_v22, %v1204_v15  ;;  %v1317_v18 = vsel %vm1170_vm12, %v1265_v29, %v1316_v10 }
 0x1fa   :  { %v1206_v12 = vsel %vm1172_vm13, %v1151_v25, %v1205_v31  ;;  %v1318_v55 = vsel %vm1172_vm13, %v1266_v32, %v1317_v18 }
 0x1fb   :  { %1574 = vrot.lane.b32.xlu0 %v1206_v12, %s3806_s16  ;;  %v1344_v41 = vrot.slane %v1318_v55, 7 }
 0x1fc   :  { %v1463_v34 = vpop.permute.xlu1 %1462 }
 0x1fd   :  { %v1436_v17 = vpop.permute.xlu0 %1435  ;;  %v4989_v44 = vsel %vm1366_vm14, 0.0, %v1344_v41  ;;  %v1630_v59 = vsel %vm821_vm7, %v1623_v54, %v1463_v34 }
 0x1fe   :  { %1550 = vrot.lane.b32.xlu1 %v4989_v44, %s3805_s15  ;;  %v1427_v50 = vrot.slane %v4989_v44, 1  ;;  %v1624_v56 = vsel %vm787_vm5, %v1617_v52, %v1436_v17 }
 0x1ff   :  { %v1631_v37 = vsel %vm821_vm7, %v1624_v56, %v1465_v42 }
 0x200   :  { %1600 = vrot.lane.b32.xlu2 %v1427_v50, %s3807_s2 }
 0x203   :  { %1404 = vrot.lane.b32.xlu0 %v1206_v12, %s3799_s23 }
 0x204   :  { %v1489_v0 = vpop.permute.xlu1 %1488 }
 0x205   :  { %v1487_v46 = vpop.permute.xlu0 %1486  ;;  %v978_v58 = vpop.f32.mrf.mxu0  ;;  %v1639_v53 = vsel %vm6642_vm9, %v1631_v37, %v1489_v0 }
 0x206   :  { %1598 = vrot.lane.b32.xlu1 %v1426_v40, %s3807_s2  ;;  %v1547_v21 = vpop.permute.xlu2 %1546  ;;  %v1003_v5 = vmul.f32 %v4465_v47, %v978_v58  ;;  %v1638_v2 = vsel %vm6642_vm9, %v1630_v59, %v1487_v46 }
 0x207   :  { %v1647_v38 = vsel %vm6639_vm15, %v1638_v2, %v1519_v48 }
 0x208   :  { %1439 = vrot.lane.b32.xlu2 %v1427_v50, %s3798_s22  ;;  %v1020_v4 = vadd.f32 %v4478_v60, %v1003_v5 }
 0x20a   :  { %v5011_v63 = vmax.f32 %v1020_v4, 0.0 }
 0x20c   :  { %v1545_v40 = vpop.permute.xlu1 %1544  ;;  %v1092_v33 = vrot.slane %v5011_v63, 2  ;;  %v1093_v27 = vrot.slane %v5011_v63, 4  ;;  %v1267_v42 = vperm.slane %v5011_v63, 1  ;;  %v1094_v48 = vrot.slane %v5011_v63, 6 }
 0x20d   :  { %v1521_v9 = vpop.permute.xlu0 %1520  ;;  %v1656_v13 = vsel %vm1653_vm10, %v1647_v38, %v1545_v40 }
 0x20e   :  { %v1595_v19 = vpop.permute.xlu2 %1594  ;;  %v1648_v26 = vsel %vm6639_vm15, %v1639_v53, %v1521_v9  ;;  %v1268_v25 = vperm.slane %v1092_v33, 1  ;;  %v1269_v18 = vperm.slane %v1093_v27, 1  ;;  %v1270_v38 = vperm.slane %v1094_v48, 1 }
 0x20f   :  { %v1657_v15 = vsel %vm1653_vm10, %v1648_v26, %v1547_v21  ;;  %v1152_v26 = vperm.slane %v5011_v63, 0 }
 0x210   :  { %v1319_v34 = vsel %vm1168_vm11, %v1268_v25, %v1267_v42 }
 0x211   :  { %v1320_v9 = vsel %vm1170_vm12, %v1269_v18, %v1319_v34 }
 0x215   :  { %v1569_v24 = vpop.permute.xlu0 %1568 }
 0x216   :  { %v1665_v6 = vsel %vm6638_vm8, %v1656_v13, %v1569_v24 }
 0x217   :  { %v1674_v39 = vsel %vm1671_vm6, %v1665_v6, %v1595_v19  ;;  %v1321_v6 = vsel %vm1172_vm13, %v1270_v38, %v1320_v9 }
 0x218   :  { %1692 = vst [vmem:[#allocation1 + $0x10] ss:$2 sm:$0xff] %v1674_v39  ;;  %v1153_v39 = vperm.slane %v1092_v33, 0  ;;  %v1345_v53 = vrot.slane %v1321_v6, 7 }
 0x21b   :  { %v1571_v11 = vpop.permute.xlu1 %1570 }
 0x21c   :  { %v981_v22 = vpop.f32.mrf.mxu0  ;;  %v1666_v31 = vsel %vm6638_vm8, %v1657_v15, %v1571_v11  ;;  %v1154_v11 = vperm.slane %v1093_v27, 0  ;;  %v1380_v15 = vsel %vm1366_vm14, 0.0, %v1345_v53 }
 0x21d   :  { %v1004_v3 = vmul.f32 %v4465_v47, %v981_v22 }
 0x21f   :  { %v1021_v29 = vadd.f32 %v4478_v60, %v1004_v3 }
 0x220   :  { %v1597_v10 = vpop.permute.xlu0 %1596 }
 0x221   :  { %v5025_v32 = vmax.f32 %v1021_v29, 0.0  ;;  %v1675_v12 = vsel %vm1671_vm6, %v1666_v31, %v1597_v10  ;;  %v1207_v29 = vsel %vm1168_vm11, %v1153_v39, %v1152_v26  ;;  %v1155_v10 = vperm.slane %v1094_v48, 0 }
 0x222   :  { %1694 = vst [vmem:[#allocation1 + $0x11] ss:$2 sm:$0xff] %v1675_v12  ;;  %v1208_v31 = vsel %vm1170_vm12, %v1154_v11, %v1207_v29 }
 0x223   :  { %v1095_v55 = vrot.slane %v5025_v32, 2  ;;  %v1096_v17 = vrot.slane %v5025_v32, 4  ;;  %v1097_v41 = vrot.slane %v5025_v32, 6  ;;  %v1156_v50 = vperm.slane %v5025_v32, 0 }
 0x224   :  { %v1271_v45 = vperm.slane %v5025_v32, 1  ;;  %v1209_v27 = vsel %vm1172_vm13, %v1155_v10, %v1208_v31 }
 0x225   :  { %v1157_v46 = vperm.slane %v1095_v55, 0  ;;  %v1158_v0 = vperm.slane %v1096_v17, 0  ;;  %v1272_v58 = vperm.slane %v1095_v55, 1  ;;  %v1273_v21 = vperm.slane %v1096_v17, 1 }
 0x226   :  { %v1159_v5 = vperm.slane %v1097_v41, 0  ;;  %v1274_v59 = vperm.slane %v1097_v41, 1 }
 0x227   :  { %v1210_v54 = vsel %vm1168_vm11, %v1157_v46, %v1156_v50  ;;  %v1322_v2 = vsel %vm1168_vm11, %v1272_v58, %v1271_v45 }
 0x228   :  { %v1211_v4 = vsel %vm1170_vm12, %v1158_v0, %v1210_v54  ;;  %v1323_v40 = vsel %vm1170_vm12, %v1273_v21, %v1322_v2 }
 0x229   :  { %v1212_v13 = vsel %vm1172_vm13, %v1159_v5, %v1211_v4  ;;  %v1324_v24 = vsel %vm1172_vm13, %v1274_v59, %v1323_v40  ;;  %v1704_v52 = vld.sshfl [vmem:[#allocation1 + $0x10] sm:$0xff pattern:$0x75316420]  ;;  %v1512_v40 = vrot.slane %v1380_v15, 1 }
 0x22a   :  { %1406 = vrot.lane.b32.xlu1 %v1212_v13, %s3799_s23  ;;  %v1346_v19 = vrot.slane %v1324_v24, 7  ;;  %3710 = vmatmul.msk.f32.gmra.mxu1 %vm6637_vm4, %v1704_v52 }
 0x22c   :  { %v5047_v56 = vsel %vm1366_vm14, 0.0, %v1346_v19 }
 0x22d   :  { %v1428_v37 = vrot.slane %v5047_v56, 1 }
 0x22e   :  { %v984_v22 = vpop.f32.mrf.mxu0 }
 0x22f   :  { %v1005_v3 = vmul.f32 %v4465_v47, %v984_v22  ;;  %1441 = vrot.lane.b32.xlu0 %v1428_v37, %s3798_s22 }
 0x231   :  { %v1022_v25 = vadd.f32 %v4478_v60, %v1005_v3 }
 0x232   :  { %1470 = vrot.lane.b32.xlu1 %v1380_v15, %s3800_s26 }
 0x233   :  { %v5059_v33 = vmax.f32 %v1022_v25, 0.0  ;;  %v1438_v25 = vpop.permute.xlu2 %1437 }
 0x235   :  { %v1098_v42 = vrot.slane %v5059_v33, 2  ;;  %v1099_v12 = vrot.slane %v5059_v33, 4  ;;  %v1100_v18 = vrot.slane %v5059_v33, 6  ;;  %v1160_v55 = vperm.slane %v5059_v33, 0 }
 0x236   :  { %v1275_v34 = vperm.slane %v5059_v33, 1 }
 0x237   :  { %1494 = vrot.lane.b32.xlu0 %v1209_v27, %s3801_s29  ;;  %v1161_v17 = vperm.slane %v1098_v42, 0  ;;  %v1162_v41 = vperm.slane %v1099_v12, 0  ;;  %v1276_v50 = vperm.slane %v1098_v42, 1  ;;  %v1277_v46 = vperm.slane %v1099_v12, 1 }
 0x238   :  { %v1163_v0 = vperm.slane %v1100_v18, 0  ;;  %v1278_v58 = vperm.slane %v1100_v18, 1 }
 0x239   :  { %v1213_v48 = vsel %vm1168_vm11, %v1161_v17, %v1160_v55  ;;  %v1325_v45 = vsel %vm1168_vm11, %v1276_v50, %v1275_v34  ;;  %v5101_v55 = vsel %vm1810_vm2, %v4570_v8, 0.0 }
 0x23a   :  { %v1214_v21 = vsel %vm1170_vm12, %v1162_v41, %v1213_v48  ;;  %v1326_v9 = vsel %vm1170_vm12, %v1277_v46, %v1325_v45  ;;  %v1827_v34 = vrot.slane %v5101_v55, 1  ;;  %v1467_v46 = vpop.permute.xlu0 %1466  ;;  %v1855_v48 = vrot.slane %v5101_v55, 2 }
 0x23b   :  { %v1215_v5 = vsel %vm1172_vm13, %v1163_v0, %v1214_v21  ;;  %v1327_v54 = vsel %vm1172_vm13, %v1278_v58, %v1326_v9  ;;  %v1491_v0 = vpop.permute.xlu2 %1490 }
 0x23c   :  { %1496 = vrot.lane.b32.xlu1 %v1215_v5, %s3801_s29  ;;  %v1347_v59 = vrot.slane %v1327_v54, 7 }
 0x23e   :  { %v1382_v2 = vsel %vm1366_vm14, 0.0, %v1347_v59 }
 0x23f   :  { %1472 = vrot.lane.b32.xlu2 %v1382_v2, %s3800_s26  ;;  %v1513_v4 = vrot.slane %v1382_v2, 1 }
 0x241   :  { %1528 = vrot.lane.b32.xlu0 %v1513_v4, %s3804_s0 }
 0x244   :  { %1552 = vrot.lane.b32.xlu1 %v5047_v56, %s3805_s15  ;;  %v1403_v50 = vpop.permute.xlu1 %1402 }
 0x245   :  { %v987_v38 = vpop.f32.mrf.mxu0  ;;  %v1618_v9 = vsel %vm753_vm3, %v4902_v43, %v1403_v50 }
 0x246   :  { %v1006_v24 = vmul.f32 %v4465_v47, %v987_v38  ;;  %v1632_v38 = vsel %vm821_vm7, %v4927_v51, %v1467_v46 }
 0x247   :  { %1526 = vrot.lane.b32.xlu2 %v1512_v40, %s3804_s0  ;;  %v1393_v40 = vld [vmem:[%s6627_s3 + $0x48] sm:$0x3]  ;;  %s3810_s3 = smov 80  }
 0x248   :  { %v1023_v52 = vadd.f32 %v4478_v60, %v1006_v24  ;;  %v1525_v21 = vpop.permute.xlu2 %1524  ;;  %v5129_v43 = vperm.slane %v1393_v40, 0 }
 0x249   :  { %1576 = vrot.lane.b32.xlu0 %v1212_v13, %s3806_s16 }
 0x24a   :  { %v5085_v19 = vmax.f32 %v1023_v52, 0.0 }
 0x24c   :  { %v1101_v6 = vrot.slane %v5085_v19, 2  ;;  %v1102_v39 = vrot.slane %v5085_v19, 4  ;;  %v1103_v53 = vrot.slane %v5085_v19, 6  ;;  %v1164_v22 = vperm.slane %v5085_v19, 0 }
 0x24d   :  { %v1279_v47 = vperm.slane %v5085_v19, 1 }
 0x24e   :  { %v1165_v26 = vperm.slane %v1101_v6, 0  ;;  %v1166_v3 = vperm.slane %v1102_v39, 0  ;;  %v1280_v11 = vperm.slane %v1101_v6, 1  ;;  %v1281_v29 = vperm.slane %v1102_v39, 1 }
 0x24f   :  { %v1167_v60 = vperm.slane %v1103_v53, 0  ;;  %v1282_v15 = vperm.slane %v1103_v53, 1  ;;  %v1640_v6 = vsel %vm6642_vm9, %v1632_v38, %v1491_v0 }
 0x250   :  { %v1216_v13 = vsel %vm1168_vm11, %v1165_v26, %v1164_v22  ;;  %v1328_v31 = vsel %vm1168_vm11, %v1280_v11, %v1279_v47  ;;  %v1573_v59 = vpop.permute.xlu2 %1572  ;;  %v5135_v47 = vperm.slane %v1393_v40, 1 }
 0x251   :  { %v1217_v10 = vsel %vm1170_vm12, %v1166_v3, %v1216_v13  ;;  %v1329_v42 = vsel %vm1170_vm12, %v1281_v29, %v1328_v31 }
 0x252   :  { %v1218_v12 = vsel %vm1172_vm13, %v1167_v60, %v1217_v10  ;;  %v1330_v18 = vsel %vm1172_vm13, %v1282_v15, %v1329_v42 }
 0x253   :  { %1578 = vrot.lane.b32.xlu1 %v1218_v12, %s3806_s16  ;;  %v1348_v27 = vrot.slane %v1330_v18, 7 }
 0x255   :  { %v1383_v17 = vsel %vm1366_vm14, 0.0, %v1348_v27 }
 0x256   :  { %1554 = vrot.lane.b32.xlu2 %v1383_v17, %s3805_s15  ;;  %v1589_v41 = vrot.slane %v1383_v17, 1 }
 0x258   :  { %1604 = vrot.lane.b32.xlu0 %v1589_v41, %s3807_s2 }
 0x25a   :  { %v1601_v22 = vpop.permute.xlu2 %1600 }
 0x25b   :  { %1834 = vrot.lane.b32.xlu1 %v1827_v34, %s3798_s22  ;;  %v1493_v45 = vpop.permute.xlu0 %1492 }
 0x25e   :  { %1602 = vrot.lane.b32.xlu2 %v1428_v37, %s3807_s2  ;;  %v1469_v58 = vpop.permute.xlu1 %1468  ;;  %v1625_v37 = vsel %vm787_vm5, %v1618_v9, %v1438_v25 }
 0x25f   :  { %v1633_v2 = vsel %vm821_vm7, %v1625_v37, %v1469_v58 }
 0x260   :  { %1862 = vrot.lane.b32.xlu0 %v1855_v48, %s3801_s29  ;;  %v1641_v4 = vsel %vm6642_vm9, %v1633_v2, %v1493_v45 }
 0x261   :  { %v1650_v52 = vsel %vm6639_vm15, %v1641_v4, %v1525_v21 }
 0x262   :  { %v1440_v45 = vpop.permute.xlu2 %1439 }
 0x263   :  { %1988 = vrot.lane.b32.xlu1 %v1827_v34, %s3808_s25  ;;  %v1549_v54 = vpop.permute.xlu0 %1548 }
 0x266   :  { %1967 = vrot.lane.b32.xlu2 %v5101_v55, %s3809_s27  ;;  %v1523_v5 = vpop.permute.xlu1 %1522 }
 0x267   :  { %v1649_v26 = vsel %vm6639_vm15, %v1640_v6, %v1523_v5 }
 0x268   :  { %v1658_v25 = vsel %vm1653_vm10, %v1649_v26, %v1549_v54 }
 0x269   :  { %v1667_v31 = vsel %vm6638_vm8, %v1658_v25, %v1573_v59 }
 0x26d   :  { %v1575_v39 = vpop.permute.xlu0 %1574 }
 0x270   :  { %v1551_v24 = vpop.permute.xlu1 %1550 }
 0x271   :  { %v1659_v53 = vsel %vm1653_vm10, %v1650_v52, %v1551_v24 }
 0x272   :  { %v1668_v3 = vsel %vm6638_vm8, %v1659_v53, %v1575_v39 }
 0x273   :  { %v1677_v11 = vsel %vm1671_vm6, %v1668_v3, %v1601_v22 }
 0x274   :  { %1698 = vst [vmem:[#allocation1 + $0x21] ss:$2 sm:$0xff] %v1677_v11 }
 0x275   :  { %v1733_v51 = vpop.f32.mrf.mxu1  ;;  %v1405_v21 = vpop.permute.xlu0 %1404 }
 0x276   :  { %v1746_v29 = vmul.f32 %v5129_v43, %v1733_v51  ;;  %v1619_v26 = vsel %vm753_vm3, %v4989_v44, %v1405_v21 }
 0x277   :  { %v1626_v25 = vsel %vm787_vm5, %v1619_v26, %v1440_v45  ;;  %v1780_v26 = vld [vmem:[%s6628_s4 + $0x68] sm:$0xff] }
 0x278   :  { %v1751_v60 = vadd.f32 %v5135_v47, %v1746_v29  ;;  %v1599_v15 = vpop.permute.xlu1 %1598 }
 0x279   :  { %v1676_v10 = vsel %vm1671_vm6, %v1667_v31, %v1599_v15 }
 0x27a   :  { %v1755_v13 = vmax.f32 %v1751_v60, 0.0  ;;  %1696 = vst [vmem:[#allocation1 + $0x20] ss:$2 sm:$0xff] %v1676_v10 }
 0x27c   :  { %v1786_v42 = vrot.slane %v1755_v13, 7  ;;  %v3713_v12 = vrot.slane %v1755_v13, 11 }
 0x27e   :  { %v1803_v18 = vsel %vm1366_vm14, 0.0, %v3713_v12  ;;  %v1802_v27 = vsel %vm1366_vm14, 0.0, %v1786_v42 }
 0x27f   :  { %v5146_v17 = vsel %vm1810_vm2, %v1803_v18, 0.0  ;;  %v5149_v41 = vsel %vm1810_vm2, %v1802_v27, 0.0 }
 0x280   :  { %1887 = vrot.lane.b32.xlu0 %v5146_v17, %s3805_s15  ;;  %1885 = vrot.lane.b32.xlu2 %v5149_v41, %s3805_s15  ;;  %v1856_v34 = vrot.slane %v5149_v41, 2  ;;  %v1828_v46 = vrot.slane %v5149_v41, 1  ;;  %v1829_v0 = vrot.slane %v5146_v17, 1  ;;  %v5167_v58 = vrot.slane %v5146_v17, 2 }
 0x281   :  { %v1705_v50 = vld.sshfl [vmem:[#allocation1 + $0x20] sm:$0xff pattern:$0x75316420] }
 0x282   :  { %1864 = vrot.lane.b32.xlu1 %v1856_v34, %s3801_s29  ;;  %3711 = vmatmul.msk.f32.gmra.mxu1 %vm6637_vm4, %v1705_v50 }
 0x288   :  { %1961 = vrot.lane.b32.xlu2 %v5146_v17, %s3809_s27  ;;  %1937 = vrot.lane.b32.xlu0 %v1856_v34, %s3810_s3 }
 0x28a   :  { %1911 = vrot.lane.b32.xlu1 %v1828_v46, %s3807_s2 }
 0x290   :  { %1838 = vrot.lane.b32.xlu0 %v1829_v0, %s3798_s22  ;;  %1836 = vrot.lane.b32.xlu2 %v1828_v46, %s3798_s22 }
 0x292   :  { %1939 = vrot.lane.b32.xlu1 %v5167_v58, %s3810_s3 }
 0x298   :  { %1913 = vrot.lane.b32.xlu2 %v1829_v0, %s3807_s2 }
 0x299   :  { %v1473_v5 = vpop.permute.xlu2 %1472 }
 0x29a   :  { %1982 = vrot.lane.b32.xlu1 %v1829_v0, %s3808_s25 }
 0x29c   :  { %v1407_v9 = vpop.permute.xlu1 %1406 }
 0x29d   :  { %v1620_v50 = vsel %vm753_vm3, %v5047_v56, %v1407_v9 }
 0x2a0   :  { %1866 = vrot.lane.b32.xlu2 %v5167_v58, %s3801_s29 }
 0x2a1   :  { %v1442_v37 = vpop.permute.xlu0 %1441  ;;  %v1527_v4 = vpop.permute.xlu2 %1526 }
 0x2a2   :  { %v1627_v46 = vsel %vm787_vm5, %v1620_v50, %v1442_v37 }
 0x2a3   :  { %v1635_v0 = vsel %vm821_vm7, %v1627_v46, %v1473_v5 }
 0x2a4   :  { %v1471_v54 = vpop.permute.xlu1 %1470 }
 0x2a5   :  { %v1634_v44 = vsel %vm821_vm7, %v1626_v25, %v1471_v54  ;;  %v1778_v25 = vld [vmem:[%s6628_s4 + $0x58] sm:$0xff] }
 0x2a7   :  { %v1736_v59 = vpop.f32.mrf.mxu1 }
 0x2a8   :  { %v1747_v2 = vmul.f32 %v5129_v43, %v1736_v59 }
 0x2a9   :  { %v1495_v38 = vpop.permute.xlu0 %1494 }
 0x2aa   :  { %v1752_v40 = vadd.f32 %v5135_v47, %v1747_v2  ;;  %v1642_v60 = vsel %vm6642_vm9, %v1634_v44, %v1495_v38 }
 0x2ab   :  { %v1651_v31 = vsel %vm6639_vm15, %v1642_v60, %v1527_v4  ;;  %v1777_v60 = vld [vmem:[%s6628_s4 + $0x50] sm:$0xff] }
 0x2ac   :  { %v1756_v24 = vmax.f32 %v1752_v40, 0.0 }
 0x2ae   :  { %v1497_v52 = vpop.permute.xlu1 %1496  ;;  %v1788_v6 = vrot.slane %v1756_v24, 7  ;;  %v3714_v39 = vrot.slane %v1756_v24, 11 }
 0x2af   :  { %v1643_v45 = vsel %vm6642_vm9, %v1635_v0, %v1497_v52 }
 0x2b0   :  { %v1805_v53 = vsel %vm1366_vm14, 0.0, %v3714_v39  ;;  %v1804_v22 = vsel %vm1366_vm14, 0.0, %v1788_v6  ;;  %v1555_v3 = vpop.permute.xlu2 %1554  ;;  %v1782_v6 = vld [vmem:[%s6628_s4 + $0x78] sm:$0xff] }
 0x2b1   :  { %v5182_v11 = vsel %vm1810_vm2, %v1805_v53, 0.0  ;;  %v5185_v51 = vsel %vm1810_vm2, %v1804_v22, 0.0  ;;  %2118 = vmatpush.msrb.mxu1 %v1782_v6  ;;  %v1781_v53 = vld [vmem:[%s6628_s4 + $0x70] sm:$0xff]  ;;  %v1771_v6 = vld [vmem:[%s6628_s4 + $0x20] sm:$0xff] }
 0x2b2   :  { %1891 = vrot.lane.b32.xlu2 %v5182_v11, %s3805_s15  ;;  %1889 = vrot.lane.b32.xlu1 %v5185_v51, %s3805_s15  ;;  %v1830_v15 = vrot.slane %v5185_v51, 1  ;;  %v5199_v10 = vrot.slane %v5185_v51, 2  ;;  %v1909_v56 = vrot.slane %v5182_v11, 1  ;;  %v1935_v2 = vrot.slane %v5182_v11, 2 }
 0x2b3   :  { %v1529_v29 = vpop.permute.xlu0 %1528  ;;  %1963 = vrot.lane.b32.xlu0 %v5185_v51, %s3809_s27  ;;  %2119 = vmatpush.msrb.mxu1 %v1781_v53  ;;  %v1770_v53 = vld [vmem:[%s6628_s4 + $0x18] sm:$0xff] }
 0x2b4   :  { %v1652_v21 = vsel %vm6639_vm15, %v1643_v45, %v1529_v29  ;;  %v1773_v45 = vld [vmem:[%s6628_s4 + $0x30] sm:$0xff]  ;;  %vm2051_vm15 = vcmask 916480  }
 0x2b5   :  { %v1661_v59 = vsel %vm1653_vm10, %v1652_v21, %v1555_v3  ;;  %v1779_v3 = vld [vmem:[%s6628_s4 + $0x60] sm:$0xff]  ;;  %2120 = vmatpush.msrb.mxu1 %v1780_v26 }
 0x2b6   :  { %v1553_v13 = vpop.permute.xlu1 %1552 }
 0x2b7   :  { %v1660_v42 = vsel %vm1653_vm10, %v1651_v31, %v1553_v13  ;;  %2121 = vmatpush.msrb.mxu1 %v1779_v3  ;;  %v1775_v31 = vld [vmem:[%s6628_s4 + $0x40] sm:$0xff] }
 0x2b8   :  { %v1603_v18 = vpop.permute.xlu2 %1602 }
 0x2b9   :  { %2122 = vmatpush.msrb.mxu1 %v1778_v25  ;;  %v2068_v25 = vrot.slane %v5167_v58, 4  ;;  %v1768_v58 = vld [vmem:[%s6628_s4 + $0x8] sm:$0xff] }
 0x2ba   :  { %1965 = vrot.lane.b32.xlu1 %v5182_v11, %s3809_s27  ;;  %1984 = vrot.lane.b32.xlu2 %v1830_v15, %s3808_s25 }
 0x2bb   :  { %v1577_v12 = vpop.permute.xlu0 %1576  ;;  %1868 = vrot.lane.b32.xlu0 %v5199_v10, %s3801_s29  ;;  %2123 = vmatpush.msrb.mxu1 %v1777_v60 }
 0x2bc   :  { %v1669_v27 = vsel %vm6638_vm8, %v1660_v42, %v1577_v12  ;;  %v1774_v12 = vld [vmem:[%s6628_s4 + $0x38] sm:$0xff] }
 0x2bd   :  { %v1678_v34 = vsel %vm1671_vm6, %v1669_v27, %v1603_v18 }
 0x2be   :  { %1700 = vst [vmem:[#allocation1 + $0x30] ss:$2 sm:$0xff] %v1678_v34 }
 0x2c0   :  { %v5230_v38 = vpop.permute.xlu2 %1967 }
 0x2c2   :  { %1840 = vrot.lane.b32.xlu1 %v1830_v15, %s3798_s22  ;;  %1941 = vrot.lane.b32.xlu2 %v5199_v10, %s3810_s3 }
 0x2c3   :  { %1915 = vrot.lane.b32.xlu0 %v1830_v15, %s3807_s2  ;;  %v1776_v15 = vld [vmem:[%s6628_s4 + $0x48] sm:$0xff] }
 0x2c4   :  { %2124 = vmatpush.msrb.mxu1 %v1776_v15 }
 0x2c5   :  { %v1579_v54 = vpop.permute.xlu1 %1578 }
 0x2c6   :  { %v1670_v9 = vsel %vm6638_vm8, %v1661_v59, %v1579_v54  ;;  %2125 = vmatpush.msrb.mxu1 %v1775_v31  ;;  %vm6640_vm8 = vcmask 785408   ;;  %v1769_v31 = vld [vmem:[%s6628_s4 + $0x10] sm:$0xff] }
 0x2c8   :  { %2126 = vmatpush.msrb.mxu1 %v1774_v12 }
 0x2ca   :  { %v1605_v37 = vpop.permute.xlu0 %1604  ;;  %1917 = vrot.lane.b32.xlu1 %v1909_v56, %s3807_s2  ;;  %2127 = vmatpush.msrb.mxu1 %v1773_v45 }
 0x2cb   :  { %v1679_v4 = vsel %vm1671_vm6, %v1670_v9, %v1605_v37  ;;  %1943 = vrot.lane.b32.xlu0 %v1935_v2, %s3810_s3 }
 0x2cc   :  { %1702 = vst [vmem:[#allocation1 + $0x31] ss:$2 sm:$0xff] %v1679_v4  ;;  %v1772_v4 = vld [vmem:[%s6628_s4 + $0x28] sm:$0xff] }
 0x2cd   :  { %v1835_v40 = vpop.permute.xlu1 %1834  ;;  %2128 = vmatpush.msrb.mxu1 %v1772_v4 }
 0x2ce   :  { %v2003_v42 = vsel %vm787_vm5, %v5101_v55, %v1835_v40 }
 0x2cf   :  { %2129 = vmatpush.msrb.mxu1 %v1771_v6 }
 0x2d1   :  { %2130 = vmatpush.msrb.mxu1 %v1770_v53 }
 0x2d2   :  { %v1863_v22 = vpop.permute.xlu0 %1862 }
 0x2d3   :  { %v1706_v5 = vld.sshfl [vmem:[#allocation1 + $0x30] sm:$0xff pattern:$0x75316420]  ;;  %1986 = vrot.lane.b32.xlu0 %v1909_v56, %s3808_s25  ;;  %v5268_v34 = vsel %vm6642_vm9, %v2003_v42, %v1863_v22  ;;  %2131 = vmatpush.msrb.mxu1 %v1769_v31 }
 0x2d4   :  { %3712 = vmatmul.msk.f32.gmra.mxu1 %vm6637_vm4, %v1706_v5  ;;  %vm2033_vm4 = vcmask 654336  }
 0x2d5   :  { %v5232_v24 = vpop.permute.xlu1 %1988  ;;  %2132 = vmatpush.msrb.mxu1 %v1768_v58 }
 0x2da   :  { %v1886_v52 = vpop.permute.xlu2 %1885 }
 0x2db   :  { %v2017_v21 = vsel %vm1653_vm10, %v5268_v34, %v1886_v52 }
 0x2e2   :  { %v1962_v29 = vpop.permute.xlu2 %1961 }
 0x2ea   :  { %v1837_v18 = vpop.permute.xlu2 %1836 }
 0x2f2   :  { %v5254_v13 = vpop.permute.xlu0 %1887  ;;  %v1914_v22 = vpop.permute.xlu2 %1913 }
 0x2f4   :  { %v5237_v39 = vpop.permute.xlu1 %1864 }
 0x2fa   :  { %v1938_v56 = vpop.permute.xlu0 %1937  ;;  %v1867_v45 = vpop.permute.xlu2 %1866 }
 0x2fc   :  { %v1912_v44 = vpop.permute.xlu1 %1911 }
 0x2fd   :  { %v2025_v54 = vsel %vm1671_vm6, %v2017_v21, %v1912_v44 }
 0x2fe   :  { %v2034_v5 = vsel %vm2033_vm4, %v2025_v54, %v1938_v56  ;;  %v2004_v56 = vsel %vm787_vm5, %v5149_v41, %v1837_v18 }
 0x2ff   :  { %v1739_v27 = vpop.f32.mrf.mxu1  ;;  %v2043_v60 = vsel %vm6640_vm8, %v2034_v5, %v1962_v29  ;;  %v1784_v29 = vld [vmem:[%s6628_s4 + $0x88] sm:$0xff] }
 0x300   :  { %v1748_v50 = vmul.f32 %v5129_v43, %v1739_v27  ;;  %2161 = vmatpush.msra.mxu3 %v1784_v29  ;;  %v1783_v27 = vld [vmem:[%s6628_s4 + $0x80] sm:$0xff]  ;;  %v5362_v29 = vrot.slane %v1855_v48, 4 }
 0x302   :  { %v1753_v46 = vadd.f32 %v5135_v47, %v1748_v50  ;;  %v1767_v50 = vld [vmem:[%s6628_s4] sm:$0xff]  ;;  %2162 = vmatpush.msra.mxu3 %v1783_v27 }
 0x303   :  { %2133 = vmatpush.msrb.mxu1 %v1767_v50 }
 0x304   :  { %v5272_v0 = vpop.permute.xlu1 %1939  ;;  %v1757_v59 = vmax.f32 %v1753_v46, 0.0 }
 0x306   :  { %v1790_v9 = vrot.slane %v1757_v59, 7  ;;  %v3715_v37 = vrot.slane %v1757_v59, 11 }
 0x308   :  { %v1807_v40 = vsel %vm1366_vm14, 0.0, %v3715_v37  ;;  %v1806_v52 = vsel %vm1366_vm14, 0.0, %v1790_v9  ;;  %v1839_v9 = vpop.permute.xlu0 %1838  ;;  %v2011_v37 = vsel %vm6642_vm9, %v2004_v56, %v5237_v39  ;;  %v2069_v39 = vrot.slane %v5199_v10, 4 }
 0x309   :  { %v5293_v26 = vsel %vm1810_vm2, %v1807_v40, 0.0  ;;  %v5296_v3 = vsel %vm1810_vm2, %v1806_v52, 0.0  ;;  %v2018_v4 = vsel %vm1653_vm10, %v2011_v37, %v5254_v13  ;;  %v2070_v37 = vrot.slane %v1935_v2, 4 }
 0x30a   :  { %1895 = vrot.lane.b32.xlu2 %v5293_v26, %s3805_s15  ;;  %1893 = vrot.lane.b32.xlu1 %v5296_v3, %s3805_s15  ;;  %v1859_v15 = vrot.slane %v5296_v3, 2  ;;  %v1831_v46 = vrot.slane %v5296_v3, 1  ;;  %v1832_v21 = vrot.slane %v5293_v26, 1  ;;  %v5332_v54 = vrot.slane %v5293_v26, 2 }
 0x30b   :  { %v2026_v5 = vsel %vm1671_vm6, %v2018_v4, %v1914_v22 }
 0x30c   :  { %v1983_v44 = vpop.permute.xlu1 %1982  ;;  %1870 = vrot.lane.b32.xlu0 %v1859_v15, %s3801_s29  ;;  %v1892_v59 = vpop.permute.xlu2 %1891  ;;  %v2035_v41 = vsel %vm2033_vm4, %v2026_v5, %v5272_v0 }
 0x30d   :  { %v2052_v42 = vsel %vm2051_vm15, %v2043_v60, %v1983_v44 }
 0x30e   :  { %v2075_v12 = vsel %vm921_vm1, %v2052_v42, %v2068_v25  ;;  %v2005_v42 = vsel %vm787_vm5, %v5146_v17, %v1839_v9 }
 0x30f   :  { %2083 = vst [vmem:[#allocation1] ss:$2 sm:$0xff] %v2075_v12  ;;  %v2012_v27 = vsel %vm6642_vm9, %v2005_v42, %v1867_v45 }
 0x312   :  { %1969 = vrot.lane.b32.xlu1 %v5293_v26, %s3809_s27  ;;  %1842 = vrot.lane.b32.xlu2 %v1831_v46, %s3798_s22 }
 0x314   :  { %1919 = vrot.lane.b32.xlu0 %v1831_v46, %s3807_s2  ;;  %v1985_v52 = vpop.permute.xlu2 %1984 }
 0x31a   :  { %1921 = vrot.lane.b32.xlu1 %v1832_v21, %s3807_s2  ;;  %1945 = vrot.lane.b32.xlu2 %v1859_v15, %s3810_s3 }
 0x31c   :  { %1947 = vrot.lane.b32.xlu0 %v5332_v54, %s3810_s3  ;;  %v1942_v55 = vpop.permute.xlu2 %1941 }
 0x322   :  { %1872 = vrot.lane.b32.xlu1 %v5332_v54, %s3801_s29  ;;  %1844 = vrot.lane.b32.xlu2 %v1832_v21, %s3798_s22 }
 0x324   :  { %v1890_v40 = vpop.permute.xlu1 %1889  ;;  %1990 = vrot.lane.b32.xlu0 %v1832_v21, %s3808_s25 }
 0x325   :  { %v1964_v18 = vpop.permute.xlu0 %1963  ;;  %v2019_v21 = vsel %vm1653_vm10, %v2012_v27, %v1890_v40 }
 0x326   :  { %v2044_v6 = vsel %vm6640_vm8, %v2035_v41, %v1964_v18 }
 0x327   :  { %v2053_v13 = vsel %vm2051_vm15, %v2044_v6, %v1985_v52 }
 0x328   :  { %v2076_v53 = vsel %vm921_vm1, %v2053_v13, %v2069_v39 }
 0x329   :  { %2085 = vst [vmem:[#allocation1 + $0x1] ss:$2 sm:$0xff] %v2076_v53 }
 0x32c   :  { %v1966_v25 = vpop.permute.xlu1 %1965 }
 0x32d   :  { %v1869_v44 = vpop.permute.xlu0 %1868 }
 0x330   :  { %v2098_v22 = vld.sshfl [vmem:[#allocation1] sm:$0xff pattern:$0x75316420]  ;;  %v2099_v60 = vld.sshfl [vmem:[#allocation1 + $0x8] sm:$0xff pattern:$0x75316420] }
 0x331   :  { %2134 = vmatmul.f32.vlgmr.msrb.gmra.mxu1 %v2098_v22  ;;  %3717 = vmatmul.msk.f32.vlgmr.msra.gmra.mxu3 %vm787_vm5, %v2099_v60  ;;  %v2438_v60 = vsel %vm1366_vm14, %v4552_v57, 0.0 }
 0x332   :  { %v2484_v42 = vrot.slane %v2438_v60, 1 }
 0x334   :  { %v1841_v0 = vpop.permute.xlu1 %1840 }
 0x335   :  { %v1916_v15 = vpop.permute.xlu0 %1915  ;;  %v2006_v31 = vsel %vm787_vm5, %v5185_v51, %v1841_v0 }
 0x336   :  { %v2013_v10 = vsel %vm6642_vm9, %v2006_v31, %v1869_v44  ;;  %v2027_v56 = vsel %vm1671_vm6, %v2019_v21, %v1916_v15  ;;  %v2575_v31 = vrot.slane %v2438_v60, 2 }
 0x337   :  { %v2020_v58 = vsel %vm1653_vm10, %v2013_v10, %v1892_v59  ;;  %v2036_v45 = vsel %vm2033_vm4, %v2027_v56, %v1942_v55  ;;  %v2574_v10 = vrot.slane %v4570_v8, 2 }
 0x338   :  { %v2045_v9 = vsel %vm6640_vm8, %v2036_v45, %v1966_v25 }
 0x33c   :  { %v1918_v12 = vpop.permute.xlu1 %1917 }
 0x33d   :  { %v2028_v50 = vsel %vm1671_vm6, %v2020_v58, %v1918_v12  ;;  %v1944_v46 = vpop.permute.xlu0 %1943  ;;  %v2390_v12 = vrot.slane %v4511_v20, 7  ;;  %v5428_v58 = vsel %vm243_vm0, %v1422_v23, %v2484_v42  ;;  %v2391_v23 = vrot.slane %v4490_v1, 7 }
 0x33e   :  { %v2037_v51 = vsel %vm2033_vm4, %v2028_v50, %v1944_v46 }
 0x33f   :  { %v2046_v17 = vsel %vm6640_vm8, %v2037_v51, %v5230_v38  ;;  %v5431_v27 = vsel %vm1366_vm14, 0.0, %v2390_v12  ;;  %v2439_v50 = vsel %vm1366_vm14, %v2390_v12, 0.0  ;;  %v5449_v55 = vsel %vm1366_vm14, 0.0, %v2391_v23 }
 0x340   :  { %v2055_v59 = vsel %vm2051_vm15, %v2046_v17, %v5232_v24  ;;  %v2577_v20 = vrot.slane %v5431_v27, 2  ;;  %v2578_v46 = vrot.slane %v2439_v50, 2  ;;  %v2486_v51 = vrot.slane %v5431_v27, 1 }
 0x341   :  { %v2078_v48 = vsel %vm921_vm1, %v2055_v59, %v5362_v29  ;;  %v2487_v17 = vrot.slane %v2439_v50, 1  ;;  %v2440_v1 = vsel %vm1366_vm14, %v2391_v23, 0.0  ;;  %v2580_v45 = vrot.slane %v5449_v55, 2 }
 0x342   :  { %2089 = vst [vmem:[#allocation1 + $0x11] ss:$2 sm:$0xff] %v2078_v48  ;;  %v2393_v23 = vrot.slane %v4588_v49, 7 }
 0x343   :  { %v2488_v48 = vsel %vm243_vm0, %v2486_v51, %v2487_v17 }
 0x344   :  { %v5500_v51 = vsel %vm1366_vm14, 0.0, %v2393_v23  ;;  %v2442_v17 = vsel %vm1366_vm14, %v2393_v23, 0.0 }
 0x345   :  { %v1987_v4 = vpop.permute.xlu0 %1986  ;;  %v2587_v49 = vrot.slane %v2442_v17, 2 }
 0x346   :  { %v2054_v5 = vsel %vm2051_vm15, %v2045_v9, %v1987_v4  ;;  %v2581_v9 = vrot.slane %v2440_v1, 2  ;;  %v2489_v4 = vrot.slane %v5449_v55, 1 }
 0x347   :  { %v2077_v40 = vsel %vm921_vm1, %v2054_v5, %v2070_v37  ;;  %v2490_v5 = vrot.slane %v2440_v1, 1  ;;  %v2496_v1 = vrot.slane %v2442_v17, 1 }
 0x348   :  { %2087 = vst [vmem:[#allocation1 + $0x10] ss:$2 sm:$0xff] %v2077_v40 }
 0x34f   :  { %v2100_v41 = vld.sshfl [vmem:[#allocation1 + $0x10] sm:$0xff pattern:$0x75316420]  ;;  %v2101_v18 = vld.sshfl [vmem:[#allocation1 + $0x18] sm:$0xff pattern:$0x75316420] }
 0x350   :  { %2137 = vmatmul.f32.gmra.mxu1 %v2100_v41  ;;  %3718 = vmatmul.msk.f32.gmra.mxu3 %vm787_vm5, %v2101_v18  ;;  %v2491_v18 = vsel %vm243_vm0, %v2489_v4, %v2490_v5 }
 0x351   :  { %v1742_v52 = vpop.f32.mrf.mxu1 }
 0x352   :  { %v1749_v39 = vmul.f32 %v5129_v43, %v1742_v52 }
 0x354   :  { %v1754_v6 = vadd.f32 %v5135_v47, %v1749_v39 }
 0x356   :  { %v1758_v13 = vmax.f32 %v1754_v6, 0.0  ;;  %v2392_v6 = vrot.slane %v4522_v30, 7 }
 0x358   :  { %v1792_v53 = vrot.slane %v1758_v13, 7  ;;  %v3716_v11 = vrot.slane %v1758_v13, 11 }
 0x35a   :  { %v1809_v2 = vsel %vm1366_vm14, 0.0, %v3716_v11  ;;  %v1808_v25 = vsel %vm1366_vm14, 0.0, %v1792_v53 }
 0x35b   :  { %v5387_v44 = vsel %vm1810_vm2, %v1809_v2, 0.0  ;;  %v5390_v22 = vsel %vm1810_vm2, %v1808_v25, 0.0  ;;  %vm2573_vm2 = vcmask 1045504   ;;  %v5476_v2 = vsel %vm1366_vm14, 0.0, %v2392_v6 }
 0x35c   :  { %1899 = vrot.lane.b32.xlu1 %v5387_v44, %s3805_s15  ;;  %1897 = vrot.lane.b32.xlu0 %v5390_v22, %s3805_s15  ;;  %v1833_v43 = vrot.slane %v5390_v22, 1  ;;  %v5400_v47 = vrot.slane %v5390_v22, 2  ;;  %v1910_v0 = vrot.slane %v5387_v44, 1  ;;  %v1936_v15 = vrot.slane %v5387_v44, 2 }
 0x35d   :  { %1971 = vrot.lane.b32.xlu2 %v5390_v22, %s3809_s27  ;;  %v5423_v57 = vsel %vm2573_vm2, %v2574_v10, %v2575_v31  ;;  %v2579_v59 = vsel %vm2573_vm2, %v2577_v20, %v2578_v46  ;;  %v2582_v41 = vsel %vm2573_vm2, %v2580_v45, %v2581_v9  ;;  %v2441_v25 = vsel %vm1366_vm14, %v2392_v6, 0.0  ;;  %v1785_v9 = vld [vmem:[%s6628_s4 + $0x90] sm:$0x3] }
 0x35e   :  { %v2493_v60 = vrot.slane %v2441_v25, 1  ;;  %v2072_v31 = vrot.slane %v5332_v54, 4  ;;  %v2583_v20 = vrot.slane %v5476_v2, 2  ;;  %v2584_v46 = vrot.slane %v2441_v25, 2 }
 0x35f   :  { %v2586_v45 = vrot.slane %v5500_v51, 2  ;;  %v5516_v5 = vperm.slane %v1785_v9, 0  ;;  %v5520_v6 = vperm.slane %v1785_v9, 1 }
 0x360   :  { %v2585_v54 = vsel %vm2573_vm2, %v2583_v20, %v2584_v46 }
 0x361   :  { %v2588_v4 = vsel %vm2573_vm2, %v2586_v45, %v2587_v49 }
 0x364   :  { %1973 = vrot.lane.b32.xlu0 %v5387_v44, %s3809_s27  ;;  %1992 = vrot.lane.b32.xlu1 %v1833_v43, %s3808_s25  ;;  %v5442_v21 = vpop.permute.xlu2 %1895 }
 0x365   :  { %1874 = vrot.lane.b32.xlu2 %v5400_v47, %s3801_s29 }
 0x36c   :  { %1846 = vrot.lane.b32.xlu0 %v1833_v43, %s3798_s22  ;;  %1949 = vrot.lane.b32.xlu1 %v5400_v47, %s3810_s3  ;;  %v5459_v40 = vpop.permute.xlu2 %1842 }
 0x36d   :  { %1923 = vrot.lane.b32.xlu2 %v1833_v43, %s3807_s2 }
 0x374   :  { %1925 = vrot.lane.b32.xlu0 %v1910_v0, %s3807_s2  ;;  %1994 = vrot.lane.b32.xlu1 %v1910_v0, %s3808_s25  ;;  %v1946_v11 = vpop.permute.xlu2 %1945 }
 0x375   :  { %1951 = vrot.lane.b32.xlu2 %v1936_v15, %s3810_s3 }
 0x37c   :  { %2619 = vrot.lane.b32.xlu0 %v5423_v57, %s3798_s22  ;;  %2666 = vrot.lane.b32.xlu1 %v5431_v27, %s3800_s26  ;;  %v1894_v52 = vpop.permute.xlu1 %1893 }
 0x37d   :  { %2528 = vrot.lane.b32.xlu2 %v5428_v58, %s3799_s23  ;;  %v2021_v13 = vsel %vm1653_vm10, %v5268_v34, %v1894_v52  ;;  %v2492_v34 = vrot.slane %v5476_v2, 1 }
 0x37e   :  { %v5445_v56 = vpop.permute.xlu0 %1870 }
 0x37f   :  { %v2494_v50 = vsel %vm243_vm0, %v2492_v34, %v2493_v60  ;;  %v2394_v60 = vrot.slane %v4664_v61, 7 }
 0x384   :  { %2776 = vrot.lane.b32.xlu0 %v2579_v59, %s3804_s0  ;;  %2824 = vrot.lane.b32.xlu1 %v5449_v55, %s3805_s15  ;;  %v1970_v30 = vpop.permute.xlu1 %1969 }
 0x385   :  { %2722 = vrot.lane.b32.xlu2 %v2488_v48, %s3801_s29 }
 0x386   :  { %v1920_v37 = vpop.permute.xlu0 %1919 }
 0x387   :  { %v2029_v53 = vsel %vm1671_vm6, %v2021_v13, %v1920_v37 }
 0x388   :  { %v2038_v43 = vsel %vm2033_vm4, %v2029_v53, %v1946_v11 }
 0x389   :  { %v2047_v0 = vsel %vm6640_vm8, %v2038_v43, %v1970_v30 }
 0x38c   :  { %2914 = vrot.lane.b32.xlu0 %v2582_v41, %s3807_s2  ;;  %2530 = vrot.lane.b32.xlu1 %v2488_v48, %s3799_s23  ;;  %v2495_v48 = vrot.slane %v5500_v51, 1  ;;  %v1922_v25 = vpop.permute.xlu1 %1921 }
 0x38d   :  { %2869 = vrot.lane.b32.xlu2 %v2491_v18, %s3806_s16 }
 0x38e   :  { %v5466_v39 = vpop.permute.xlu0 %1947  ;;  %v2497_v37 = vsel %vm243_vm0, %v2495_v48, %v2496_v1  ;;  %v2007_v1 = vsel %vm787_vm5, %v5296_v3, %v5459_v40  ;;  %v2388_v3 = vld [vmem:[%s6629_s5 + $0x40] sm:$0xff] }
 0x38f   :  { %v2014_v45 = vsel %vm6642_vm9, %v2007_v1, %v5445_v56  ;;  %3140 = vmatpush.msra.mxu2 %v2388_v3  ;;  %v2387_v56 = vld [vmem:[%s6629_s5 + $0x38] sm:$0xff] }
 0x391   :  { %3141 = vmatpush.msra.mxu2 %v2387_v56 }
 0x394   :  { %2668 = vrot.lane.b32.xlu0 %v5449_v55, %s3800_s26  ;;  %2724 = vrot.lane.b32.xlu1 %v2491_v18, %s3801_s29  ;;  %v1873_v61 = vpop.permute.xlu1 %1872 }
 0x395   :  { %2621 = vrot.lane.b32.xlu2 %v2579_v59, %s3798_s22  ;;  %v5505_v59 = vpop.permute.xlu2 %1844 }
 0x396   :  { %v1991_v10 = vpop.permute.xlu0 %1990  ;;  %v2008_v56 = vsel %vm787_vm5, %v5293_v26, %v5505_v59  ;;  %v2381_v59 = vld [vmem:[%s6629_s5 + $0x8] sm:$0xff] }
 0x397   :  { %v2056_v42 = vsel %vm2051_vm15, %v2047_v0, %v1991_v10 }
 0x398   :  { %v2079_v12 = vsel %vm921_vm1, %v2056_v42, %v2072_v31  ;;  %v5542_v42 = vsel %vm1366_vm14, 0.0, %v2394_v60 }
 0x399   :  { %2091 = vst [vmem:[#allocation1 + $0x20] ss:$2 sm:$0xff] %v2079_v12  ;;  %v2443_v12 = vsel %vm1366_vm14, %v2394_v60, 0.0  ;;  %v2589_v20 = vrot.slane %v5542_v42, 2 }
 0x39a   :  { %v2590_v46 = vrot.slane %v2443_v12, 2  ;;  %v2499_v23 = vrot.slane %v2443_v12, 1 }
 0x39c   :  { %2826 = vrot.lane.b32.xlu0 %v5476_v2, %s3805_s15  ;;  %2871 = vrot.lane.b32.xlu1 %v2494_v50, %s3806_s16  ;;  %v5554_v17 = vsel %vm2573_vm2, %v2589_v20, %v2590_v46  ;;  %v2385_v20 = vld [vmem:[%s6629_s5 + $0x28] sm:$0xff] }
 0x39d   :  { %2778 = vrot.lane.b32.xlu2 %v2582_v41, %s3804_s0 }
 0x3a4   :  { %2532 = vrot.lane.b32.xlu0 %v2491_v18, %s3799_s23  ;;  %2623 = vrot.lane.b32.xlu1 %v2582_v41, %s3798_s22 }
 0x3a5   :  { %2916 = vrot.lane.b32.xlu2 %v2585_v54, %s3807_s2 }
 0x3ac   :  { %2726 = vrot.lane.b32.xlu0 %v2494_v50, %s3801_s29  ;;  %2780 = vrot.lane.b32.xlu1 %v2585_v54, %s3804_s0 }
 0x3ad   :  { %2670 = vrot.lane.b32.xlu2 %v5476_v2, %s3800_s26 }
 0x3ae   :  { %v2135_v41 = vpop.f32.mrf.mxu1 }
 0x3b4   :  { %2873 = vrot.lane.b32.xlu0 %v2497_v37, %s3806_s16  ;;  %2918 = vrot.lane.b32.xlu1 %v2588_v4, %s3807_s2  ;;  %v2164_v18 = vpop.f32.mrf.mxu3 }
 0x3b5   :  { %2828 = vrot.lane.b32.xlu2 %v5500_v51, %s3805_s15  ;;  %v2165_v52 = vadd.f32 %v2164_v18, %v2135_v41  ;;  %v2395_v18 = vrot.slane %v4674_v36, 7 }
 0x3b7   :  { %v1972_v13 = vpop.permute.xlu2 %1971  ;;  %v2177_v53 = vmul.f32 %v5516_v5, %v2165_v52  ;;  %v5588_v36 = vsel %vm1366_vm14, 0.0, %v2395_v18 }
 0x3b8   :  { %v2501_v1 = vrot.slane %v5588_v36, 1 }
 0x3b9   :  { %v2182_v11 = vadd.f32 %v5520_v6, %v2177_v53 }
 0x3bb   :  { %v5524_v43 = vmax.f32 %v2182_v11, 0.0  ;;  %v2386_v11 = vld [vmem:[%s6629_s5 + $0x30] sm:$0xff] }
 0x3bc   :  { %2625 = vrot.lane.b32.xlu0 %v2585_v54, %s3798_s22  ;;  %2672 = vrot.lane.b32.xlu1 %v5500_v51, %s3800_s26  ;;  %v2498_v54 = vrot.slane %v5542_v42, 1 }
 0x3bd   :  { %2534 = vrot.lane.b32.xlu2 %v2494_v50, %s3799_s23  ;;  %v5531_v30 = vrot.slane %v5524_v43, 4  ;;  %v2198_v0 = vperm.slane %v5524_v43, 0  ;;  %3142 = vmatpush.msra.mxu2 %v2386_v11 }
 0x3be   :  { %v5557_v48 = vsel %vm243_vm0, %v2498_v54, %v2499_v23 }
 0x3bf   :  { %v5533_v34 = vpop.permute.xlu2 %1874  ;;  %v2199_v31 = vperm.slane %v5531_v30, 0  ;;  %3143 = vmatpush.msra.mxu2 %v2385_v20 }
 0x3c1   :  { %v5539_v10 = vsel %vm1168_vm11, %v2199_v31, %v2198_v0  ;;  %v2073_v31 = vrot.slane %v5400_v47, 4 }
 0x3c4   :  { %2782 = vrot.lane.b32.xlu0 %v2588_v4, %s3804_s0  ;;  %2830 = vrot.lane.b32.xlu1 %v5542_v42, %s3805_s15 }
 0x3c5   :  { %2728 = vrot.lane.b32.xlu2 %v2497_v37, %s3801_s29 }
 0x3c7   :  { %v5549_v50 = vpop.permute.xlu2 %1923 }
 0x3cc   :  { %2920 = vrot.lane.b32.xlu0 %v5554_v17, %s3807_s2  ;;  %2536 = vrot.lane.b32.xlu1 %v2497_v37, %s3799_s23  ;;  %v2022_v37 = vsel %vm1653_vm10, %v2014_v45, %v5442_v21  ;;  %v2444_v21 = vsel %vm1366_vm14, %v2395_v18, 0.0  ;;  %v2384_v45 = vld [vmem:[%s6629_s5 + $0x20] sm:$0xff]  ;;  %v2383_v18 = vld [vmem:[%s6629_s5 + $0x18] sm:$0xff] }
 0x3cd   :  { %2875 = vrot.lane.b32.xlu2 %v5557_v48, %s3806_s16  ;;  %v2030_v40 = vsel %vm1671_vm6, %v2022_v37, %v1922_v25  ;;  %v2138_v52 = vpop.f32.mrf.mxu1  ;;  %3144 = vmatpush.msra.mxu2 %v2384_v45  ;;  %v2593_v26 = vrot.slane %v2444_v21, 2 }
 0x3ce   :  { %v5569_v49 = vpop.permute.xlu1 %1899  ;;  %v1898_v41 = vpop.permute.xlu0 %1897  ;;  %v2039_v25 = vsel %vm2033_vm4, %v2030_v40, %v5466_v39  ;;  %v2382_v40 = vld [vmem:[%s6629_s5 + $0x10] sm:$0xff] }
 0x3cf   :  { %v5571_v9 = vpop.permute.xlu2 %1951  ;;  %v2048_v0 = vsel %vm6640_vm8, %v2039_v25, %v1972_v13  ;;  %3145 = vmatpush.msra.mxu2 %v2383_v18 }
 0x3d1   :  { %3146 = vmatpush.msra.mxu2 %v2382_v40 }
 0x3d3   :  { %v2167_v53 = vpop.f32.mrf.mxu3  ;;  %3147 = vmatpush.msra.mxu2 %v2381_v59 }
 0x3d4   :  { %2674 = vrot.lane.b32.xlu0 %v5542_v42, %s3800_s26  ;;  %2730 = vrot.lane.b32.xlu1 %v5557_v48, %s3801_s29  ;;  %v2168_v60 = vadd.f32 %v2167_v53, %v2138_v52  ;;  %v2015_v52 = vsel %vm6642_vm9, %v2008_v56, %v1873_v61 }
 0x3d5   :  { %2627 = vrot.lane.b32.xlu2 %v2588_v4, %s3798_s22  ;;  %v2502_v4 = vrot.slane %v2444_v21, 1  ;;  %v2380_v21 = vld [vmem:[%s6629_s5] sm:$0xff] }
 0x3d6   :  { %v1993_v12 = vpop.permute.xlu1 %1992  ;;  %v2178_v46 = vmul.f32 %v5516_v5, %v2168_v60  ;;  %v1974_v39 = vpop.permute.xlu0 %1973  ;;  %v2023_v60 = vsel %vm1653_vm10, %v2015_v52, %v1898_v41  ;;  %3148 = vmatpush.msra.mxu2 %v2380_v21 }
 0x3d7   :  { %v5603_v54 = vpop.permute.xlu2 %2528  ;;  %v2057_v23 = vsel %vm2051_vm15, %v2048_v0, %v1993_v12  ;;  %v5618_v3 = vsel %vm243_vm0, %v2501_v1, %v2502_v4  ;;  %v2592_v12 = vrot.slane %v5588_v36, 2  ;;  %v2031_v41 = vsel %vm1671_vm6, %v2023_v60, %v5549_v50 }
 0x3d8   :  { %v2080_v13 = vsel %vm921_vm1, %v2057_v23, %v2073_v31  ;;  %v2183_v47 = vadd.f32 %v5520_v6, %v2178_v46 }
 0x3d9   :  { %2093 = vst [vmem:[#allocation1 + $0x21] ss:$2 sm:$0xff] %v2080_v13  ;;  %v2594_v13 = vsel %vm2573_vm2, %v2592_v12, %v2593_v26 }
 0x3da   :  { %v5615_v37 = vmax.f32 %v2183_v47, 0.0 }
 0x3dc   :  { %2832 = vrot.lane.b32.xlu0 %v5588_v36, %s3805_s15  ;;  %2877 = vrot.lane.b32.xlu1 %v5618_v3, %s3806_s16  ;;  %v5634_v11 = vrot.slane %v5615_v37, 4  ;;  %v2200_v25 = vperm.slane %v5615_v37, 0 }
 0x3dd   :  { %2784 = vrot.lane.b32.xlu2 %v5554_v17, %s3804_s0 }
 0x3de   :  { %v1950_v53 = vpop.permute.xlu1 %1949  ;;  %v1847_v31 = vpop.permute.xlu0 %1846  ;;  %v2207_v23 = vsel %vm1170_vm12, %v2200_v25, %v5539_v10  ;;  %v2201_v1 = vperm.slane %v5634_v11, 0  ;;  %v2074_v10 = vrot.slane %v1936_v15, 4 }
 0x3df   :  { %v5638_v0 = vpop.permute.xlu2 %2722  ;;  %v2009_v46 = vsel %vm787_vm5, %v5390_v22, %v1847_v31  ;;  %v2040_v4 = vsel %vm2033_vm4, %v2031_v41, %v1950_v53 }
 0x3e0   :  { %v2102_v61 = vld.sshfl [vmem:[#allocation1 + $0x20] sm:$0xff pattern:$0x75316420]  ;;  %v2103_v20 = vld.sshfl [vmem:[#allocation1 + $0x28] sm:$0xff pattern:$0x75316420]  ;;  %v2016_v22 = vsel %vm6642_vm9, %v2009_v46, %v5533_v34  ;;  %v5664_v50 = vsel %vm1172_vm13, %v2201_v1, %v2207_v23  ;;  %v2049_v34 = vsel %vm6640_vm8, %v2040_v4, %v1974_v39 }
 0x3e1   :  { %2140 = vmatmul.f32.gmra.mxu1 %v2102_v61  ;;  %3719 = vmatmul.msk.f32.gmra.mxu3 %vm787_vm5, %v2103_v20 }
 0x3e4   :  { %2538 = vrot.lane.b32.xlu0 %v5557_v48, %s3799_s23  ;;  %2629 = vrot.lane.b32.xlu1 %v5554_v17, %s3798_s22  ;;  %v2024_v48 = vsel %vm1653_vm10, %v2016_v22, %v5569_v49  ;;  %v2396_v17 = vrot.slane %v4741_v62, 7 }
 0x3e5   :  { %2922 = vrot.lane.b32.xlu2 %v2594_v13, %s3807_s2 }
 0x3e6   :  { %v1995_v47 = vpop.permute.xlu1 %1994  ;;  %v1926_v40 = vpop.permute.xlu0 %1925  ;;  %v5683_v53 = vsel %vm1366_vm14, 0.0, %v2396_v17  ;;  %v2445_v49 = vsel %vm1366_vm14, %v2396_v17, 0.0 }
 0x3e7   :  { %v2870_v45 = vpop.permute.xlu2 %2869  ;;  %v2058_v18 = vsel %vm2051_vm15, %v2049_v34, %v1995_v47  ;;  %v2032_v52 = vsel %vm1671_vm6, %v2024_v48, %v1926_v40  ;;  %v2505_v60 = vrot.slane %v2445_v49, 1  ;;  %v2595_v31 = vrot.slane %v5683_v53, 2 }
 0x3e8   :  { %v2081_v56 = vsel %vm921_vm1, %v2058_v18, %v2074_v10  ;;  %v2041_v44 = vsel %vm2033_vm4, %v2032_v52, %v5571_v9  ;;  %v2959_v9 = vsel %vm753_vm3, %v4570_v8, %v5603_v54  ;;  %v2596_v12 = vrot.slane %v2445_v49, 2 }
 0x3e9   :  { %2095 = vst [vmem:[#allocation1 + $0x30] ss:$2 sm:$0xff] %v2081_v56  ;;  %v2050_v15 = vsel %vm6640_vm8, %v2041_v44, %v5230_v38  ;;  %vm6643_vm4 = vcmask 326656   ;;  %v2397_v48 = vrot.slane %v4786_v16, 7  ;;  %vm6648_vm8 = vcmask 588800  }
 0x3ea   :  { %v2059_v39 = vsel %vm2051_vm15, %v2050_v15, %v5232_v24  ;;  %v2504_v24 = vrot.slane %v5683_v53, 1  ;;  %v2597_v61 = vsel %vm2573_vm2, %v2595_v31, %v2596_v12  ;;  %vm6644_vm15 = vcmask 457728  }
 0x3eb   :  { %v2082_v62 = vsel %vm921_vm1, %v2059_v39, %v5362_v29  ;;  %v2429_v40 = vsel %vm1366_vm14, 0.0, %v2397_v48 }
 0x3ec   :  { %2732 = vrot.lane.b32.xlu0 %v5618_v3, %s3801_s29  ;;  %2786 = vrot.lane.b32.xlu1 %v2594_v13, %s3804_s0  ;;  %2097 = vst [vmem:[#allocation1 + $0x31] ss:$2 sm:$0xff] %v2082_v62  ;;  %v2506_v59 = vsel %vm243_vm0, %v2504_v24, %v2505_v60  ;;  %v2770_v17 = vrot.slane %v2429_v40, 2  ;;  %v2716_v44 = vrot.slane %v2429_v40, 1 }
 0x3ed   :  { %2676 = vrot.lane.b32.xlu2 %v5588_v36, %s3800_s26 }
 0x3ee   :  { %v2667_v38 = vpop.permute.xlu1 %2666  ;;  %v2620_v29 = vpop.permute.xlu0 %2619 }
 0x3ef   :  { %v2622_v25 = vpop.permute.xlu2 %2621  ;;  %v5699_v26 = vsel %vm787_vm5, %v2959_v9, %v2620_v29 }
 0x3f0   :  { %v2989_v54 = vsel %vm821_vm7, %v5699_v26, %v2667_v38 }
 0x3f1   :  { %v3005_v1 = vsel %vm6642_vm9, %v2989_v54, %v5638_v0 }
 0x3f3   :  { %v2104_v20 = vld.sshfl [vmem:[#allocation1 + $0x30] sm:$0xff pattern:$0x75316420]  ;;  %v2105_v46 = vld.sshfl [vmem:[#allocation1 + $0x38] sm:$0xff pattern:$0x75316420] }
 0x3f4   :  { %2879 = vrot.lane.b32.xlu0 %v2506_v59, %s3806_s16  ;;  %2924 = vrot.lane.b32.xlu1 %v2597_v61, %s3807_s2 }
 0x3f5   :  { %2834 = vrot.lane.b32.xlu2 %v5683_v53, %s3805_s15  ;;  %2143 = vmatmul.f32.gmra.mxu1 %v2104_v20 }
 0x3f6   :  { %3720 = vmatmul.msk.f32.gmra.mxu3 %vm787_vm5, %v2105_v46  ;;  %v2825_v41 = vpop.permute.xlu1 %2824  ;;  %v2777_v23 = vpop.permute.xlu0 %2776 }
 0x3f7   :  { %v2779_v21 = vpop.permute.xlu2 %2778  ;;  %v3021_v4 = vsel %vm6643_vm4, %v3005_v1, %v2777_v23  ;;  %vm6645_vm4 = vcmask 588800   ;;  %v2215_v23 = vperm.slane %v5531_v30, 1  ;;  %v2256_v1 = vperm.slane %v5615_v37, 3 }
 0x3f8   :  { %v3037_v22 = vsel %vm1653_vm10, %v3021_v4, %v2825_v41  ;;  %v2255_v41 = vperm.slane %v5531_v30, 3  ;;  %v2236_v4 = vperm.slane %v5615_v37, 2 }
 0x3f9   :  { %v3053_v18 = vsel %vm6644_vm15, %v3037_v22, %v2870_v45  ;;  %vm6646_vm15 = vcmask 326656   ;;  %v2234_v22 = vperm.slane %v5524_v43, 2 }
 0x3fc   :  { %2631 = vrot.lane.b32.xlu0 %v2594_v13, %s3798_s22  ;;  %2678 = vrot.lane.b32.xlu1 %v5683_v53, %s3800_s26  ;;  %v2446_v13 = vsel %vm1366_vm14, %v2397_v48, 0.0  ;;  %v2257_v48 = vperm.slane %v5634_v11, 3 }
 0x3fd   :  { %2540 = vrot.lane.b32.xlu2 %v5618_v3, %s3799_s23  ;;  %v2771_v52 = vrot.slane %v2446_v13, 2  ;;  %v2717_v39 = vrot.slane %v2446_v13, 1 }
 0x3fe   :  { %v2531_v10 = vpop.permute.xlu1 %2530  ;;  %v2915_v34 = vpop.permute.xlu0 %2914 }
 0x3ff   :  { %v2917_v47 = vpop.permute.xlu2 %2916  ;;  %v3069_v0 = vsel %vm1671_vm6, %v3053_v18, %v2915_v34  ;;  %v2960_v3 = vsel %vm753_vm3, %v5431_v27, %v2531_v10  ;;  %v2772_v49 = vsel %vm2573_vm2, %v2770_v17, %v2771_v52  ;;  %v2718_v24 = vsel %vm243_vm0, %v2716_v44, %v2717_v39 }
 0x400   :  { %3731 = vmatmul.msk.f32.vlgmr.msra.gmra.mxu2 %vm6645_vm4, %v3069_v0  ;;  %v2975_v15 = vsel %vm787_vm5, %v2960_v3, %v2622_v25  ;;  %vm6647_vm4 = vcmask 457728   ;;  %v2216_v10 = vperm.slane %v5615_v37, 1  ;;  %v2237_v0 = vperm.slane %v5634_v11, 2 }
 0x404   :  { %2788 = vrot.lane.b32.xlu0 %v2597_v61, %s3804_s0  ;;  %2836 = vrot.lane.b32.xlu1 %v2429_v40, %s3805_s15 }
 0x405   :  { %2734 = vrot.lane.b32.xlu2 %v2506_v59, %s3801_s29 }
 0x406   :  { %v2725_v45 = vpop.permute.xlu1 %2724  ;;  %v2669_v56 = vpop.permute.xlu0 %2668 }
 0x407   :  { %v2671_v16 = vpop.permute.xlu2 %2670  ;;  %v2990_v62 = vsel %vm821_vm7, %v2975_v15, %v2669_v56 }
 0x408   :  { %v3006_v38 = vsel %vm6642_vm9, %v2990_v62, %v2725_v45  ;;  %v2217_v45 = vperm.slane %v5634_v11, 1 }
 0x409   :  { %v3022_v29 = vsel %vm6646_vm15, %v3006_v38, %v2779_v21  ;;  %v2235_v21 = vperm.slane %v5531_v30, 2  ;;  %v2214_v30 = vperm.slane %v5524_v43, 1 }
 0x40b   :  { %v2222_v13 = vsel %vm1168_vm11, %v2215_v23, %v2214_v30 }
 0x40c   :  { %2926 = vrot.lane.b32.xlu0 %v2772_v49, %s3807_s2  ;;  %2542 = vrot.lane.b32.xlu1 %v2506_v59, %s3799_s23  ;;  %v2223_v17 = vsel %vm1170_vm12, %v2216_v10, %v2222_v13 }
 0x40d   :  { %2881 = vrot.lane.b32.xlu2 %v2718_v24, %s3806_s16 }
 0x40e   :  { %v2872_v27 = vpop.permute.xlu1 %2871  ;;  %v2827_v25 = vpop.permute.xlu0 %2826 }
 0x40f   :  { %v2829_v9 = vpop.permute.xlu2 %2828  ;;  %v3038_v60 = vsel %vm1653_vm10, %v3022_v29, %v2827_v25  ;;  %v2399_v25 = vrot.slane %v4864_v35, 7 }
 0x410   :  { %v3054_v31 = vsel %vm6647_vm4, %v3038_v60, %v2872_v27 }
 0x411   :  { %v3070_v12 = vsel %vm1671_vm6, %v3054_v31, %v2917_v47 }
 0x412   :  { %3732 = vmatmul.msk.f32.gmra.mxu2 %vm6648_vm8, %v3070_v12  ;;  %vm6649_vm8 = vmmov %vm6646_vm15  ;;  %v5805_v12 = vsel %vm1366_vm14, %v2399_v25, 0.0 }
 0x413   :  { %vm6650_vm15 = vmmov %vm6647_vm4  ;;  %vm6651_vm4 = vcmask 588800  }
 0x414   :  { %2680 = vrot.lane.b32.xlu0 %v2429_v40, %s3800_s26  ;;  %2736 = vrot.lane.b32.xlu1 %v2718_v24, %s3801_s29  ;;  %v2242_v40 = vsel %vm1168_vm11, %v2235_v21, %v2234_v22 }
 0x415   :  { %2633 = vrot.lane.b32.xlu2 %v2597_v61, %s3798_s22  ;;  %v2254_v61 = vperm.slane %v5524_v43, 3  ;;  %v2243_v37 = vsel %vm1170_vm12, %v2236_v4, %v2242_v40 }
 0x416   :  { %v2624_v59 = vpop.permute.xlu1 %2623  ;;  %v2533_v46 = vpop.permute.xlu0 %2532  ;;  %v2244_v52 = vsel %vm1172_vm13, %v2237_v0, %v2243_v37 }
 0x417   :  { %v5746_v20 = vpop.permute.xlu2 %2534  ;;  %v2961_v54 = vsel %vm753_vm3, %v5449_v55, %v2533_v46  ;;  %v2262_v47 = vsel %vm1168_vm11, %v2255_v41, %v2254_v61  ;;  %v2511_v41 = vrot.slane %v5805_v12, 1 }
 0x418   :  { %v2976_v55 = vsel %vm787_vm5, %v2961_v54, %v2624_v59  ;;  %v2263_v43 = vsel %vm1170_vm12, %v2256_v1, %v2262_v47  ;;  %v2962_v61 = vsel %vm753_vm3, %v5476_v2, %v5746_v20 }
 0x419   :  { %v2991_v3 = vsel %vm821_vm7, %v2976_v55, %v2671_v16  ;;  %v2264_v56 = vsel %vm1172_vm13, %v2257_v48, %v2263_v43  ;;  %v2224_v16 = vsel %vm1172_vm13, %v2217_v45, %v2223_v17 }
 0x41c   :  { %2838 = vrot.lane.b32.xlu0 %v4570_v8, %s3805_s15  ;;  %2883 = vrot.lane.b32.xlu1 %v5428_v58, %s3806_s16  ;;  %v2398_v58 = vrot.slane %v4819_v14, 7 }
 0x41d   :  { %2790 = vrot.lane.b32.xlu2 %v2772_v49, %s3804_s0 }
 0x41e   :  { %v2781_v8 = vpop.permute.xlu1 %2780  ;;  %v2727_v18 = vpop.permute.xlu0 %2726  ;;  %v5784_v15 = vsel %vm1366_vm14, 0.0, %v2398_v58  ;;  %v2447_v11 = vsel %vm1366_vm14, %v2398_v58, 0.0 }
 0x41f   :  { %v2729_v34 = vpop.permute.xlu2 %2728  ;;  %v3007_v14 = vsel %vm6642_vm9, %v2991_v3, %v2727_v18  ;;  %v2507_v24 = vrot.slane %v5784_v15, 1  ;;  %v2508_v27 = vrot.slane %v2447_v11, 1  ;;  %v2598_v21 = vrot.slane %v5784_v15, 2 }
 0x420   :  { %v3023_v44 = vsel %vm6649_vm8, %v3007_v14, %v2781_v8  ;;  %v2599_v23 = vrot.slane %v2447_v11, 2 }
 0x421   :  { %v3039_v49 = vsel %vm1653_vm10, %v3023_v44, %v2829_v9  ;;  %v5795_v31 = vsel %vm243_vm0, %v2507_v24, %v2508_v27  ;;  %v5802_v9 = vsel %vm1366_vm14, 0.0, %v2399_v25 }
 0x422   :  { %v2510_v54 = vrot.slane %v5802_v9, 1 }
 0x424   :  { %2268 = vrot.lane.b32.xlu1 %v2264_v56, %s3800_s26  ;;  %2248 = vrot.lane.b32.xlu0 %v2244_v52, %s3798_s22  ;;  %v5817_v4 = vsel %vm243_vm0, %v2510_v54, %v2511_v41 }
 0x425   :  { %2228 = vrot.lane.b32.xlu2 %v2224_v16, %s3799_s23 }
 0x426   :  { %v2919_v39 = vpop.permute.xlu1 %2918  ;;  %v2874_v38 = vpop.permute.xlu0 %2873 }
 0x427   :  { %v2876_v62 = vpop.permute.xlu2 %2875  ;;  %v3055_v29 = vsel %vm6650_vm15, %v3039_v49, %v2874_v38 }
 0x428   :  { %v3071_v60 = vsel %vm1671_vm6, %v3055_v29, %v2919_v39 }
 0x429   :  { %3733 = vmatmul.msk.f32.gmra.mxu2 %vm6651_vm4, %v3071_v60 }
 0x42c   :  { %2738 = vrot.lane.b32.xlu1 %v5795_v31, %s3801_s29  ;;  %2682 = vrot.lane.b32.xlu0 %v5784_v15, %s3800_s26 }
 0x42d   :  { %2928 = vrot.lane.b32.xlu2 %v5423_v57, %s3807_s2  ;;  %v5824_v57 = vsel %vm2573_vm2, %v2598_v21, %v2599_v23 }
 0x42e   :  { %v2673_v35 = vpop.permute.xlu1 %2672  ;;  %v2626_v46 = vpop.permute.xlu0 %2625 }
 0x42f   :  { %v2628_v59 = vpop.permute.xlu2 %2627  ;;  %v2977_v1 = vsel %vm787_vm5, %v2962_v61, %v2626_v46 }
 0x430   :  { %v2992_v55 = vsel %vm821_vm7, %v2977_v1, %v2673_v35 }
 0x431   :  { %v3008_v30 = vsel %vm6642_vm9, %v2992_v55, %v2729_v34 }
 0x434   :  { %2885 = vrot.lane.b32.xlu1 %v5817_v4, %s3806_s16  ;;  %2840 = vrot.lane.b32.xlu0 %v5802_v9, %s3805_s15 }
 0x435   :  { %2792 = vrot.lane.b32.xlu2 %v5824_v57, %s3804_s0 }
 0x436   :  { %v2831_v2 = vpop.permute.xlu1 %2830  ;;  %v2783_v22 = vpop.permute.xlu0 %2782 }
 0x437   :  { %v2785_v20 = vpop.permute.xlu2 %2784  ;;  %v3024_v10 = vsel %vm6649_vm8, %v3008_v30, %v2783_v22 }
 0x438   :  { %v3040_v8 = vsel %vm1653_vm10, %v3024_v10, %v2831_v2 }
 0x439   :  { %v3056_v48 = vsel %vm6650_vm15, %v3040_v8, %v2876_v62 }
 0x43e   :  { %v2537_v47 = vpop.permute.xlu1 %2536  ;;  %v2921_v18 = vpop.permute.xlu0 %2920 }
 0x43f   :  { %v2923_v58 = vpop.permute.xlu2 %2922  ;;  %v3072_v0 = vsel %vm1671_vm6, %v3056_v48, %v2921_v18  ;;  %v2963_v40 = vsel %vm753_vm3, %v5500_v51, %v2537_v47 }
 0x440   :  { %3734 = vmatmul.msk.f32.gmra.mxu2 %vm6651_vm4, %v3072_v0  ;;  %v2978_v34 = vsel %vm787_vm5, %v2963_v40, %v2628_v59 }
 0x446   :  { %v2731_v13 = vpop.permute.xlu1 %2730  ;;  %v2675_v43 = vpop.permute.xlu0 %2674 }
 0x447   :  { %v2677_v3 = vpop.permute.xlu2 %2676  ;;  %v2993_v37 = vsel %vm821_vm7, %v2978_v34, %v2675_v43 }
 0x448   :  { %v3009_v45 = vsel %vm6642_vm9, %v2993_v37, %v2731_v13 }
 0x449   :  { %v3025_v56 = vsel %vm6649_vm8, %v3009_v45, %v2785_v20 }
 0x44e   :  { %v2878_v14 = vpop.permute.xlu1 %2877  ;;  %v2833_v52 = vpop.permute.xlu0 %2832 }
 0x44f   :  { %v2835_v17 = vpop.permute.xlu2 %2834  ;;  %v3041_v44 = vsel %vm1653_vm10, %v3025_v56, %v2833_v52 }
 0x450   :  { %v3057_v16 = vsel %vm6650_vm15, %v3041_v44, %v2878_v14 }
 0x451   :  { %v3073_v51 = vsel %vm1671_vm6, %v3057_v16, %v2923_v58 }
 0x452   :  { %3735 = vmatmul.msk.f32.gmra.mxu2 %vm6651_vm4, %v3073_v51 }
 0x456   :  { %v2630_v11 = vpop.permute.xlu1 %2629  ;;  %v2539_v62 = vpop.permute.xlu0 %2538 }
 0x457   :  { %v2541_v39 = vpop.permute.xlu2 %2540  ;;  %v2964_v49 = vsel %vm753_vm3, %v5542_v42, %v2539_v62 }
 0x458   :  { %v2979_v38 = vsel %vm787_vm5, %v2964_v49, %v2630_v11  ;;  %v2965_v58 = vsel %vm753_vm3, %v5588_v36, %v2541_v39 }
 0x459   :  { %v2994_v25 = vsel %vm821_vm7, %v2979_v38, %v2677_v3 }
 0x45e   :  { %v2787_v24 = vpop.permute.xlu1 %2786  ;;  %v2733_v29 = vpop.permute.xlu0 %2732 }
 0x45f   :  { %v2735_v27 = vpop.permute.xlu2 %2734  ;;  %v3010_v60 = vsel %vm6642_vm9, %v2994_v25, %v2733_v29  ;;  %v2141_v35 = vpop.f32.mrf.mxu1 }
 0x460   :  { %v3026_v59 = vsel %vm6649_vm8, %v3010_v60, %v2787_v24 }
 0x461   :  { %v3042_v23 = vsel %vm1653_vm10, %v3026_v59, %v2835_v17 }
 0x464   :  { %v2170_v46 = vpop.f32.mrf.mxu3 }
 0x465   :  { %v2171_v54 = vadd.f32 %v2170_v46, %v2141_v35 }
 0x466   :  { %v2925_v41 = vpop.permute.xlu1 %2924  ;;  %v2880_v42 = vpop.permute.xlu0 %2879 }
 0x467   :  { %v2179_v21 = vmul.f32 %v5516_v5, %v2171_v54  ;;  %v3058_v61 = vsel %vm6650_vm15, %v3042_v23, %v2880_v42  ;;  %v2882_v55 = vpop.permute.xlu2 %2881 }
 0x468   :  { %v3074_v2 = vsel %vm1671_vm6, %v3058_v61, %v2925_v41 }
 0x469   :  { %v2184_v1 = vadd.f32 %v5520_v6, %v2179_v21  ;;  %3736 = vmatmul.msk.f32.gmra.mxu2 %vm6651_vm4, %v3074_v2 }
 0x46b   :  { %v2188_v20 = vmax.f32 %v2184_v1, 0.0 }
 0x46d   :  { %v2196_v22 = vrot.slane %v2188_v20, 4  ;;  %v2202_v47 = vperm.slane %v2188_v20, 0  ;;  %v2258_v24 = vperm.slane %v2188_v20, 3  ;;  %v2218_v29 = vperm.slane %v2188_v20, 1 }
 0x46e   :  { %v2679_v30 = vpop.permute.xlu1 %2678  ;;  %v2632_v10 = vpop.permute.xlu0 %2631 }
 0x46f   :  { %v2203_v8 = vperm.slane %v2196_v22, 0  ;;  %v2980_v18 = vsel %vm787_vm5, %v2965_v58, %v2632_v10  ;;  %v2634_v0 = vpop.permute.xlu2 %2633  ;;  %v2259_v11 = vperm.slane %v2196_v22, 3  ;;  %v2239_v39 = vperm.slane %v2196_v22, 2 }
 0x470   :  { %v2995_v40 = vsel %vm821_vm7, %v2980_v18, %v2679_v30  ;;  %v2219_v62 = vperm.slane %v2196_v22, 1 }
 0x471   :  { %v2209_v48 = vsel %vm1168_vm11, %v2203_v8, %v2202_v47  ;;  %v3011_v43 = vsel %vm6642_vm9, %v2995_v40, %v2735_v27  ;;  %v2238_v27 = vperm.slane %v2188_v20, 2 }
 0x472   :  { %v2144_v34 = vpop.f32.mrf.mxu1  ;;  %v2225_v46 = vsel %vm1168_vm11, %v2219_v62, %v2218_v29 }
 0x473   :  { %v2245_v59 = vsel %vm1168_vm11, %v2239_v39, %v2238_v27 }
 0x476   :  { %v2837_v13 = vpop.permute.xlu1 %2836  ;;  %v2789_v3 = vpop.permute.xlu0 %2788 }
 0x477   :  { %v3027_v37 = vsel %vm6649_vm8, %v3011_v43, %v2789_v3  ;;  %v2791_v56 = vpop.permute.xlu2 %2790  ;;  %v2602_v3 = vrot.slane %v5805_v12, 2 }
 0x478   :  { %v3043_v17 = vsel %vm1653_vm10, %v3027_v37, %v2837_v13  ;;  %v2601_v13 = vrot.slane %v5802_v9, 2 }
 0x479   :  { %v2173_v45 = vpop.f32.mrf.mxu3  ;;  %v3059_v51 = vsel %vm6650_vm15, %v3043_v17, %v2882_v55 }
 0x47a   :  { %v2174_v14 = vadd.f32 %v2173_v45, %v2144_v34 }
 0x47c   :  { %v2180_v36 = vmul.f32 %v5516_v5, %v2174_v14 }
 0x47e   :  { %v2185_v52 = vadd.f32 %v5520_v6, %v2180_v36  ;;  %v2543_v44 = vpop.permute.xlu1 %2542  ;;  %v2927_v16 = vpop.permute.xlu0 %2926  ;;  %v2265_v6 = vsel %vm1168_vm11, %v2259_v11, %v2258_v24 }
 0x47f   :  { %v3075_v38 = vsel %vm1671_vm6, %v3059_v51, %v2927_v16  ;;  %v2966_v61 = vsel %vm753_vm3, %v5683_v53, %v2543_v44  ;;  %v2229_v8 = vpop.permute.xlu2 %2228 }
 0x480   :  { %v2189_v49 = vmax.f32 %v2185_v52, 0.0  ;;  %3737 = vmatmul.msk.f32.gmra.mxu2 %vm6651_vm4, %v3075_v38  ;;  %v2981_v53 = vsel %vm787_vm5, %v2966_v61, %v2634_v0  ;;  %v2603_v0 = vsel %vm2573_vm2, %v2601_v13, %v2602_v3 }
 0x482   :  { %v2197_v25 = vrot.slane %v2189_v49, 4  ;;  %v2260_v5 = vperm.slane %v2189_v49, 3  ;;  %v2240_v60 = vperm.slane %v2189_v49, 2  ;;  %v2220_v35 = vperm.slane %v2189_v49, 1 }
 0x483   :  { %v2204_v54 = vperm.slane %v2189_v49, 0  ;;  %v3150_v37 = vpop.f32.mrf.mxu2  ;;  %v2274_v49 = vsel %vm753_vm3, %v5664_v50, %v2229_v8 }
 0x484   :  { %v2261_v41 = vperm.slane %v2197_v25, 3  ;;  %v2266_v21 = vsel %vm1170_vm12, %v2260_v5, %v2265_v6  ;;  %v2241_v23 = vperm.slane %v2197_v25, 2  ;;  %v2246_v42 = vsel %vm1170_vm12, %v2240_v60, %v2245_v59 }
 0x485   :  { %v2221_v1 = vperm.slane %v2197_v25, 1  ;;  %v2226_v55 = vsel %vm1170_vm12, %v2220_v35, %v2225_v46  ;;  %v2210_v2 = vsel %vm1170_vm12, %v2204_v54, %v2209_v48  ;;  %v2205_v10 = vperm.slane %v2197_v25, 0  ;;  %v2389_v48 = vld [vmem:[%s6629_s5 + $0x48] sm:$0x3] }
 0x486   :  { %v2267_v20 = vsel %vm1172_vm13, %v2261_v41, %v2266_v21  ;;  %v2247_v22 = vsel %vm1172_vm13, %v2241_v23, %v2246_v42  ;;  %v2737_v30 = vpop.permute.xlu1 %2736  ;;  %v2681_v58 = vpop.permute.xlu0 %2680  ;;  %v5895_v43 = vperm.slane %v2389_v48, 0  ;;  %v5908_v12 = vperm.slane %v2389_v48, 1 }
 0x487   :  { %2270 = vrot.lane.b32.xlu1 %v2267_v20, %s3800_s26  ;;  %2250 = vrot.lane.b32.xlu0 %v2247_v22, %s3798_s22  ;;  %v2227_v47 = vsel %vm1172_vm13, %v2221_v1, %v2226_v55  ;;  %v5887_v18 = vsel %vm1172_vm13, %v2205_v10, %v2210_v2  ;;  %v2996_v40 = vsel %vm821_vm7, %v2981_v53, %v2681_v58  ;;  %v5914_v44 = vpop.permute.xlu2 %2928  ;;  %v2401_v55 = vrot.slane %v4969_v7, 7 }
 0x488   :  { %2230 = vrot.lane.b32.xlu2 %v2227_v47, %s3799_s23  ;;  %v3012_v34 = vsel %vm6642_vm9, %v2996_v40, %v2737_v30  ;;  %v3199_v36 = vmul.f32 %v5895_v43, %v3150_v37 }
 0x489   :  { %v3028_v14 = vsel %vm6649_vm8, %v3012_v34, %v2791_v56  ;;  %v5968_v22 = vsel %vm1366_vm14, 0.0, %v2401_v55  ;;  %v2450_v30 = vsel %vm1366_vm14, %v2401_v55, 0.0  ;;  %vm6652_vm8 = vcmask 31744  }
 0x48a   :  { %v3216_v16 = vadd.f32 %v5908_v12, %v3199_v36  ;;  %v2607_v7 = vrot.slane %v5968_v22, 2  ;;  %v2608_v8 = vrot.slane %v2450_v30, 2  ;;  %v2516_v47 = vrot.slane %v5968_v22, 1 }
 0x48b   :  { %v2517_v58 = vrot.slane %v2450_v30, 1 }
 0x48c   :  { %v5933_v24 = vmax.f32 %v3216_v16, 0.0  ;;  %v2609_v13 = vsel %vm2573_vm2, %v2607_v7, %v2608_v8 }
 0x48d   :  { %v2518_v3 = vsel %vm243_vm0, %v2516_v47, %v2517_v58 }
 0x48e   :  { %v5898_v45 = vpop.permute.xlu1 %2883  ;;  %v5906_v17 = vpop.permute.xlu0 %2838  ;;  %v3298_v59 = vrot.slane %v5933_v24, 1  ;;  %v3502_v21 = vrot.slane %v5933_v24, 7 }
 0x48f   :  { %2635 = vrot.lane.b32.xlu1 %v5824_v57, %s3798_s22  ;;  %2544 = vrot.lane.b32.xlu0 %v5795_v31, %s3799_s23  ;;  %v3044_v52 = vsel %vm1653_vm10, %v3028_v14, %v5906_v17  ;;  %v2400_v57 = vrot.slane %v4929_v28, 7  ;;  %v2402_v14 = vrot.slane %v5011_v63, 7 }
 0x490   :  { %2930 = vrot.lane.b32.xlu2 %v2603_v0, %s3807_s2  ;;  %v3060_v31 = vsel %vm6650_vm15, %v3044_v52, %v5898_v45  ;;  %vm6653_vm15 = vmmov %vm6652_vm8 }
 0x491   :  { %v3076_v56 = vsel %vm1671_vm6, %v3060_v31, %v5914_v44  ;;  %v5924_v51 = vsel %vm1366_vm14, 0.0, %v2400_v57  ;;  %v2449_v11 = vsel %vm1366_vm14, %v2400_v57, 0.0  ;;  %v5996_v36 = vsel %vm1366_vm14, 0.0, %v2402_v14 }
 0x492   :  { %3738 = vmatmul.msk.f32.gmra.mxu2 %vm6651_vm4, %v3076_v56  ;;  %v2604_v29 = vrot.slane %v5924_v51, 2  ;;  %v2605_v25 = vrot.slane %v2449_v11, 2  ;;  %v2513_v60 = vrot.slane %v5924_v51, 1  ;;  %v2514_v35 = vrot.slane %v2449_v11, 1 }
 0x493   :  { %v2451_v52 = vsel %vm1366_vm14, %v2402_v14, 0.0  ;;  %v2519_v31 = vrot.slane %v5996_v36, 1  ;;  %vm6641_vm4 = vcmask 1044484  }
 0x494   :  { %v2606_v46 = vsel %vm2573_vm2, %v2604_v29, %v2605_v25  ;;  %v2515_v54 = vsel %vm243_vm0, %v2513_v60, %v2514_v35  ;;  %v2520_v57 = vrot.slane %v2451_v52, 1  ;;  %v6031_v35 = vld [vmem:[%s6630_s6 + $0x8] sm:$0xff] }
 0x495   :  { %v3153_v39 = vpop.f32.mrf.mxu2 }
 0x496   :  { %v2269_v62 = vpop.permute.xlu1 %2268  ;;  %v3200_v28 = vmul.f32 %v5895_v43, %v3153_v39  ;;  %v2249_v38 = vpop.permute.xlu0 %2248  ;;  %v2521_v63 = vsel %vm243_vm0, %v2519_v31, %v2520_v57  ;;  %v6011_v39 = vld [vmem:[%s6630_s6] sm:$0xff]  ;;  %v2404_v57 = vrot.slane %v5059_v33, 7 }
 0x497   :  { %2794 = vrot.lane.b32.xlu1 %v2603_v0, %s3804_s0  ;;  %2740 = vrot.lane.b32.xlu0 %v5817_v4, %s3801_s29  ;;  %v2276_v27 = vsel %vm787_vm5, %v2274_v49, %v2249_v38  ;;  %v2610_v49 = vrot.slane %v5996_v36, 2 }
 0x498   :  { %2684 = vrot.lane.b32.xlu2 %v5802_v9, %s3800_s26  ;;  %v3217_v50 = vadd.f32 %v5908_v12, %v3200_v28  ;;  %v2278_v5 = vsel %vm821_vm7, %v2276_v27, %v2269_v62  ;;  %v2611_v28 = vrot.slane %v2451_v52, 2 }
 0x499   :  { %3721 = vmatpush.msk.msrb.mxu3 %vm921_vm1, %v2278_v5 }
 0x49a   :  { %v5943_v6 = vmax.f32 %v3217_v50, 0.0  ;;  %3722 = vmatmul.msk.f32.vlgmr.msrb.gmra.mxu3 %vm6652_vm8, %v6011_v39  ;;  %v2612_v60 = vsel %vm2573_vm2, %v2610_v49, %v2611_v28  ;;  %vm6654_vm8 = vcmask 326656   ;;  %v6077_v49 = vsel %vm1366_vm14, 0.0, %v2404_v57 }
 0x49b   :  { %v2616_v33 = vrot.slane %v6077_v49, 2 }
 0x49c   :  { %v3299_v41 = vsel %vm1168_vm11, %v5943_v6, %v3298_v59  ;;  %v3503_v23 = vrot.slane %v5943_v6, 6  ;;  %v3264_v42 = vrot.slane %v5943_v6, 7  ;;  %v2403_v59 = vrot.slane %v5025_v32, 7 }
 0x49e   :  { %v3504_v61 = vsel %vm1168_vm11, %v3503_v23, %v3502_v21  ;;  %v3265_v1 = vsel %vm1168_vm11, %v3264_v42, %v5933_v24  ;;  %v2739_v30 = vpop.permute.xlu1 %2738 }
 0x49f   :  { %2932 = vrot.lane.b32.xlu1 %v2606_v46, %s3807_s2  ;;  %2887 = vrot.lane.b32.xlu0 %v2515_v54, %s3806_s16 }
 0x4a0   :  { %2842 = vrot.lane.b32.xlu2 %v5924_v51, %s3805_s15 }
 0x4a2   :  { %3723 = vmatmul.msk.f32.gmra.mxu3 %vm6653_vm15, %v6031_v35  ;;  %vm6655_vm15 = vcmask 457728  }
 0x4a6   :  { %v2886_v14 = vpop.permute.xlu1 %2885 }
 0x4a7   :  { %2686 = vrot.lane.b32.xlu1 %v5924_v51, %s3800_s26  ;;  %2637 = vrot.lane.b32.xlu0 %v2603_v0, %s3798_s22 }
 0x4a8   :  { %2546 = vrot.lane.b32.xlu2 %v5817_v4, %s3799_s23 }
 0x4ac   :  { %v3156_v2 = vpop.f32.mrf.mxu2 }
 0x4ad   :  { %v3201_v20 = vmul.f32 %v5895_v43, %v3156_v2 }
 0x4af   :  { %2844 = vrot.lane.b32.xlu1 %v5968_v22, %s3805_s15  ;;  %2796 = vrot.lane.b32.xlu0 %v2606_v46, %s3804_s0  ;;  %v3218_v10 = vadd.f32 %v5908_v12, %v3201_v20 }
 0x4b0   :  { %2742 = vrot.lane.b32.xlu2 %v2515_v54, %s3801_s29 }
 0x4b1   :  { %v5976_v4 = vmax.f32 %v3218_v10, 0.0 }
 0x4b3   :  { %v3300_v53 = vrot.slane %v5976_v4, 7  ;;  %v3505_v48 = vrot.slane %v5976_v4, 5  ;;  %v3266_v40 = vrot.slane %v5976_v4, 6 }
 0x4b5   :  { %v3301_v34 = vsel %vm1170_vm12, %v3300_v53, %v3299_v41  ;;  %v3506_v37 = vsel %vm1170_vm12, %v3505_v48, %v3504_v61  ;;  %v3267_v0 = vsel %vm1170_vm12, %v3266_v40, %v3265_v1  ;;  %v2452_v41 = vsel %vm1366_vm14, %v2403_v59, 0.0  ;;  %v2793_v61 = vpop.permute.xlu2 %2792  ;;  %v2683_v1 = vpop.permute.xlu0 %2682 }
 0x4b6   :  { %v2614_v32 = vrot.slane %v2452_v41, 2  ;;  %v2523_v2 = vrot.slane %v2452_v41, 1  ;;  %v2997_v53 = vsel %vm821_vm7, %v5699_v26, %v2683_v1 }
 0x4b7   :  { %2548 = vrot.lane.b32.xlu1 %v2515_v54, %s3799_s23  ;;  %2934 = vrot.lane.b32.xlu0 %v2609_v13, %s3807_s2  ;;  %v6037_v54 = vsel %vm1366_vm14, 0.0, %v2403_v59 }
 0x4b8   :  { %2889 = vrot.lane.b32.xlu2 %v2518_v3, %s3806_s16  ;;  %v2613_v42 = vrot.slane %v6037_v54, 2  ;;  %v2522_v55 = vrot.slane %v6037_v54, 1 }
 0x4ba   :  { %v2615_v10 = vsel %vm2573_vm2, %v2613_v42, %v2614_v32  ;;  %v2524_v7 = vsel %vm243_vm0, %v2522_v55, %v2523_v2 }
 0x4bf   :  { %2744 = vrot.lane.b32.xlu1 %v2518_v3, %s3801_s29  ;;  %2688 = vrot.lane.b32.xlu0 %v5968_v22, %s3800_s26 }
 0x4c0   :  { %2639 = vrot.lane.b32.xlu2 %v2606_v46, %s3798_s22 }
 0x4c3   :  { %v3159_v56 = vpop.f32.mrf.mxu2 }
 0x4c4   :  { %v3202_v16 = vmul.f32 %v5895_v43, %v3159_v56 }
 0x4c6   :  { %v3219_v11 = vadd.f32 %v5908_v12, %v3202_v16 }
 0x4c7   :  { %2891 = vrot.lane.b32.xlu1 %v2521_v63, %s3806_s16  ;;  %2846 = vrot.lane.b32.xlu0 %v5996_v36, %s3805_s15 }
 0x4c8   :  { %2798 = vrot.lane.b32.xlu2 %v2609_v13, %s3804_s0  ;;  %v6013_v62 = vmax.f32 %v3219_v11, 0.0 }
 0x4ca   :  { %v3302_v38 = vrot.slane %v6013_v62, 6  ;;  %v3507_v27 = vrot.slane %v6013_v62, 4  ;;  %v3268_v29 = vrot.slane %v6013_v62, 5 }
 0x4cc   :  { %v3303_v25 = vsel %vm1172_vm13, %v3302_v38, %v3301_v34  ;;  %v3508_v50 = vsel %vm1172_vm13, %v3507_v27, %v3506_v37  ;;  %v3269_v5 = vsel %vm1172_vm13, %v3268_v29, %v3267_v0  ;;  %v3013_v34 = vsel %vm6642_vm9, %v2997_v53, %v2739_v30  ;;  %v2841_v37 = vpop.permute.xlu0 %2840 }
 0x4cd   :  { %v3029_v0 = vsel %vm6654_vm8, %v3013_v34, %v2793_v61  ;;  %vm6657_vm8 = vcmask 31744  }
 0x4ce   :  { %v3045_v52 = vsel %vm1653_vm10, %v3029_v0, %v2841_v37 }
 0x4cf   :  { %2641 = vrot.lane.b32.xlu1 %v2609_v13, %s3798_s22  ;;  %2550 = vrot.lane.b32.xlu0 %v2518_v3, %s3799_s23  ;;  %v3061_v31 = vsel %vm6655_vm15, %v3045_v52, %v2886_v14  ;;  %vm6659_vm15 = vcmask 326656  }
 0x4d0   :  { %2936 = vrot.lane.b32.xlu2 %v2612_v60, %s3807_s2 }
 0x4d5   :  { %v3162_v46 = vpop.f32.mrf.mxu2 }
 0x4d6   :  { %v3203_v21 = vmul.f32 %v5895_v43, %v3162_v46 }
 0x4d7   :  { %2800 = vrot.lane.b32.xlu1 %v2612_v60, %s3804_s0  ;;  %2746 = vrot.lane.b32.xlu0 %v2521_v63, %s3801_s29 }
 0x4d8   :  { %2690 = vrot.lane.b32.xlu2 %v5996_v36, %s3800_s26  ;;  %v3220_v23 = vadd.f32 %v5908_v12, %v3203_v21 }
 0x4da   :  { %v6048_v20 = vmax.f32 %v3220_v23, 0.0 }
 0x4dc   :  { %v3304_v8 = vrot.slane %v6048_v20, 5  ;;  %v3509_v47 = vrot.slane %v6048_v20, 3  ;;  %v3270_v58 = vrot.slane %v6048_v20, 4 }
 0x4de   :  { %v3305_v48 = vsel %vm6641_vm4, %v3304_v8, %v3303_v25  ;;  %v3510_v40 = vsel %vm6641_vm4, %v3509_v47, %v3508_v50  ;;  %v3272_v13 = vsel %vm6641_vm4, %v3270_v58, %v3269_v5  ;;  %vm6656_vm4 = vcmask 588800  }
 0x4df   :  { %2938 = vrot.lane.b32.xlu1 %v2615_v10, %s3807_s2  ;;  %2893 = vrot.lane.b32.xlu0 %v2524_v7, %s3806_s16  ;;  %v2525_v25 = vrot.slane %v6077_v49, 1  ;;  %v2405_v47 = vrot.slane %v5085_v19, 7 }
 0x4e0   :  { %2848 = vrot.lane.b32.xlu2 %v6037_v54, %s3805_s15 }
 0x4e1   :  { %v2454_v19 = vsel %vm1366_vm14, %v2405_v47, 0.0 }
 0x4e2   :  { %v2231_v3 = vpop.permute.xlu2 %2230  ;;  %v2774_v52 = vrot.slane %v2454_v19, 2 }
 0x4e3   :  { %v2275_v32 = vsel %vm753_vm3, %v5887_v18, %v2231_v3 }
 0x4e7   :  { %2692 = vrot.lane.b32.xlu1 %v6037_v54, %s3800_s26  ;;  %2643 = vrot.lane.b32.xlu0 %v2612_v60, %s3798_s22 }
 0x4e8   :  { %2552 = vrot.lane.b32.xlu2 %v2521_v63, %s3799_s23  ;;  %v2453_v63 = vsel %vm1366_vm14, %v2404_v57, 0.0  ;;  %v2720_v57 = vrot.slane %v2454_v19, 1  ;;  %v3336_v19 = vrot.slane %v6013_v62, 7 }
 0x4e9   :  { %v2617_v29 = vrot.slane %v2453_v63, 2  ;;  %v2526_v50 = vrot.slane %v2453_v63, 1 }
 0x4ea   :  { %v2931_v26 = vpop.permute.xlu2 %2930 }
 0x4eb   :  { %v3077_v56 = vsel %vm1671_vm6, %v3061_v31, %v2931_v26  ;;  %v2618_v46 = vsel %vm2573_vm2, %v2616_v33, %v2617_v29  ;;  %v2527_v41 = vsel %vm243_vm0, %v2525_v25, %v2526_v50  ;;  %v3401_v25 = vrot.slane %v5943_v6, 3 }
 0x4ec   :  { %3739 = vmatmul.msk.f32.gmra.mxu2 %vm6656_vm4, %v3077_v56  ;;  %v3165_v16 = vpop.f32.mrf.mxu2  ;;  %vm3274_vm4 = vcmask 1045509   ;;  %v3367_v50 = vrot.slane %v5943_v6, 2 }
 0x4ed   :  { %v3204_v11 = vmul.f32 %v5895_v43, %v3165_v16 }
 0x4ef   :  { %2850 = vrot.lane.b32.xlu1 %v6077_v49, %s3805_s15  ;;  %2802 = vrot.lane.b32.xlu0 %v2615_v10, %s3804_s0  ;;  %v3221_v28 = vadd.f32 %v5908_v12, %v3204_v11 }
 0x4f0   :  { %2748 = vrot.lane.b32.xlu2 %v2524_v7, %s3801_s29 }
 0x4f1   :  { %v6086_v38 = vmax.f32 %v3221_v28, 0.0 }
 0x4f2   :  { %v2685_v27 = vpop.permute.xlu2 %2684 }
 0x4f3   :  { %v3306_v5 = vrot.slane %v6086_v38, 4  ;;  %v3511_v60 = vrot.slane %v6086_v38, 2  ;;  %v3273_v59 = vrot.slane %v6086_v38, 3 }
 0x4f5   :  { %v3307_v21 = vsel %vm3274_vm4, %v3306_v5, %v3305_v48  ;;  %v3512_v23 = vsel %vm3274_vm4, %v3511_v60, %v3510_v40  ;;  %v3275_v42 = vsel %vm3274_vm4, %v3273_v59, %v3272_v13  ;;  %v6119_v40 = vsel %vm1366_vm14, 0.0, %v2405_v47 }
 0x4f6   :  { %v2773_v37 = vrot.slane %v6119_v40, 2  ;;  %v2719_v26 = vrot.slane %v6119_v40, 1  ;;  %vm3277_vm14 = vcmask 1046534   ;;  %v3333_v5 = vrot.slane %v5943_v6, 1 }
 0x4f7   :  { %2554 = vrot.lane.b32.xlu1 %v2524_v7, %s3799_s23  ;;  %2940 = vrot.lane.b32.xlu0 %v2618_v46, %s3807_s2 }
 0x4f8   :  { %2895 = vrot.lane.b32.xlu2 %v2527_v41, %s3806_s16  ;;  %v2775_v63 = vsel %vm2573_vm2, %v2773_v37, %v2774_v52  ;;  %vm6660_vm2 = vcmask 457728   ;;  %v3338_v52 = vrot.slane %v6048_v20, 6 }
 0x4f9   :  { %v2271_v61 = vpop.permute.xlu1 %2270  ;;  %v2251_v1 = vpop.permute.xlu0 %2250 }
 0x4fa   :  { %v2843_v55 = vpop.permute.xlu2 %2842  ;;  %v2277_v2 = vsel %vm787_vm5, %v2275_v32, %v2251_v1  ;;  %v3369_v1 = vrot.slane %v5976_v4, 1 }
 0x4fb   :  { %v2279_v30 = vsel %vm821_vm7, %v2277_v2, %v2271_v61  ;;  %v3332_v2 = vrot.slane %v5933_v24, 2 }
 0x4fc   :  { %3724 = vmatpush.msk.msra.mxu1 %vm921_vm1, %v2279_v30  ;;  %vm6658_vm1 = vmmov %vm6657_vm8  ;;  %v3468_v30 = vrot.slane %v5933_v24, 6 }
 0x4fd   :  { %3725 = vmatmul.msk.f32.vlgmr.msra.gmra.mxu1 %vm6657_vm8, %v6011_v39  ;;  %vm6661_vm8 = vcmask 588800  }
 0x4ff   :  { %2647 = vrot.lane.b32.xlu1 %v2618_v46, %s3798_s22  ;;  %2645 = vrot.lane.b32.xlu0 %v2615_v10, %s3798_s22 }
 0x500   :  { %2556 = vrot.lane.b32.xlu2 %v2527_v41, %s3799_s23 }
 0x501   :  { %v2636_v7 = vpop.permute.xlu1 %2635  ;;  %v2545_v18 = vpop.permute.xlu0 %2544 }
 0x502   :  { %v6110_v8 = vpop.permute.xlu2 %2546  ;;  %v2967_v58 = vsel %vm753_vm3, %v5784_v15, %v2545_v18  ;;  %v3434_v18 = vrot.slane %v5933_v24, 5 }
 0x503   :  { %v3168_v53 = vpop.f32.mrf.mxu2  ;;  %v2982_v10 = vsel %vm787_vm5, %v2967_v58, %v2636_v7  ;;  %v3403_v7 = vrot.slane %v5976_v4, 2 }
 0x504   :  { %v3205_v48 = vmul.f32 %v5895_v43, %v3168_v53  ;;  %v2998_v14 = vsel %vm821_vm7, %v2982_v10, %v2685_v27  ;;  %v2721_v27 = vsel %vm243_vm0, %v2719_v26, %v2720_v57  ;;  %v3334_v53 = vsel %vm1168_vm11, %v3333_v5, %v3332_v2 }
 0x505   :  { %3726 = vmatmul.msk.f32.gmra.mxu1 %vm6658_vm1, %v6031_v35  ;;  %v3405_v10 = vrot.slane %v6013_v62, 1  ;;  %v3437_v26 = vrot.slane %v5976_v4, 3  ;;  %vm6662_vm1 = vcmask 1044484   ;;  %v2968_v2 = vsel %vm753_vm3, %v5802_v9, %v6110_v8 }
 0x506   :  { %v3222_v13 = vadd.f32 %v5908_v12, %v3205_v48  ;;  %v3435_v48 = vrot.slane %v5943_v6, 4 }
 0x507   :  { %2750 = vrot.lane.b32.xlu1 %v2527_v41, %s3801_s29  ;;  %2696 = vrot.lane.b32.xlu0 %v6119_v40, %s3800_s26 }
 0x508   :  { %2694 = vrot.lane.b32.xlu2 %v6077_v49, %s3800_s26  ;;  %v6129_v15 = vmax.f32 %v3222_v13, 0.0  ;;  %v3335_v13 = vsel %vm1170_vm12, %v5976_v4, %v3334_v53 }
 0x509   :  { %v2795_v3 = vpop.permute.xlu1 %2794  ;;  %v2741_v34 = vpop.permute.xlu0 %2740 }
 0x50a   :  { %v6132_v0 = vpop.permute.xlu2 %2742  ;;  %v3014_v31 = vsel %vm6642_vm9, %v2998_v14, %v2741_v34  ;;  %v3308_v56 = vrot.slane %v6129_v15, 3  ;;  %v3513_v16 = vrot.slane %v6129_v15, 1  ;;  %v3276_v33 = vrot.slane %v6129_v15, 2 }
 0x50b   :  { %v3030_v11 = vsel %vm6659_vm15, %v3014_v31, %v2795_v3  ;;  %v3471_v3 = vrot.slane %v5976_v4, 4  ;;  %v3372_v14 = vrot.slane %v6048_v20, 7  ;;  %vm6663_vm15 = vmmov %vm6662_vm1 }
 0x50c   :  { %v6142_v28 = vsel %vm3277_vm14, %v3308_v56, %v3307_v21  ;;  %v6149_v29 = vsel %vm3277_vm14, %v3513_v16, %v3512_v23  ;;  %v6156_v60 = vsel %vm3277_vm14, %v3276_v33, %v3275_v42  ;;  %v3046_v41 = vsel %vm1653_vm10, %v3030_v11, %v2843_v55 }
 0x50d   :  { %v3400_v21 = vrot.slane %v5933_v24, 4  ;;  %v3366_v23 = vrot.slane %v5933_v24, 3  ;;  %v3469_v55 = vrot.slane %v5943_v6, 5  ;;  %v3408_v56 = vrot.slane %v6086_v38, 7 }
 0x50e   :  { %v3410_v11 = vrot.slane %v6129_v15, 6  ;;  %v3374_v33 = vrot.slane %v6086_v38, 6  ;;  %v3444_v6 = vrot.slane %v6129_v15, 7 }
 0x50f   :  { %2806 = vrot.lane.b32.xlu1 %v2775_v63, %s3804_s0  ;;  %2804 = vrot.lane.b32.xlu0 %v2618_v46, %s3804_s0  ;;  %v3402_v47 = vsel %vm1168_vm11, %v3401_v25, %v3400_v21  ;;  %v3368_v58 = vsel %vm1168_vm11, %v3367_v50, %v3366_v23 }
 0x510   :  { %2752 = vrot.lane.b32.xlu2 %v2721_v27, %s3801_s29  ;;  %v3370_v37 = vsel %vm1170_vm12, %v3369_v1, %v3368_v58  ;;  %v3404_v57 = vsel %vm1170_vm12, %v3403_v7, %v3402_v47  ;;  %v3342_v1 = vrot.slane %v6129_v15, 4 }
 0x511   :  { %v2933_v59 = vpop.permute.xlu1 %2932  ;;  %v2888_v46 = vpop.permute.xlu0 %2887  ;;  %v3371_v16 = vsel %vm1172_vm13, %v6013_v62, %v3370_v37 }
 0x512   :  { %v6161_v32 = vpop.permute.xlu2 %2889  ;;  %v3062_v61 = vsel %vm6660_vm2, %v3046_v41, %v2888_v46  ;;  %v3376_v41 = vrot.slane %v6129_v15, 5  ;;  %v3337_v46 = vsel %vm1172_vm13, %v3336_v19, %v3335_v13  ;;  %v3373_v23 = vsel %vm6663_vm15, %v3372_v14, %v3371_v16  ;;  %vm6664_vm2 = vmmov %vm6662_vm1 }
 0x513   :  { %v3078_v42 = vsel %vm1671_vm6, %v3062_v61, %v2933_v59  ;;  %v3406_v59 = vsel %vm1172_vm13, %v3405_v10, %v3404_v57  ;;  %v3339_v61 = vsel %vm6664_vm2, %v3338_v52, %v3337_v46  ;;  %v3375_v53 = vsel %vm3274_vm4, %v3374_v33, %v3373_v23  ;;  %vm6666_vm15 = vmmov %vm6664_vm2 }
 0x514   :  { %3740 = vmatmul.msk.f32.gmra.mxu2 %vm6661_vm8, %v3078_v42  ;;  %vm3280_vm8 = vcmask 1047559   ;;  %v3377_v19 = vsel %vm3277_vm14, %v3376_v41, %v3375_v53  ;;  %v3439_v33 = vrot.slane %v6013_v62, 2 }
 0x515   :  { %v3171_v34 = vpop.f32.mrf.mxu2 }
 0x516   :  { %v3206_v31 = vmul.f32 %v5895_v43, %v3171_v34 }
 0x517   :  { %2942 = vrot.lane.b32.xlu1 %v2775_v63, %s3807_s2  ;;  %2897 = vrot.lane.b32.xlu0 %v2721_v27, %s3806_s16  ;;  %v3340_v63 = vrot.slane %v6086_v38, 5  ;;  %v3473_v27 = vrot.slane %v6013_v62, 3  ;;  %v3477_v62 = vrot.slane %v6086_v38, 1 }
 0x518   :  { %2852 = vrot.lane.b32.xlu2 %v6119_v40, %s3805_s15  ;;  %v3223_v25 = vadd.f32 %v5908_v12, %v3206_v31  ;;  %v3407_v40 = vsel %vm6662_vm1, %v6048_v20, %v3406_v59  ;;  %vm6665_vm1 = vcmask 326656  }
 0x519   :  { %v2687_v50 = vpop.permute.xlu1 %2686  ;;  %v2638_v5 = vpop.permute.xlu0 %2637  ;;  %v3409_v7 = vsel %vm3274_vm4, %v3408_v56, %v3407_v40  ;;  %v3341_v10 = vsel %vm3274_vm4, %v3340_v63, %v3339_v61 }
 0x51a   :  { %v6202_v21 = vpop.permute.xlu2 %2639  ;;  %v3239_v42 = vmax.f32 %v3223_v25, 0.0  ;;  %v2983_v47 = vsel %vm787_vm5, %v2968_v2, %v2638_v5  ;;  %v3411_v58 = vsel %vm3277_vm14, %v3410_v11, %v3409_v7  ;;  %v3343_v14 = vsel %vm3277_vm14, %v3342_v1, %v3341_v10 }
 0x51b   :  { %v2999_v31 = vsel %vm821_vm7, %v2983_v47, %v2687_v50  ;;  %v3475_v11 = vrot.slane %v6048_v20, 2  ;;  %v3470_v5 = vsel %vm1168_vm11, %v3469_v55, %v3468_v30 }
 0x51c   :  { %v3412_v13 = vrot.slane %v3239_v42, 5  ;;  %v3378_v34 = vrot.slane %v3239_v42, 4  ;;  %v3344_v37 = vrot.slane %v3239_v42, 3  ;;  %v3310_v9 = vrot.slane %v3239_v42, 2 }
 0x51d   :  { %v6221_v8 = vsel %vm3280_vm8, %v3239_v42, %v6149_v29  ;;  %v3279_v52 = vrot.slane %v3239_v42, 1  ;;  %v3015_v59 = vsel %vm6642_vm9, %v2999_v31, %v6132_v0  ;;  %v3472_v41 = vsel %vm1170_vm12, %v3471_v3, %v3470_v5 }
 0x51e   :  { %v3413_v57 = vsel %vm3280_vm8, %v3412_v13, %v3411_v58  ;;  %v3379_v56 = vsel %vm3280_vm8, %v3378_v34, %v3377_v19  ;;  %v3345_v16 = vsel %vm3280_vm8, %v3344_v37, %v3343_v14  ;;  %v6233_v29 = vsel %vm3280_vm8, %v3310_v9, %v6142_v28 }
 0x51f   :  { %3394 = vrot.lane.b32.xlu1 %v3379_v56, %s3795_s11  ;;  %v6237_v63 = vsel %vm3280_vm8, %v3279_v52, %v6156_v60  ;;  %3360 = vrot.lane.b32.xlu0 %v3345_v16, %s3799_s23  ;;  %v3436_v28 = vsel %vm1168_vm11, %v3435_v48, %v3434_v18  ;;  %v3441_v60 = vrot.slane %v6048_v20, 1  ;;  %v3474_v55 = vsel %vm1172_vm13, %v3473_v27, %v3472_v41  ;;  %v34_v56 = vld [vmem:[%s6631_s7 + $0x18] sm:$0xff]  ;;  %v33_v16 = vld [vmem:[%s6631_s7 + $0x10] sm:$0xff] }
 0x520   :  { %3428 = vrot.lane.b32.xlu2 %v3413_v57, %s3798_s22  ;;  %v3438_v46 = vsel %vm1170_vm12, %v3437_v26, %v3436_v28  ;;  %v3480_v24 = vrot.slane %v3239_v42, 7  ;;  %v3476_v18 = vsel %vm6666_vm15, %v3475_v11, %v3474_v55  ;;  %v3446_v48 = vrot.slane %v3239_v42, 6  ;;  %2363 = vmatpush.msra.mxu3 %v34_v56  ;;  %v31_v28 = vld [vmem:[%s6631_s7] sm:$0xff]  ;;  %v3788_v55 = vld [vmem:[%s6629_s5 + $0x30] sm:$0xff] }
 0x521   :  { %v2845_v25 = vpop.permute.xlu1 %2844  ;;  %v2797_v50 = vpop.permute.xlu0 %2796  ;;  %v3440_v20 = vsel %vm1172_vm13, %v3439_v33, %v3438_v46  ;;  %v3478_v0 = vsel %vm3274_vm4, %v3477_v62, %v3476_v18  ;;  %vm6668_vm15 = vcmask 588800   ;;  %v32_v33 = vld [vmem:[%s6631_s7 + $0x8] sm:$0xff]  ;;  %v3786_v41 = vld [vmem:[%s6629_s5 + $0x40] sm:$0xff] }
 0x522   :  { %v3031_v30 = vsel %vm6665_vm1, %v3015_v59, %v2797_v50  ;;  %v2799_v40 = vpop.permute.xlu2 %2798  ;;  %v3442_v4 = vsel %vm6664_vm2, %v3441_v60, %v3440_v20  ;;  %v3479_v26 = vsel %vm3277_vm14, %v6129_v15, %v3478_v0  ;;  %vm6667_vm1 = vcmask 457728   ;;  %2364 = vmatpush.msra.mxu3 %v33_v16  ;;  %v2306_v59 = vpop.f32.mrf.mxu3  ;;  %v3789_v20 = vld [vmem:[%s6629_s5 + $0x28] sm:$0xff] }
 0x523   :  { %v3047_v3 = vsel %vm1653_vm10, %v3031_v30, %v2845_v25  ;;  %v3443_v27 = vsel %vm3274_vm4, %v6086_v38, %v3442_v4  ;;  %v3481_v23 = vsel %vm3280_vm8, %v3480_v24, %v3479_v26  ;;  %vm6669_vm2 = vcmask 326656   ;;  %v3787_v30 = vld [vmem:[%s6629_s5 + $0x38] sm:$0xff]  ;;  %v3790_v4 = vld [vmem:[%s6629_s5 + $0x20] sm:$0xff] }
 0x524   :  { %v3445_v61 = vsel %vm3277_vm14, %v3444_v6, %v3443_v27  ;;  %v3063_v7 = vsel %vm6667_vm1, %v3047_v3, %v6161_v32  ;;  %2365 = vmatpush.msra.mxu3 %v32_v33  ;;  %v3791_v26 = vld [vmem:[%s6629_s5 + $0x18] sm:$0xff]  ;;  %v3792_v27 = vld [vmem:[%s6629_s5 + $0x10] sm:$0xff] }
 0x525   :  { %v3447_v1 = vsel %vm3280_vm8, %v3446_v48, %v3445_v61 }
 0x526   :  { %2366 = vmatpush.msra.mxu3 %v31_v28 }
 0x527   :  { %3496 = vrot.lane.b32.xlu1 %v3481_v23, %s3800_s26  ;;  %3462 = vrot.lane.b32.xlu0 %v3447_v1, %s3797_s17  ;;  %v3793_v1 = vld [vmem:[%s6629_s5 + $0x8] sm:$0xff] }
 0x528   :  { %3755 = vmatpush.msrb.mxu3 %v3786_v41 }
 0x529   :  { %v2549_v2 = vpop.permute.xlu1 %2548  ;;  %v2935_v42 = vpop.permute.xlu0 %2934  ;;  %3727 = vmatmul.msk.f32.vlgmr.msra.gmra.mxu3 %vm6642_vm9, %v2306_v59 }
 0x52a   :  { %v3079_v15 = vsel %vm1671_vm6, %v3063_v7, %v2935_v42  ;;  %v2937_v38 = vpop.permute.xlu2 %2936  ;;  %v2969_v47 = vsel %vm753_vm3, %v5924_v51, %v2549_v2  ;;  %3756 = vmatpush.msrb.mxu3 %v3787_v30  ;;  %v2309_v0 = vpop.f32.mrf.mxu3  ;;  %v3794_v7 = vld [vmem:[%s6629_s5] sm:$0xff]  ;;  %s3811_s5 = smov 124  }
 0x52b   :  { %3741 = vmatmul.msk.f32.gmra.mxu2 %vm6668_vm15, %v3079_v15  ;;  %v2984_v10 = vsel %vm787_vm5, %v2969_v47, %v6202_v21 }
 0x52c   :  { %3757 = vmatpush.msrb.mxu3 %v3788_v55 }
 0x52e   :  { %3758 = vmatpush.msrb.mxu3 %v3789_v20 }
 0x52f   :  { %3550 = vrot.lane.b32.xlu0 %v6011_v39, %s3811_s5  ;;  %3552 = vrot.lane.b32.xlu1 %v6031_v35, %s3811_s5 }
 0x530   :  { %3759 = vmatpush.msrb.mxu3 %v3790_v4 }
 0x531   :  { %v2745_v58 = vpop.permute.xlu1 %2744  ;;  %v2689_v53 = vpop.permute.xlu0 %2688  ;;  %3728 = vmatmul.msk.f32.gmra.mxu3 %vm6642_vm9, %v2309_v0 }
 0x532   :  { %v3000_v13 = vsel %vm821_vm7, %v2984_v10, %v2689_v53  ;;  %v2691_v34 = vpop.permute.xlu2 %2690  ;;  %3760 = vmatpush.msrb.mxu3 %v3791_v26 }
 0x533   :  { %v3016_v19 = vsel %vm6642_vm9, %v3000_v13, %v2745_v58 }
 0x534   :  { %v3032_v32 = vsel %vm6669_vm2, %v3016_v19, %v2799_v40  ;;  %3761 = vmatpush.msrb.mxu3 %v3792_v27 }
 0x536   :  { %3762 = vmatpush.msrb.mxu3 %v3793_v1 }
 0x538   :  { %3763 = vmatpush.msrb.mxu3 %v3794_v7 }
 0x539   :  { %v2892_v37 = vpop.permute.xlu1 %2891  ;;  %v2847_v14 = vpop.permute.xlu0 %2846 }
 0x53a   :  { %v3048_v9 = vsel %vm1653_vm10, %v3032_v32, %v2847_v14  ;;  %v2849_v21 = vpop.permute.xlu2 %2848 }
 0x53b   :  { %v3064_v52 = vsel %vm6667_vm1, %v3048_v9, %v2892_v37 }
 0x53c   :  { %v3080_v51 = vsel %vm1671_vm6, %v3064_v52, %v2937_v38 }
 0x53d   :  { %3742 = vmatmul.msk.f32.gmra.mxu2 %vm6668_vm15, %v3080_v51 }
 0x541   :  { %v2642_v31 = vpop.permute.xlu1 %2641  ;;  %v2551_v57 = vpop.permute.xlu0 %2550 }
 0x542   :  { %v2970_v11 = vsel %vm753_vm3, %v5968_v22, %v2551_v57  ;;  %v2553_v22 = vpop.permute.xlu2 %2552 }
 0x543   :  { %v2985_v25 = vsel %vm787_vm5, %v2970_v11, %v2642_v31  ;;  %v2971_v2 = vsel %vm753_vm3, %v5996_v36, %v2553_v22 }
 0x544   :  { %v3001_v62 = vsel %vm821_vm7, %v2985_v25, %v2691_v34 }
 0x549   :  { %v2801_v50 = vpop.permute.xlu1 %2800  ;;  %v2747_v5 = vpop.permute.xlu0 %2746 }
 0x54a   :  { %v3017_v60 = vsel %vm6642_vm9, %v3001_v62, %v2747_v5  ;;  %v2749_v3 = vpop.permute.xlu2 %2748 }
 0x54b   :  { %v3033_v46 = vsel %vm6669_vm2, %v3017_v60, %v2801_v50 }
 0x54c   :  { %v3049_v6 = vsel %vm1653_vm10, %v3033_v46, %v2849_v21 }
 0x551   :  { %v2939_v24 = vpop.permute.xlu1 %2938  ;;  %v2894_v40 = vpop.permute.xlu0 %2893 }
 0x552   :  { %v3065_v18 = vsel %vm6667_vm1, %v3049_v6, %v2894_v40  ;;  %v2896_v38 = vpop.permute.xlu2 %2895 }
 0x553   :  { %v3081_v48 = vsel %vm1671_vm6, %v3065_v18, %v2939_v24 }
 0x554   :  { %3743 = vmatmul.msk.f32.gmra.mxu2 %vm6668_vm15, %v3081_v48 }
 0x559   :  { %v2693_v23 = vpop.permute.xlu1 %2692  ;;  %v2644_v61 = vpop.permute.xlu0 %2643 }
 0x55a   :  { %v2986_v42 = vsel %vm787_vm5, %v2971_v2, %v2644_v61  ;;  %v2557_v37 = vpop.permute.xlu2 %2556 }
 0x55b   :  { %v3002_v15 = vsel %vm821_vm7, %v2986_v42, %v2693_v23  ;;  %v2973_v21 = vsel %vm753_vm3, %v6077_v49, %v2557_v37 }
 0x55c   :  { %v3018_v53 = vsel %vm6642_vm9, %v3002_v15, %v2749_v3 }
 0x561   :  { %v2851_v47 = vpop.permute.xlu1 %2850  ;;  %v2803_v58 = vpop.permute.xlu0 %2802 }
 0x562   :  { %v3034_v10 = vsel %vm6669_vm2, %v3018_v53, %v2803_v58  ;;  %v2695_v52 = vpop.permute.xlu2 %2694 }
 0x563   :  { %v3050_v13 = vsel %vm1653_vm10, %v3034_v10, %v2851_v47 }
 0x564   :  { %v3066_v34 = vsel %vm6667_vm1, %v3050_v13, %v2896_v38  ;;  %vm6670_vm1 = vmmov %vm6669_vm2 }
 0x569   :  { %v2555_v19 = vpop.permute.xlu1 %2554  ;;  %v2941_v36 = vpop.permute.xlu0 %2940 }
 0x56a   :  { %v3082_v32 = vsel %vm1671_vm6, %v3066_v34, %v2941_v36  ;;  %v2753_v16 = vpop.permute.xlu2 %2752  ;;  %v2972_v33 = vsel %vm753_vm3, %v6037_v54, %v2555_v19 }
 0x56b   :  { %3744 = vmatmul.msk.f32.gmra.mxu2 %vm6668_vm15, %v3082_v32  ;;  %vm6671_vm15 = vcmask 457728  }
 0x571   :  { %v2648_v14 = vpop.permute.xlu1 %2647  ;;  %v2646_v9 = vpop.permute.xlu0 %2645 }
 0x572   :  { %v2988_v56 = vsel %vm787_vm5, %v2973_v21, %v2648_v14  ;;  %v2987_v25 = vsel %vm787_vm5, %v2972_v33, %v2646_v9  ;;  %v2853_v46 = vpop.permute.xlu2 %2852 }
 0x573   :  { %v3003_v49 = vsel %vm821_vm7, %v2987_v25, %v2695_v52 }
 0x579   :  { %v2751_v51 = vpop.permute.xlu1 %2750  ;;  %v2697_v31 = vpop.permute.xlu0 %2696 }
 0x57a   :  { %v2332_v57 = vpop.f32.mrf.mxu1  ;;  %v3004_v11 = vsel %vm821_vm7, %v2988_v56, %v2697_v31  ;;  %v3019_v59 = vsel %vm6642_vm9, %v3003_v49, %v2751_v51 }
 0x57b   :  { %3729 = vmatmul.msk.f32.gmra.mxu3 %vm6642_vm9, %v2332_v57  ;;  %v3020_v5 = vsel %vm6642_vm9, %v3004_v11, %v2753_v16 }
 0x581   :  { %v2807_v50 = vpop.permute.xlu1 %2806  ;;  %v2805_v62 = vpop.permute.xlu0 %2804 }
 0x582   :  { %v3036_v28 = vsel %vm6669_vm2, %v3020_v5, %v2807_v50  ;;  %v2335_v60 = vpop.f32.mrf.mxu1  ;;  %v3035_v54 = vsel %vm6670_vm1, %v3019_v59, %v2805_v62  ;;  %vm6672_vm2 = vmmov %vm6671_vm15 }
 0x583   :  { %3730 = vmatmul.msk.f32.gmra.mxu3 %vm6642_vm9, %v2335_v60  ;;  %v3052_v22 = vsel %vm1653_vm10, %v3036_v28, %v5906_v17  ;;  %v3051_v55 = vsel %vm1653_vm10, %v3035_v54, %v2853_v46  ;;  %vm6673_vm9 = vcmask 588800  }
 0x584   :  { %v3068_v41 = vsel %vm6671_vm15, %v3052_v22, %v5898_v45  ;;  %vm6674_vm1 = vmmov %vm6673_vm9  ;;  %v3174_v45 = vpop.f32.mrf.mxu2 }
 0x585   :  { %v3084_v17 = vsel %vm1671_vm6, %v3068_v41, %v5914_v44  ;;  %v3207_v39 = vmul.f32 %v5895_v43, %v3174_v45 }
 0x587   :  { %v3224_v48 = vadd.f32 %v5908_v12, %v3207_v39 }
 0x589   :  { %v2943_v30 = vpop.permute.xlu1 %2942  ;;  %v2898_v24 = vpop.permute.xlu0 %2897  ;;  %v6384_v4 = vmax.f32 %v3224_v48, 0.0 }
 0x58a   :  { %v3067_v6 = vsel %vm6672_vm2, %v3051_v55, %v2898_v24 }
 0x58b   :  { %3746 = vmatmul.msk.f32.vlgmr.msrb.gmra.mxu3 %vm6673_vm9, %v3084_v17  ;;  %v3083_v40 = vsel %vm1671_vm6, %v3067_v6, %v2943_v30  ;;  %vm6675_vm6 = vcmask 1044484   ;;  %v3414_v50 = vrot.slane %v6384_v4, 4  ;;  %v3380_v62 = vrot.slane %v6384_v4, 3 }
 0x58c   :  { %3745 = vmatmul.msk.f32.gmra.mxu2 %vm6674_vm1, %v3083_v40  ;;  %v3312_v28 = vrot.slane %v6384_v4, 1  ;;  %v3516_v22 = vrot.slane %v6384_v4, 7  ;;  %v3482_v59 = vrot.slane %v6384_v4, 6  ;;  %vm6676_vm9 = vmmov %vm6675_vm6 }
 0x58d   :  { %vm6677_vm15 = vmmov %vm6675_vm6 }
 0x58e   :  { %vm6678_vm2 = vmmov %vm6675_vm6 }
 0x58f   :  { %vm6679_vm1 = vmmov %vm6678_vm2 }
 0x597   :  { %v3177_v18 = vpop.f32.mrf.mxu2 }
 0x598   :  { %v3208_v35 = vmul.f32 %v5895_v43, %v3177_v18 }
 0x59a   :  { %v3225_v20 = vadd.f32 %v5908_v12, %v3208_v35 }
 0x59c   :  { %v6382_v0 = vmax.f32 %v3225_v20, 0.0 }
 0x59e   :  { %v3282_v44 = vrot.slane %v6382_v0, 7  ;;  %v3415_v16 = vrot.slane %v6382_v0, 3  ;;  %v3381_v11 = vrot.slane %v6382_v0, 2  ;;  %v3517_v33 = vrot.slane %v6382_v0, 6 }
 0x59f   :  { %v3483_v25 = vrot.slane %v6382_v0, 5  ;;  %v3313_v41 = vsel %vm1168_vm11, %v6382_v0, %v3312_v28 }
 0x5a0   :  { %v3283_v3 = vsel %vm1168_vm11, %v3282_v44, %v6384_v4  ;;  %v3416_v54 = vsel %vm1168_vm11, %v3415_v16, %v3414_v50  ;;  %v3382_v30 = vsel %vm1168_vm11, %v3381_v11, %v3380_v62  ;;  %v3518_v55 = vsel %vm1168_vm11, %v3517_v33, %v3516_v22 }
 0x5a1   :  { %v3484_v6 = vsel %vm1168_vm11, %v3483_v25, %v3482_v59 }
 0x5ac   :  { %v6407_v37 = vpop.f32.mrf.mxu3 }
 0x5ae   :  { %v3180_v26 = vpop.f32.mrf.mxu2 }
 0x5af   :  { %v3209_v27 = vmul.f32 %v5895_v43, %v3180_v26 }
 0x5b1   :  { %v3226_v23 = vadd.f32 %v5908_v12, %v3209_v27 }
 0x5b3   :  { %v6391_v61 = vmax.f32 %v3226_v23, 0.0 }
 0x5b4   :  { %v6413_v51 = vpop.f32.mrf.mxu3 }
 0x5b5   :  { %v3284_v1 = vrot.slane %v6391_v61, 6  ;;  %v3417_v5 = vrot.slane %v6391_v61, 2  ;;  %v3383_v60 = vrot.slane %v6391_v61, 1  ;;  %v3314_v49 = vrot.slane %v6391_v61, 7 }
 0x5b6   :  { %v3519_v24 = vrot.slane %v6391_v61, 5  ;;  %v3485_v18 = vrot.slane %v6391_v61, 4 }
 0x5b7   :  { %v3285_v2 = vsel %vm1170_vm12, %v3284_v1, %v3283_v3  ;;  %v3418_v45 = vsel %vm1170_vm12, %v3417_v5, %v3416_v54  ;;  %v3384_v20 = vsel %vm1170_vm12, %v3383_v60, %v3382_v30  ;;  %v3315_v48 = vsel %vm1170_vm12, %v3314_v49, %v3313_v41 }
 0x5b8   :  { %v3520_v30 = vsel %vm1170_vm12, %v3519_v24, %v3518_v55 }
 0x5c0   :  { %v3183_v42 = vpop.f32.mrf.mxu2 }
 0x5c1   :  { %v3210_v7 = vmul.f32 %v5895_v43, %v3183_v42 }
 0x5c3   :  { %v3227_v15 = vadd.f32 %v5908_v12, %v3210_v7 }
 0x5c5   :  { %v6397_v38 = vmax.f32 %v3227_v15, 0.0 }
 0x5c7   :  { %v3286_v47 = vrot.slane %v6397_v38, 5  ;;  %v3419_v39 = vrot.slane %v6397_v38, 1  ;;  %v3316_v44 = vrot.slane %v6397_v38, 6  ;;  %v3521_v42 = vrot.slane %v6397_v38, 4 }
 0x5c9   :  { %v3287_v58 = vsel %vm1172_vm13, %v3286_v47, %v3285_v2  ;;  %v3385_v2 = vsel %vm1172_vm13, %v6397_v38, %v3384_v20  ;;  %v3420_v15 = vsel %vm1172_vm13, %v3419_v39, %v3418_v45  ;;  %v3522_v45 = vsel %vm1172_vm13, %v3521_v42, %v3520_v30 }
 0x5d7   :  { %v3186_v53 = vpop.f32.mrf.mxu2 }
 0x5d8   :  { %v3211_v10 = vmul.f32 %v5895_v43, %v3186_v53 }
 0x5da   :  { %v3228_v13 = vadd.f32 %v5908_v12, %v3211_v10  ;;  %v3317_v10 = vsel %vm1172_vm13, %v3316_v44, %v3315_v48 }
 0x5dc   :  { %v6403_v19 = vmax.f32 %v3228_v13, 0.0 }
 0x5de   :  { %v3288_v36 = vrot.slane %v6403_v19, 4  ;;  %v3386_v27 = vrot.slane %v6403_v19, 7  ;;  %v3318_v23 = vrot.slane %v6403_v19, 5  ;;  %v3523_v13 = vrot.slane %v6403_v19, 3 }
 0x5e0   :  { %v3289_v34 = vsel %vm6675_vm6, %v3288_v36, %v3287_v58  ;;  %v3487_v58 = vrot.slane %v6397_v38, 3  ;;  %v3524_v20 = vsel %vm6679_vm1, %v3523_v13, %v3522_v45  ;;  %vm6680_vm6 = vmmov %vm6679_vm1  ;;  %v39_v45 = vld [vmem:[%s6631_s7 + $0x40] sm:$0x3] }
 0x5ee   :  { %v3189_v32 = vpop.f32.mrf.mxu2 }
 0x5ef   :  { %v3212_v14 = vmul.f32 %v5895_v43, %v3189_v32  ;;  %v3319_v32 = vsel %vm6678_vm2, %v3318_v23, %v3317_v10 }
 0x5f1   :  { %v3229_v9 = vadd.f32 %v5908_v12, %v3212_v14  ;;  %v3489_v14 = vrot.slane %v6403_v19, 2 }
 0x5f3   :  { %v6411_v52 = vmax.f32 %v3229_v9, 0.0 }
 0x5f5   :  { %v3290_v31 = vrot.slane %v6411_v52, 3  ;;  %v3422_v26 = vrot.slane %v6411_v52, 7  ;;  %v3320_v47 = vrot.slane %v6411_v52, 4  ;;  %v3525_v49 = vrot.slane %v6411_v52, 2 }
 0x5f6   :  { %v3491_v41 = vrot.slane %v6411_v52, 1 }
 0x5f7   :  { %v6417_v57 = vsel %vm3274_vm4, %v3290_v31, %v3289_v34  ;;  %v3387_v34 = vsel %vm6677_vm15, %v3386_v27, %v3385_v2  ;;  %v3321_v50 = vsel %vm3274_vm4, %v3320_v47, %v3319_v32  ;;  %v3526_v55 = vsel %vm3274_vm4, %v3525_v49, %v3524_v20  ;;  %vm6682_vm15 = vmmov %vm6679_vm1 }
 0x5f8   :  { %v3347_v27 = vrot.slane %v6382_v0, 1  ;;  %v3346_v2 = vrot.slane %v6384_v4, 2  ;;  %v3451_v32 = vrot.slane %v6391_v61, 3  ;;  %v3617_v20 = vrot.slane %v39_v45, 1 }
 0x5fa   :  { %v3348_v42 = vsel %vm1168_vm11, %v3347_v27, %v3346_v2 }
 0x5fb   :  { %v3349_v47 = vsel %vm1170_vm12, %v6391_v61, %v3348_v42 }
 0x5fe   :  { %v6419_v21 = vpop.f32.mrf.mxu3 }
 0x606   :  { %v6421_v56 = vpop.f32.mrf.mxu3 }
 0x60e   :  { %v3195_v46 = vpop.f32.mrf.mxu3 }
 0x60f   :  { %v3214_v17 = vmul.f32 %v5895_v43, %v3195_v46  ;;  %v3192_v40 = vpop.f32.mrf.mxu2 }
 0x610   :  { %v3213_v35 = vmul.f32 %v5895_v43, %v3192_v40  ;;  %v3388_v43 = vrot.slane %v6411_v52, 6  ;;  %v3486_v40 = vsel %vm1170_vm12, %v3485_v18, %v3484_v6 }
 0x611   :  { %v3231_v3 = vadd.f32 %v5908_v12, %v3214_v17  ;;  %v3488_v39 = vsel %vm1172_vm13, %v3487_v58, %v3486_v40 }
 0x612   :  { %v3230_v1 = vadd.f32 %v5908_v12, %v3213_v35  ;;  %v3421_v12 = vsel %vm6676_vm9, %v6403_v19, %v3420_v15  ;;  %v3389_v31 = vsel %vm3274_vm4, %v3388_v43, %v3387_v34  ;;  %v3490_v48 = vsel %vm6680_vm6, %v3489_v14, %v3488_v39  ;;  %vm6681_vm9 = vmmov %vm6679_vm1  ;;  %v37_v39 = vld [vmem:[%s6631_s7 + $0x30] sm:$0xff] }
 0x613   :  { %v6459_v7 = vmax.f32 %v3231_v3, 0.0  ;;  %v3423_v36 = vsel %vm3274_vm4, %v3422_v26, %v3421_v12  ;;  %v3492_v24 = vsel %vm3274_vm4, %v3491_v41, %v3490_v48  ;;  %v3350_v43 = vrot.slane %v6397_v38, 7 }
 0x614   :  { %v6464_v53 = vmax.f32 %v3230_v1, 0.0  ;;  %v3354_v15 = vrot.slane %v6411_v52, 5  ;;  %v3613_v48 = vrot.slane %v37_v39, 1 }
 0x615   :  { %v3426_v33 = vrot.slane %v6459_v7, 5  ;;  %v3392_v25 = vrot.slane %v6459_v7, 4  ;;  %v3324_v5 = vrot.slane %v6459_v7, 2  ;;  %v3494_v6 = vrot.slane %v6459_v7, 7 }
 0x616   :  { %v3424_v9 = vrot.slane %v6464_v53, 6  ;;  %v3390_v16 = vrot.slane %v6464_v53, 5  ;;  %v3322_v11 = vrot.slane %v6464_v53, 3  ;;  %v3527_v17 = vrot.slane %v6464_v53, 1 }
 0x617   :  { %v3292_v35 = vrot.slane %v6464_v53, 2  ;;  %v3493_v3 = vsel %vm3277_vm14, %v6464_v53, %v3492_v24  ;;  %v3356_v58 = vrot.slane %v6464_v53, 4  ;;  %v3351_v12 = vsel %vm1172_vm13, %v3350_v43, %v3349_v47 }
 0x618   :  { %v3425_v62 = vsel %vm3277_vm14, %v3424_v9, %v3423_v36  ;;  %v3391_v28 = vsel %vm3277_vm14, %v3390_v16, %v3389_v31  ;;  %v3323_v60 = vsel %vm3277_vm14, %v3322_v11, %v3321_v50  ;;  %v3528_v44 = vsel %vm3277_vm14, %v3527_v17, %v3526_v55 }
 0x619   :  { %v3427_v22 = vsel %vm3280_vm8, %v3426_v33, %v3425_v62  ;;  %v3393_v59 = vsel %vm3280_vm8, %v3392_v25, %v3391_v28  ;;  %v3325_v54 = vsel %vm3280_vm8, %v3324_v5, %v3323_v60  ;;  %v3293_v18 = vsel %vm3277_vm14, %v3292_v35, %v6417_v57  ;;  %v3361_v5 = vpop.permute.xlu0 %3360  ;;  %v3429_v62 = vpop.permute.xlu2 %3428 }
 0x61a   :  { %3430 = vrot.lane.b32.xlu1 %v3427_v22, %s3798_s22  ;;  %3396 = vrot.lane.b32.xlu0 %v3393_v59, %s3795_s11  ;;  %v3781_v46 = vpack.i.bf16 %v3325_v54, %v6233_v29  ;;  %v3294_v29 = vrot.slane %v6459_v7, 1  ;;  %v3529_v23 = vsel %vm3280_vm8, %v6459_v7, %v3528_v44  ;;  %v3495_v1 = vsel %vm3280_vm8, %v3494_v6, %v3493_v3  ;;  %v3395_v28 = vpop.permute.xlu1 %3394 }
 0x61b   :  { %v3352_v57 = vrot.slane %v6403_v19, 6  ;;  %v3449_v36 = vrot.slane %v6382_v0, 4  ;;  %v3358_v14 = vrot.slane %v6459_v7, 3  ;;  %v3453_v9 = vrot.slane %v6397_v38, 2 }
 0x61c   :  { %3782 = vrot.lane.b32.xlu2 %v3781_v46, %s3796_s12  ;;  %v6512_v26 = vsel %vm3280_vm8, %v3294_v29, %v3293_v18  ;;  %v3455_v31 = vrot.slane %v6403_v19, 1  ;;  %v3458_v33 = vrot.slane %v6464_v53, 7  ;;  %v3460_v19 = vrot.slane %v6459_v7, 6  ;;  %v36_v29 = vld [vmem:[%s6631_s7 + $0x28] sm:$0xff] }
 0x61d   :  { %v3353_v10 = vsel %vm6681_vm9, %v3352_v57, %v3351_v12  ;;  %v3611_v24 = vrot.slane %v36_v29, 1 }
 0x61e   :  { %v3355_v13 = vsel %vm3274_vm4, %v3354_v15, %v3353_v10 }
 0x61f   :  { %v3357_v34 = vsel %vm3277_vm14, %v3356_v58, %v3355_v13  ;;  %v3614_v44 = vsel %vm243_vm0, %v3611_v24, %v3613_v48 }
 0x620   :  { %v3359_v16 = vsel %vm3280_vm8, %v3358_v14, %v3357_v34 }
 0x621   :  { %v3463_v60 = vpop.permute.xlu0 %3462 }
 0x622   :  { %3532 = vrot.lane.b32.xlu1 %v3529_v23, %s3802_s30  ;;  %3498 = vrot.lane.b32.xlu0 %v3495_v1, %s3800_s26  ;;  %v3497_v59 = vpop.permute.xlu1 %3496 }
 0x624   :  { %3530 = vrot.lane.b32.xlu2 %v6221_v8, %s3802_s30  ;;  %v3448_v8 = vrot.slane %v6384_v4, 5 }
 0x626   :  { %v3450_v11 = vsel %vm1168_vm11, %v3449_v36, %v3448_v8  ;;  %vm6683_vm11 = vcmask 31744  }
 0x627   :  { %v3452_v0 = vsel %vm1170_vm12, %v3451_v32, %v3450_v11  ;;  %vm6684_vm12 = vcmask 97280  }
 0x628   :  { %v3454_v61 = vsel %vm1172_vm13, %v3453_v9, %v3452_v0  ;;  %vm6685_vm13 = vcmask 162816  }
 0x629   :  { %v3456_v25 = vsel %vm6682_vm15, %v3455_v31, %v3454_v61  ;;  %v3551_v17 = vpop.permute.xlu0 %3550  ;;  %vm6689_vm2 = vmmov %vm6685_vm13  ;;  %v3604_v31 = vperm.slane %v39_v45, 1 }
 0x62a   :  { %v3457_v4 = vsel %vm3274_vm4, %v6411_v52, %v3456_v25  ;;  %vm6686_vm4 = vcmask 228352   ;;  %v3553_v55 = vpop.permute.xlu1 %3552 }
 0x62b   :  { %v3459_v38 = vsel %vm3277_vm14, %v3458_v33, %v3457_v4  ;;  %vm6687_vm14 = vmmov %vm6683_vm11 }
 0x62c   :  { %3362 = vrot.lane.b32.xlu2 %v3359_v16, %s3799_s23  ;;  %v3461_v50 = vsel %vm3280_vm8, %v3460_v19, %v3459_v38  ;;  %vm6688_vm8 = vmmov %vm6684_vm12 }
 0x62d   :  { %vm6690_vm1 = vmmov %vm6686_vm4 }
 0x634   :  { %3464 = vrot.lane.b32.xlu2 %v3461_v50, %s3797_s17 }
 0x676   :  { %v3783_v53 = vpop.permute.xlu2 %3782 }
 0x677   :  { %v3784_v49 = vunpack.i.l.bf16 %v3783_v53  ;;  %v3785_v27 = vunpack.i.h.bf16 %v3783_v53 }
 0x679   :  { %v3536_v22 = vsel %vm6683_vm11, %v6237_v63, %v3784_v49  ;;  %v38_v63 = vld [vmem:[%s6631_s7 + $0x38] sm:$0xff]  ;;  %v3537_v23 = vsel %vm6687_vm14, %v6512_v26, %v3785_v27  ;;  %v35_v26 = vld [vmem:[%s6631_s7 + $0x20] sm:$0xff] }
 0x67a   :  { %v3538_v52 = vsel %vm753_vm3, %v3536_v22, %v3361_v5  ;;  %v3615_v35 = vrot.slane %v38_v63, 1  ;;  %v3610_v36 = vrot.slane %v35_v26, 1  ;;  %v2338_v19 = vperm.slane %v35_v26, 0 }
 0x67b   :  { %v3540_v54 = vsel %vm6684_vm12, %v3538_v52, %v3395_v28 }
 0x67c   :  { %v3542_v7 = vsel %vm787_vm5, %v3540_v54, %v3429_v62  ;;  %v3618_v6 = vsel %vm243_vm0, %v3615_v35, %v3617_v20  ;;  %v3616_v18 = vsel %vm243_vm0, %v3613_v48, %v3615_v35  ;;  %v3612_v34 = vsel %vm243_vm0, %v3610_v36, %v3611_v24 }
 0x67d   :  { %v3544_v41 = vsel %vm6685_vm13, %v3542_v7, %v3463_v60  ;;  %3647 = vmatpush.msra.mxu3 %v3618_v6  ;;  %v2369_v50 = vadd.f32 %v6407_v37, %v2338_v19  ;;  %vm6695_vm0 = vcmask 785408   ;;  %v2378_v28 = vadd.f32 %v6421_v56, %v2338_v19 }
 0x67e   :  { %v3531_v46 = vpop.permute.xlu2 %3530  ;;  %v3546_v30 = vsel %vm821_vm7, %v3544_v41, %v3497_v59  ;;  %v2372_v60 = vadd.f32 %v6413_v51, %v2338_v19  ;;  %vm6697_vm15 = vmmov %vm6695_vm0  ;;  %v2375_v56 = vadd.f32 %v6419_v21, %v2338_v19 }
 0x67f   :  { %v3548_v40 = vsel %vm6686_vm4, %v3546_v30, %v3531_v46  ;;  %3648 = vmatpush.msra.mxu3 %v3616_v18  ;;  %vm6698_vm11 = vmmov %vm6695_vm0 }
 0x680   :  { %3573 = vmatpush.msrb.mxu1 %v3548_v40 }
 0x681   :  { %3747 = vmatmul.msk.f32.vlgmr.msrb.gmra.mxu1 %vm753_vm3, %v3551_v17  ;;  %3649 = vmatpush.msra.mxu3 %v3614_v44 }
 0x683   :  { %3650 = vmatpush.msra.mxu3 %v3612_v34 }
 0x686   :  { %v3363_v3 = vpop.permute.xlu2 %3362 }
 0x687   :  { %v3539_v43 = vsel %vm753_vm3, %v3537_v23, %v3363_v3 }
 0x689   :  { %3748 = vmatmul.msk.f32.gmra.mxu1 %vm753_vm3, %v3553_v55 }
 0x68c   :  { %v3431_v1 = vpop.permute.xlu1 %3430  ;;  %v3397_v2 = vpop.permute.xlu0 %3396 }
 0x68d   :  { %v3541_v57 = vsel %vm6688_vm8, %v3539_v43, %v3397_v2 }
 0x68e   :  { %v3465_v42 = vpop.permute.xlu2 %3464  ;;  %v3543_v15 = vsel %vm787_vm5, %v3541_v57, %v3431_v1  ;;  %vm6691_vm5 = vcmask 261120  }
 0x68f   :  { %v3545_v47 = vsel %vm6689_vm2, %v3543_v15, %v3465_v42  ;;  %vm6693_vm6 = vmmov %vm6691_vm5 }
 0x690   :  { %vm6694_vm9 = vmmov %vm6691_vm5 }
 0x694   :  { %v3533_v58 = vpop.permute.xlu1 %3532  ;;  %v3499_v12 = vpop.permute.xlu0 %3498 }
 0x695   :  { %v3547_v10 = vsel %vm821_vm7, %v3545_v47, %v3499_v12  ;;  %vm6692_vm7 = vmmov %vm6691_vm5 }
 0x696   :  { %v3549_v13 = vsel %vm6690_vm1, %v3547_v10, %v3533_v58 }
 0x697   :  { %3596 = vmatpush.msra.mxu1 %v3549_v13 }
 0x698   :  { %3749 = vmatmul.msk.f32.vlgmr.msra.gmra.mxu1 %vm753_vm3, %v3551_v17 }
 0x6a0   :  { %3750 = vmatmul.msk.f32.gmra.mxu1 %vm753_vm3, %v3553_v55  ;;  %vm6696_vm3 = vmmov %vm6695_vm0 }
 0x6fe   :  { %v3575_v32 = vpop.f32.mrf.mxu1 }
 0x6ff   :  { %3751 = vmatmul.msk.f32.vlgmr.msra.gmra.mxu3 %vm6691_vm5, %v3575_v32 }
 0x706   :  { %v3578_v14 = vpop.f32.mrf.mxu1 }
 0x707   :  { %3752 = vmatmul.msk.f32.gmra.mxu3 %vm6692_vm7, %v3578_v14 }
 0x715   :  { %v3598_v8 = vpop.f32.mrf.mxu1 }
 0x716   :  { %3753 = vmatmul.msk.f32.gmra.mxu3 %vm6693_vm6, %v3598_v8 }
 0x71d   :  { %v3601_v9 = vpop.f32.mrf.mxu1 }
 0x71e   :  { %3754 = vmatmul.msk.f32.gmra.mxu3 %vm6694_vm9, %v3601_v9 }
 0x782   :  { %v3652_v16 = vpop.f32.mrf.mxu3 }
 0x783   :  { %v3653_v11 = vadd.f32 %v3652_v16, %v3604_v31 }
 0x785   :  { %3668 = vrot.lane.b32.xlu2 %v3653_v11, %s3805_s15 }
 0x78a   :  { %v3655_v0 = vpop.f32.mrf.mxu3 }
 0x78b   :  { %v3656_v33 = vadd.f32 %v3655_v0, %v3604_v31 }
 0x78d   :  { %3670 = vrot.lane.b32.xlu0 %v3656_v33, %s3805_s15 }
 0x799   :  { %v3658_v61 = vpop.f32.mrf.mxu3 }
 0x79a   :  { %v3659_v25 = vadd.f32 %v3658_v61, %v3604_v31 }
 0x79c   :  { %3672 = vrot.lane.b32.xlu1 %v3659_v25, %s3805_s15 }
 0x7a1   :  { %v3661_v4 = vpop.f32.mrf.mxu3 }
 0x7a2   :  { %v3662_v38 = vadd.f32 %v3661_v4, %v3604_v31 }
 0x7a4   :  { %3674 = vrot.lane.b32.xlu2 %v3662_v38, %s3805_s15 }
 0x7df   :  { %v3669_v5 = vpop.permute.xlu2 %3668 }
 0x7e0   :  { %v3680_v62 = vsel %vm1653_vm10, %v2369_v50, %v3669_v5 }
 0x7e1   :  { %3684 = vst.msk [vmem:[%s6632_s8] sm:$0xff] %vm6695_vm0, %v3680_v62 }
 0x7fe   :  { %v3675_v53 = vpop.permute.xlu2 %3674 }
 0x7ff   :  { %v3683_v49 = vsel %vm1653_vm10, %v2378_v28, %v3675_v53  ;;  %v3671_v22 = vpop.permute.xlu0 %3670 }
 0x800   :  { %3687 = vst.msk [vmem:[%s6632_s8 + $0x18] sm:$0xff] %vm6696_vm3, %v3683_v49  ;;  %v3681_v37 = vsel %vm1653_vm10, %v2372_v60, %v3671_v22 }
 0x801   :  { %3685 = vst.msk [vmem:[%s6632_s8 + $0x8] sm:$0xff] %vm6697_vm15, %v3681_v37 }
 0x80e   :  { %v3673_v59 = vpop.permute.xlu1 %3672 }
 0x80f   :  { %v3682_v51 = vsel %vm1653_vm10, %v2375_v56, %v3673_v59 }
 0x810   :  { %3686 = vst.msk [vmem:[%s6632_s8 + $0x10] sm:$0xff] %vm6698_vm11, %v3682_v51 }

</bundles_post_ra>
